<compile_context>
chip_gen: v6e
topology: v6e:2x2x1
jax: 0.10.0
libtpu: 0.0.40
codegen_flags: <defaults>
</compile_context>

<pallas_src>
import numpy as np
import jax
import jax.numpy as jnp
from jax.experimental import pallas as pl
from jax.experimental.pallas import tpu as pltpu

MIN_DEG = 0
MAX_DEG = 6
N_FREQS = MAX_DEG - MIN_DEG + 1            # 7
SCALE = 0.1

_DIRS_FLAT = [
    0.8506508, 0, 0.5257311, 0.809017, 0.5, 0.309017, 0.5257311, 0.8506508, 0,
    1, 0, 0, 0.809017, 0.5, -0.309017, 0.8506508, 0, -0.5257311, 0.309017,
    0.809017, -0.5, 0, 0.5257311, -0.8506508, 0.5, 0.309017, -0.809017, 0, 1, 0,
    -0.5257311, 0.8506508, 0, -0.309017, 0.809017, -0.5, 0, 0.5257311,
    0.8506508, -0.309017, 0.809017, 0.5, 0.309017, 0.809017, 0.5, 0.5, 0.309017,
    0.809017, 0.5, -0.309017, 0.809017, 0, 0, 1, -0.5, 0.309017, 0.809017,
    -0.809017, 0.5, 0.309017, -0.809017, 0.5, -0.309017,
]
assert len(_DIRS_FLAT) % 3 == 0
N_DIRS = len(_DIRS_FLAT) // 3              # 21  (derived, not hard-coded)
XB_SIZE = N_DIRS * N_FREQS                 # 147
EMB_SIZE = 2 * XB_SIZE + 3                 # 297


def _fold_weights():
    """W[:, i*7 + j] = scale * dirs[:, i] * 2**j  -> xb = x @ W (same column
    ordering as the torch reshape of proj[..., None] * freqs)."""
    dirs = np.asarray(_DIRS_FLAT, np.float64).reshape(-1, 3).T          # (3, 21)
    freqs = 2.0 ** np.linspace(MIN_DEG, MAX_DEG, N_FREQS)               # (7,)
    w = SCALE * dirs[:, :, None] * freqs[None, None, :]                 # (3, 21, 7)
    return w.reshape(3, XB_SIZE).astype(np.float32)                     # (3, 147)


def _pe_kernel(x_ref, w_ref, out_ref):
    # x_ref:   (tile_n, 3)    float32 input points
    # w_ref:   (3, 147)       folded scale*dirs*freq matrix
    # out_ref: (tile_n, 297)  [x*scale | sin(xb) | cos(xb)]
    x = x_ref[...]                                                       # (tn, 3)
    # Tiny-K projection on the MXU (vector-extended slot; keeps VALU free for
    # the sin/cos polynomials, which are the nearly-saturated slot).
    xb = jnp.dot(x, w_ref[...], preferred_element_type=jnp.float32)     # (tn, 147)
    out = jnp.concatenate([x * SCALE, jnp.sin(xb), jnp.cos(xb)], axis=-1)
    out_ref[...] = out.astype(out_ref.dtype)


def positional_encoding(x, tile_n=1024):
    """x: (..., 3) float array -> (..., 297) icosahedron positional encoding."""
    orig_shape = x.shape
    assert orig_shape[-1] == 3, "PositionalEncoding expects (..., 3) input"
    xf = x.reshape(-1, 3)
    if xf.dtype != jnp.float32:
        xf = xf.astype(jnp.float32)
    n = xf.shape[0]

    # Tile selection: large tiles amortize the ~0.35us/step pipeline overhead,
    # but keep >= 2 grid steps when possible so both TensorCores get work (v7x).
    half_n = ((((n + 1) // 2) + 7) // 8) * 8          # ceil(n/2) rounded up to 8
    tile = max(8, min(int(tile_n), half_n))
    grid = (pl.cdiv(n, tile),)                        # partial edge block is clipped

    w = jnp.asarray(_fold_weights())                  # (3, 147)

    out = pl.pallas_call(
        _pe_kernel,
        out_shape=jax.ShapeDtypeStruct((n, EMB_SIZE), jnp.float32),
        grid=grid,
        in_specs=[
            pl.BlockSpec((tile, 3), lambda i: (i, 0)),
            pl.BlockSpec((3, XB_SIZE), lambda i: (0, 0)),
        ],
        out_specs=pl.BlockSpec((tile, EMB_SIZE), lambda i: (i, 0)),
        compiler_params=pltpu.CompilerParams(
            dimension_semantics=("parallel",)),
    )(xf, w)

    return out.reshape(*orig_shape[:-1], EMB_SIZE)


def _reference(x):
    """float64 numpy ground truth mirroring the PyTorch forward."""
    x64 = np.asarray(x, np.float64)
    dirs = np.asarray(_DIRS_FLAT, np.float64).reshape(-1, 3).T           # (3, 21)
    freqs = 2.0 ** np.linspace(MIN_DEG, MAX_DEG, N_FREQS)                # (7,)
    x_s = x64 * SCALE
    proj = x_s @ dirs                                                     # (..., 21)
    xb = (proj[..., None] * freqs).reshape(*proj.shape[:-1], -1)          # (..., 147)
    emb = np.sin(np.concatenate([xb, xb + 0.5 * np.pi], axis=-1))         # (..., 294)
    return np.concatenate([x_s, emb], axis=-1)                            # (..., 297)


if __name__ == "__main__":
    key = jax.random.PRNGKey(0)
    x = jax.random.normal(key, (2, 128, 3), dtype=jnp.float32)  # (batch, points, 3)

    out = positional_encoding(x)
    out = jax.block_until_ready(out)

    ref = _reference(x)
    assert out.shape == (2, 128, EMB_SIZE), out.shape
    np.testing.assert_allclose(np.asarray(out, np.float64), ref, rtol=1e-4, atol=1e-4)

    print("KERNEL_OK")
</pallas_src>

<mosaic_0001>
module attributes {stable_mosaic.version = 11 : i64} {
  func.func @_pe_kernel(%arg0: i32, %arg1: memref<128x3xf32, #tpu.memory_space<vmem>>, %arg2: memref<3x147xf32, #tpu.memory_space<vmem>>, %arg3: memref<128x297xf32, #tpu.memory_space<vmem>>) attributes {dimension_semantics = [#tpu.dimension_semantics<parallel>], iteration_bounds = array<i64: 2>, scalar_prefetch = 0 : i64, scratch_operands = 0 : i64, tpu.core_type = #tpu.core_type<tc>, window_params = [{transform_indices = @transform_0, window_bounds = array<i64: 128, 3>}, {pipeline_mode = #tpu.pipeline_mode<synchronous>, transform_indices = @transform_1, window_bounds = array<i64: 3, 147>}, {transform_indices = @transform_2, window_bounds = array<i64: 128, 297>}]} {
    %c0 = arith.constant 0 : index
    %c0_0 = arith.constant 0 : index
    %0 = vector.load %arg1[%c0, %c0_0] : memref<128x3xf32, #tpu.memory_space<vmem>>, vector<128x3xf32>
    %c0_1 = arith.constant 0 : index
    %c0_2 = arith.constant 0 : index
    %1 = vector.load %arg2[%c0_1, %c0_2] : memref<3x147xf32, #tpu.memory_space<vmem>>, vector<3x147xf32>
    %cst = arith.constant dense<0.000000e+00> : vector<128x147xf32>
    %2 = tpu.matmul %0, %1, %cst {dimension_numbers = #tpu.dot_dimension_numbers<[1], [0], [0], [1], [0, 0, 1, 1], [], []>} : vector<128x3xf32>, vector<3x147xf32>, vector<128x147xf32> -> vector<128x147xf32>
    %cst_3 = arith.constant 1.000000e-01 : f32
    %3 = vector.broadcast %cst_3 : f32 to vector<128x3xf32>
    %4 = arith.mulf %0, %3 : vector<128x3xf32>
    %5 = math.sin %2 : vector<128x147xf32>
    %6 = math.cos %2 : vector<128x147xf32>
    %7 = tpu.concatenate %4, %5, %6 in 1 : vector<128x3xf32>, vector<128x147xf32>, vector<128x147xf32> -> vector<128x297xf32>
    %c0_4 = arith.constant 0 : index
    %c0_5 = arith.constant 0 : index
    %8 = vector.load %arg3[%c0_4, %c0_5] : memref<128x297xf32, #tpu.memory_space<vmem>>, vector<128x297xf32>
    tpu.vector_store %arg3[%c0_4, %c0_5], %7 {strides = array<i32>} : memref<128x297xf32, #tpu.memory_space<vmem>>, vector<128x297xf32>,
    return
  }
  func.func @transform_0(%arg0: i32) -> (i32, i32) {
    %c0_i32 = arith.constant 0 : i32
    %c0_i32_0 = arith.constant 0 : i32
    return %arg0, %c0_i32 : i32, i32
  }
  func.func @transform_1(%arg0: i32) -> (i32, i32) {
    %c0_i32 = arith.constant 0 : i32
    %c0_i32_0 = arith.constant 0 : i32
    %c0_i32_1 = arith.constant 0 : i32
    return %c0_i32, %c0_i32_0 : i32, i32
  }
  func.func @transform_2(%arg0: i32) -> (i32, i32) {
    %c0_i32 = arith.constant 0 : i32
    %c0_i32_0 = arith.constant 0 : i32
    return %arg0, %c0_i32 : i32, i32
  }
}

</mosaic_0001>

<bundles_post_ra>
// kernel: tpu_custom_call.1
= control target key start
LH: loop header
LB: loop body
LE: loop exit
PB: predicated region body
PF: predicated region fallthrough
CT: control target
= control target key end

     0   :  { %s8055_s9 = smov 0   ;;  %s11828_s0 = inlined_call_operand.vmem [shape: f32[256,3], index: 0, kind: input, shape index: {}]   ;;  %s11829_s1 = inlined_call_operand.vmem [shape: f32[3,147], index: 1, kind: input, shape index: {}]   ;;  %s11830_s2 = inlined_call_operand.vmem [shape: f32[256,297], index: 2, kind: output, shape index: {}]  }
   0x1 LB: > { %s7451_s10 = sadd.s32 4294967295, %s8029_s9   ;;  %p7455_p0 = scmp.ge.s32.totalorder %s8029_s9, 1  ;;  %s8029_s9 = sphi %s8055_s9, %s12_s9  }
   0x2   : > { %p113_p1 = scmp.lt.s32.totalorder %s8029_s9, 3 }
   0x4   : > { %p114_p2 = pnand %p7455_p0, %p113_p1 }
   0x6   : > { %117 = sbr.rel (%p114_p2) target bundleno = 1222 (0x4c6), region = 28 }
   0xb   : > { %v165_v0 = vld [vmem:[%s11829_s1] sm:$0x77]  ;;  %vm217_vm0 = vcmask 1042432   ;;  %s7456_s13 = sshll.u32 %s7451_s10, 4  ;;  %v8031_v2 = vmov 0.0   ;;  %vm11876_vm1 = vcmask 23552  }
   0xc   : > { %v167_v1 = vcombine.high %v165_v0, %v165_v0  ;;  %286 = vmatprep.mubr.f32.mxu0 %v8031_v2  ;;  %334 = vmatprep.mubr.f32.mxu1 %v8031_v2  ;;  %p137_p3 = scmp.lt.s32.totalorder %s7456_s13, 31  ;;  %v11849_v50 = vmov 683565275   ;;  %v11846_v52 = vmov 2475754826   ;;  %s8038_s18 = smov 3  }
   0xd   : > { %v11841_v54 = vmov 2131351028   ;;  %v11844_v56 = vmov 2102212464   ;;  %v11838_v58 = vmov 920167782  }
   0xe   : > { %7460 = vmatprep.subr.msk.mxu0 %vm217_vm0, %v167_v1  ;;  %7736 = vmatprep.subr.msk.mxu1 %vm217_vm0, %v167_v1  ;;  %s12538_s13 = smov (!%p137_p3, %s7456_s13), 31  ;;  %s8039_s19 = smov 22  }
   0xf   : > { %7461 = vmatpush1.msk.msra.mxu0 %vm217_vm0, %v165_v0  ;;  %7737 = vmatpush1.msk.msra.mxu1 %vm217_vm0, %v165_v0  ;;  %s7457_s14 = sshll.u32 %s12538_s13, 3  ;;  %s7738_s20 = smul.u32 24, %s12538_s13 }
  0x10   : > { %s8072_s17 = scalar_lea.vmem %s11828_s0, %s7457_s14 }
  0x11   : > { %v8075_v3 = vld [vmem:[%s8072_s17] sm:$0xff]  ;;  %v8085_v5 = vld [vmem:[%s8072_s17 + $0x8] sm:$0xff]  ;;  %v8095_v7 = vld [vmem:[%s8072_s17 + $0x10] sm:$0xff]  ;;  %s11547_s23 = scalar_lea.vmem %s11830_s2, %s7738_s20 }
  0x12   : > { %v8078_v4 = vld [vmem:[%s8072_s17 + $0x40] sm:$0xff]  ;;  %7462 = vmatmul.mubr.msk.f32.vlgmr.msra.gmra.mxu0 %vm11876_vm1, %v8075_v3  ;;  %v8088_v6 = vld [vmem:[%s8072_s17 + $0x48] sm:$0xff]  ;;  %v8098_v8 = vld [vmem:[%s8072_s17 + $0x50] sm:$0xff] }
  0x13   : > { %7470 = vmatmul.mubr.msk.f32.vlgmr.msra.gmra.mxu1 %vm11876_vm1, %v8078_v4  ;;  %292 = vmatprep.mubr.f32.mxu0 %v8031_v2  ;;  %v152_v9 = vld [vmem:[%s8072_s17 + $0x18] sm:$0xff]  ;;  %v153_v11 = vld [vmem:[%s8072_s17 + $0x20] sm:$0xff]  ;;  %v154_v13 = vld [vmem:[%s8072_s17 + $0x28] sm:$0xff] }
  0x14   : > { %340 = vmatprep.mubr.f32.mxu1 %v8031_v2  ;;  %v160_v10 = vld [vmem:[%s8072_s17 + $0x58] sm:$0xff]  ;;  %v161_v12 = vld [vmem:[%s8072_s17 + $0x60] sm:$0xff]  ;;  %v162_v14 = vld [vmem:[%s8072_s17 + $0x68] sm:$0xff] }
  0x15   : > { %v155_v15 = vld [vmem:[%s8072_s17 + $0x30] sm:$0xff]  ;;  %v156_v17 = vld [vmem:[%s8072_s17 + $0x38] sm:$0xff] }
  0x16   : > { %7463 = vmatmul.mubr.msk.f32.gmra.mxu0 %vm11876_vm1, %v8085_v5  ;;  %v163_v16 = vld [vmem:[%s8072_s17 + $0x70] sm:$0xff]  ;;  %v164_v18 = vld [vmem:[%s8072_s17 + $0x78] sm:$0xff] }
  0x17   : > { %7471 = vmatmul.mubr.msk.f32.gmra.mxu1 %vm11876_vm1, %v8088_v6  ;;  %298 = vmatprep.mubr.f32.mxu0 %v8031_v2 }
  0x18   : > { %346 = vmatprep.mubr.f32.mxu1 %v8031_v2 }
  0x1a   : > { %7464 = vmatmul.mubr.msk.f32.gmra.mxu0 %vm11876_vm1, %v8095_v7 }
  0x1b   : > { %7472 = vmatmul.mubr.msk.f32.gmra.mxu1 %vm11876_vm1, %v8098_v8  ;;  %304 = vmatprep.mubr.f32.mxu0 %v8031_v2 }
  0x1c   : > { %352 = vmatprep.mubr.f32.mxu1 %v8031_v2 }
  0x1e   : > { %7465 = vmatmul.mubr.msk.f32.gmra.mxu0 %vm11876_vm1, %v152_v9  ;;  %v11836_v9 = vmov 1326507024  }
  0x1f   : > { %7473 = vmatmul.mubr.msk.f32.gmra.mxu1 %vm11876_vm1, %v160_v10  ;;  %310 = vmatprep.mubr.f32.mxu0 %v8031_v2 }
  0x20   : > { %358 = vmatprep.mubr.f32.mxu1 %v8031_v2 }
  0x22   : > { %7466 = vmatmul.mubr.msk.f32.gmra.mxu0 %vm11876_vm1, %v153_v11 }
  0x23   : > { %7474 = vmatmul.mubr.msk.f32.gmra.mxu1 %vm11876_vm1, %v161_v12  ;;  %316 = vmatprep.mubr.f32.mxu0 %v8031_v2 }
  0x24   : > { %364 = vmatprep.mubr.f32.mxu1 %v8031_v2 }
  0x26   : > { %7467 = vmatmul.mubr.msk.f32.gmra.mxu0 %vm11876_vm1, %v154_v13 }
  0x27   : > { %7475 = vmatmul.mubr.msk.f32.gmra.mxu1 %vm11876_vm1, %v162_v14  ;;  %322 = vmatprep.mubr.f32.mxu0 %v8031_v2 }
  0x28   : > { %370 = vmatprep.mubr.f32.mxu1 %v8031_v2 }
  0x2a   : > { %7468 = vmatmul.mubr.msk.f32.gmra.mxu0 %vm11876_vm1, %v155_v15 }
  0x2b   : > { %7476 = vmatmul.mubr.msk.f32.gmra.mxu1 %vm11876_vm1, %v163_v16  ;;  %328 = vmatprep.mubr.f32.mxu0 %v8031_v2 }
  0x2c   : > { %376 = vmatprep.mubr.f32.mxu1 %v8031_v2 }
  0x2e   : > { %7469 = vmatmul.mubr.msk.f32.gmra.mxu0 %vm11876_vm1, %v156_v17 }
  0x2f   : > { %7477 = vmatmul.mubr.msk.f32.gmra.mxu1 %vm11876_vm1, %v164_v18 }
  0xd2   : > { %v8124_v19 = vpop.f32.mrf.mxu0 }
  0xd3   : > { %v8126_v20 = vpop.f32.mrf.mxu1  ;;  %v11835_v21 = vand.u32 2147483647, %v8124_v19  ;;  %v402_v22 = vand.u32 2139095040, %v8124_v19 }
  0xd4   : > { %12025 = vst [vmem:[#allocation2_spill] sm:$0xff] %v8126_v20  ;;  %v11834_v23 = vand.u32 2147483647, %v8126_v20  ;;  %v2066_v24 = vand.u32 2139095040, %v8126_v20  ;;  %v8132_v25 = vpop.f32.mrf.mxu0 }
  0xd5   : > { %12026 = vst [vmem:[#allocation3_spill] sm:$0xff] %v8132_v25  ;;  %v403_v26 = vshrl.u32 %v402_v22, 23  ;;  %v406_v27 = vand.u32 8388607, %v11835_v21  ;;  %v506_v30 = vand.u32 2139095040, %v8132_v25  ;;  %v8139_v38 = vpop.f32.mrf.mxu1 }
  0xd6   : > { %v2067_v28 = vshrl.u32 %v2066_v24, 23  ;;  %v2070_v29 = vand.u32 8388607, %v11834_v23  ;;  %12027 = vst [vmem:[#allocation4_spill] sm:$0xff] %v8139_v38  ;;  %v11833_v44 = vand.u32 2147483647, %v8132_v25 }
  0xd7   : > { %v7478_v31 = vadd.s32 4294967169, %v403_v26  ;;  %v507_v33 = vshrl.u32 %v506_v30, 23  ;;  %v407_v34 = vor.u32 8388608, %v406_v27  ;;  %v2170_v48 = vand.u32 2139095040, %v8139_v38 }
  0xd8   : > { %v7542_v32 = vadd.s32 4294967169, %v2067_v28  ;;  %v2071_v36 = vor.u32 8388608, %v2070_v29 }
  0xd9   : > { %v409_v35 = vadd.s32 1, %v7478_v31  ;;  %v7482_v40 = vadd.s32 4294967169, %v507_v33  ;;  %v8141_v42 = vshll.u32 %v407_v34, 8 }
  0xda   : > { %v2073_v37 = vadd.s32 1, %v7542_v32  ;;  %v8146_v47 = vshll.u32 %v2071_v36, 8 }
  0xdb   : > { %vm410_vm2 = vcmp.gt.s32.totalorder %v409_v35, 0  ;;  %v8156_v61 = vadd.s32 1, %v7482_v40 }
  0xdc   : > { %v411_v39 = vsel %vm410_vm2, %v409_v35, 0  ;;  %vm2074_vm3 = vcmp.gt.s32.totalorder %v2073_v37, 0 }
  0xdd   : > { %v413_v41 = vand.u32 31, %v411_v39  ;;  %v2075_v43 = vsel %vm2074_vm3, %v2073_v37, 0  ;;  %v412_v45 = vshrl.u32 %v411_v39, 5  ;;  %vm514_vm8 = vcmp.gt.s32.totalorder %v8156_v61, 0 }
  0xde   : > { %v8144_v46 = vand.u32 31, %v2075_v43  ;;  %v8154_v60 = vshrl.u32 %v2075_v43, 5 }
  0xdf   : > { %v414_v49 = vsub.s32 32, %v413_v41  ;;  %v416_v51 = vshll.u32 %v11849_v50, %v413_v41  ;;  %v419_v53 = vshll.u32 %v11846_v52, %v413_v41  ;;  %v422_v55 = vshll.u32 %v11841_v54, %v413_v41 }
  0xe0   : > { %v425_v57 = vshll.u32 %v11844_v56, %v413_v41  ;;  %v428_v59 = vshll.u32 %v11838_v58, %v413_v41  ;;  %vm431_vm4 = vcmp.lt.s32.totalorder %v412_v45, 1  ;;  %vm432_vm5 = vcmp.lt.s32.totalorder %v412_v45, 2 }
  0xe1   : > { %v415_v62 = vshrl.u32 %v11849_v50, %v414_v49  ;;  %v417_v63 = vshrl.u32 %v11846_v52, %v414_v49  ;;  %v420_v0 = vshrl.u32 %v11841_v54, %v414_v49  ;;  %v423_v1 = vshrl.u32 %v11844_v56, %v414_v49 }
  0xe2   : > { %v426_v2 = vshrl.u32 %v11838_v58, %v414_v49  ;;  %v429_v10 = vshrl.u32 %v11836_v9, %v414_v49  ;;  %v2078_v14 = vsub.s32 32, %v8144_v46  ;;  %vm433_vm6 = vcmp.lt.s32.totalorder %v412_v45, 3 }
  0xe3   : > { %v418_v11 = vor.u32 %v417_v63, %v416_v51  ;;  %v421_v12 = vor.u32 %v420_v0, %v419_v53  ;;  %v424_v13 = vor.u32 %v423_v1, %v422_v55  ;;  %vm434_vm7 = vcmp.lt.s32.totalorder %v412_v45, 4 }
  0xe4   : > { %v427_v15 = vor.u32 %v426_v2, %v425_v57  ;;  %v430_v16 = vor.u32 %v429_v10, %v428_v59  ;;  %v2080_v29 = vshll.u32 %v11849_v50, %v8144_v46  ;;  %v2081_v32 = vshrl.u32 %v11846_v52, %v2078_v14 }
  0xe5   : > { %v435_v17 = vsel %vm431_vm4, %v415_v62, %v418_v11  ;;  %v436_v18 = vsel %vm434_vm7, %v424_v13, 2102212464  ;;  %v439_v22 = vsel %vm431_vm4, %v418_v11, %v421_v12  ;;  %v443_v24 = vsel %vm431_vm4, %v421_v12, %v424_v13 }
  0xe6   : > { %v437_v26 = vsel %vm433_vm6, %v421_v12, %v436_v18  ;;  %v440_v27 = vsel %vm434_vm7, %v427_v15, 920167782  ;;  %v444_v28 = vsel %vm434_vm7, %v430_v16, 1326507024  ;;  %v2083_v33 = vshll.u32 %v11846_v52, %v8144_v46 }
  0xe7   : > { %v441_v30 = vsel %vm433_vm6, %v424_v13, %v440_v27  ;;  %v445_v31 = vsel %vm433_vm6, %v427_v15, %v444_v28  ;;  %v438_v34 = vsel %vm432_vm5, %v435_v17, %v437_v26  ;;  %v2084_v37 = vshrl.u32 %v11841_v54, %v2078_v14 }
  0xe8   : > { %v442_v35 = vsel %vm432_vm5, %v439_v22, %v441_v30  ;;  %v446_v36 = vsel %vm432_vm5, %v443_v24, %v445_v31  ;;  %v2082_v49 = vor.u32 %v2081_v32, %v2080_v29  ;;  %v2086_v53 = vshll.u32 %v11841_v54, %v8144_v46 }
  0xe9   : > { %v8176_v39 = vmul.u32.u64.low %v8141_v42, %v446_v36  ;;  %v8177_v40 = vmul.u32.u64.high %v8141_v42, %v446_v36, %v8176_v39  ;;  %v8180_v41 = vmul.u32.u64.low %v8141_v42, %v442_v35  ;;  %v8181_v43 = vmul.u32.u64.high %v8141_v42, %v442_v35, %v8180_v41 }
  0xea   : > { %v2085_v51 = vor.u32 %v2084_v37, %v2083_v33  ;;  %v2087_v55 = vshrl.u32 %v11844_v56, %v2078_v14  ;;  %v2079_v45 = vshrl.u32 %v11849_v50, %v2078_v14  ;;  %v2089_v57 = vshll.u32 %v11844_v56, %v8144_v46 }
  0xeb   : > { %v2090_v59 = vshrl.u32 %v11838_v58, %v2078_v14  ;;  %v2093_v62 = vshrl.u32 %v11836_v9, %v2078_v14  ;;  %v454_v63 = vmul.u32 %v8141_v42, %v438_v34  ;;  %v2092_v1 = vshll.u32 %v11838_v58, %v8144_v46 }
  0xec   : > { %v2088_v0 = vor.u32 %v2087_v55, %v2086_v53  ;;  %vm2095_vm9 = vcmp.lt.s32.totalorder %v8154_v60, 1  ;;  %vm456_vm10 = vc.u32 %v8177_v40, %v8180_v41  ;;  %v457_v2 = vadd.s32 1, %v8181_v43 }
  0xed   : > { %v2091_v10 = vor.u32 %v2090_v59, %v2089_v57  ;;  %vm2096_vm11 = vcmp.lt.s32.totalorder %v8154_v60, 2  ;;  %v2094_v11 = vor.u32 %v2093_v62, %v2092_v1  ;;  %vm2097_vm12 = vcmp.lt.s32.totalorder %v8154_v60, 3 }
  0xee   : > { %vm2098_vm13 = vcmp.lt.s32.totalorder %v8154_v60, 4  ;;  %v2103_v42 = vsel %vm2095_vm9, %v2082_v49, %v2085_v51  ;;  %v458_v12 = vsel %vm456_vm10, %v457_v2, %v8181_v43  ;;  %v2107_v14 = vsel %vm2095_vm9, %v2085_v51, %v2088_v0 }
  0xef   : > { %v2100_v13 = vsel %vm2098_vm13, %v2088_v0, 2102212464  ;;  %v2104_v46 = vsel %vm2098_vm13, %v2091_v10, 920167782  ;;  %v459_v15 = vadd.s32 %v458_v12, %v454_v63  ;;  %v2099_v16 = vsel %vm2095_vm9, %v2079_v45, %v2082_v49 }
  0xf0   : > { %v2105_v17 = vsel %vm2097_vm12, %v2088_v0, %v2104_v46  ;;  %v2108_v18 = vsel %vm2098_vm13, %v2094_v11, 1326507024  ;;  %v2101_v22 = vsel %vm2097_vm12, %v2085_v51, %v2100_v13  ;;  %v515_v27 = vsel %vm514_vm8, %v8156_v61, 0 }
  0xf1   : > { %v2106_v24 = vsel %vm2096_vm11, %v2103_v42, %v2105_v17  ;;  %v2109_v26 = vsel %vm2097_vm12, %v2091_v10, %v2108_v18  ;;  %v460_v28 = vadd.s32 536870912, %v459_v15  ;;  %v2171_v34 = vshrl.u32 %v2170_v48, 23 }
  0xf2   : > { %v2110_v29 = vsel %vm2096_vm11, %v2107_v14, %v2109_v26  ;;  %v8211_v30 = vmul.u32.u64.low %v8146_v47, %v2106_v24  ;;  %v8212_v31 = vmul.u32.u64.high %v8146_v47, %v2106_v24, %v8211_v30  ;;  %v2102_v61 = vsel %vm2096_vm11, %v2099_v16, %v2101_v22 }
  0xf3   : > { %v8216_v32 = vmul.u32.u64.low %v8146_v47, %v2110_v29  ;;  %v8217_v33 = vmul.u32.u64.high %v8146_v47, %v2110_v29, %v8216_v32  ;;  %v8221_v35 = vshrl.u32 %v460_v28, 30  ;;  %v517_v36 = vand.u32 31, %v515_v27 }
  0xf4   : > { %v2121_v39 = vadd.s32 1, %v8212_v31  ;;  %v510_v43 = vand.u32 8388607, %v11833_v44  ;;  %v2118_v51 = vmul.u32 %v8146_v47, %v2102_v61  ;;  %v516_v48 = vshrl.u32 %v515_v27, 5 }
  0xf5   : > { %v462_v37 = vshll.u32 %v8221_v35, 30  ;;  %v518_v49 = vsub.s32 32, %v517_v36  ;;  %vm2120_vm14 = vc.u32 %v8217_v33, %v8211_v30  ;;  %v7546_v53 = vadd.s32 4294967169, %v2171_v34 }
  0xf6   : > { %v2122_v55 = vsel %vm2120_vm14, %v2121_v39, %v8212_v31  ;;  %v520_v60 = vshll.u32 %v11849_v50, %v517_v36  ;;  %v523_v57 = vshll.u32 %v11846_v52, %v517_v36  ;;  %v526_v63 = vshll.u32 %v11841_v54, %v517_v36 }
  0xf7   : > { %v521_v45 = vshrl.u32 %v11846_v52, %v518_v49  ;;  %v2123_v59 = vadd.s32 %v2122_v55, %v2118_v51  ;;  %v524_v62 = vshrl.u32 %v11841_v54, %v518_v49  ;;  %v527_v47 = vshrl.u32 %v11844_v56, %v518_v49 }
  0xf8   : > { %v8239_v0 = vsub.s32 %v459_v15, %v462_v37  ;;  %v529_v2 = vshll.u32 %v11844_v56, %v517_v36  ;;  %v530_v10 = vshrl.u32 %v11838_v58, %v518_v49  ;;  %v532_v12 = vshll.u32 %v11838_v58, %v517_v36 }
  0xf9   : > { %v522_v1 = vor.u32 %v521_v45, %v520_v60  ;;  %v525_v11 = vor.u32 %v524_v62, %v523_v57  ;;  %v528_v42 = vor.u32 %v527_v47, %v526_v63  ;;  %v533_v13 = vshrl.u32 %v11836_v9, %v518_v49 }
  0xfa   : > { %v511_v46 = vor.u32 8388608, %v510_v43  ;;  %v531_v14 = vor.u32 %v530_v10, %v529_v2  ;;  %vm535_vm15 = vcmp.lt.s32.totalorder %v516_v48, 1  ;;  %vm538_vm0 = vcmp.lt.s32.totalorder %v516_v48, 4 }
  0xfb   : > { %v2124_v16 = vadd.s32 536870912, %v2123_v59  ;;  %v534_v17 = vor.u32 %v533_v13, %v532_v12  ;;  %v543_v15 = vsel %vm535_vm15, %v522_v1, %v525_v11  ;;  %v2177_v18 = vadd.s32 1, %v7546_v53 }
  0xfc   : > { %v465_v22 = vsub.s32 0, %v8239_v0  ;;  %vm537_vm2 = vcmp.lt.s32.totalorder %v516_v48, 3  ;;  %v544_v24 = vsel %vm538_vm0, %v531_v14, 920167782  ;;  %vm536_vm3 = vcmp.lt.s32.totalorder %v516_v48, 2 }
  0xfd   : > { %v545_v26 = vsel %vm537_vm2, %v528_v42, %v544_v24  ;;  %v547_v27 = vsel %vm535_vm15, %v525_v11, %v528_v42  ;;  %v519_v28 = vshrl.u32 %v11849_v50, %v518_v49  ;;  %v548_v31 = vsel %vm538_vm0, %v534_v17, 1326507024 }
  0xfe   : > { %v546_v29 = vsel %vm536_vm3, %v543_v15, %v545_v26  ;;  %v551_v32 = vshll.u32 %v511_v46, 8  ;;  %v8253_v34 = vshrl.u32 %v2124_v16, 30  ;;  %v540_v61 = vsel %vm538_vm0, %v528_v42, 2102212464 }
  0xff   : > { %v549_v36 = vsel %vm537_vm2, %v531_v14, %v548_v31  ;;  %vm2178_vm4 = vcmp.gt.s32.totalorder %v2177_v18, 0  ;;  %v7479_v37 = vmin.u32 %v465_v22, %v8239_v0  ;;  %v539_v55 = vsel %vm535_vm15, %v519_v28, %v522_v1 }
 0x100   : > { %v550_v39 = vsel %vm536_vm3, %v547_v27, %v549_v36  ;;  %v8259_v43 = vmul.u32.u64.low %v551_v32, %v546_v29  ;;  %v8260_v51 = vmul.u32.u64.high %v551_v32, %v546_v29, %v8259_v43  ;;  %v541_v60 = vsel %vm537_vm2, %v525_v11, %v540_v61 }
 0x101   : > { %v8263_v49 = vmul.u32.u64.low %v551_v32, %v550_v39  ;;  %v8264_v53 = vmul.u32.u64.high %v551_v32, %v550_v39, %v8263_v49  ;;  %v2179_v45 = vsel %vm2178_vm4, %v2177_v18, 0  ;;  %v2126_v57 = vshll.u32 %v8253_v34, 30 }
 0x102   : > { %v2181_v62 = vand.u32 31, %v2179_v45  ;;  %v467_v63 = vclz %v7479_v37  ;;  %v561_v47 = vadd.s32 1, %v8260_v51  ;;  %v542_v2 = vsel %vm536_vm3, %v539_v55, %v541_v60 }
 0x103   : > { %vm560_vm5 = vc.u32 %v8264_v53, %v8259_v43  ;;  %v8273_v10 = vsub.s32 %v2123_v59, %v2126_v57  ;;  %v558_v13 = vmul.u32 %v551_v32, %v542_v2  ;;  %v11832_v11 = vand.u32 2147483647, %v8139_v38 }
 0x104   : > { %v562_v42 = vsel %vm560_vm5, %v561_v47, %v8260_v51  ;;  %v2182_v12 = vsub.s32 32, %v2181_v62  ;;  %v7480_v1 = vadd.s32 4294967294, %v467_v63  ;;  %v2184_v18 = vshll.u32 %v11849_v50, %v2181_v62 }
 0x105   : > { %v563_v46 = vadd.s32 %v562_v42, %v558_v13  ;;  %v2129_v14 = vsub.s32 0, %v8273_v10  ;;  %v2174_v15 = vand.u32 8388607, %v11832_v11  ;;  %v2187_v22 = vshll.u32 %v11846_v52, %v2181_v62 }
 0x106   : > { %v2185_v16 = vshrl.u32 %v11846_v52, %v2182_v12  ;;  %vm7481_vm6 = vcmp.lt.s32.totalorder %v7480_v1, 0  ;;  %v2188_v48 = vshrl.u32 %v11841_v54, %v2182_v12  ;;  %v2191_v17 = vshrl.u32 %v11844_v56, %v2182_v12 }
 0x107   : > { %v2194_v59 = vshrl.u32 %v11838_v58, %v2182_v12  ;;  %v564_v24 = vadd.s32 536870912, %v563_v46  ;;  %v2190_v26 = vshll.u32 %v11841_v54, %v2181_v62  ;;  %v2193_v27 = vshll.u32 %v11844_v56, %v2181_v62 }
 0x108   : > { %v2197_v28 = vshrl.u32 %v11836_v9, %v2182_v12  ;;  %v470_v29 = vsel %vm7481_vm6, 0, %v7480_v1  ;;  %v7543_v31 = vmin.u32 %v2129_v14, %v8273_v10  ;;  %v2180_v32 = vshrl.u32 %v2179_v45, 5  ;;  %v8293_v45 = vpop.f32.mrf.mxu0 }
 0x109   : > { %v2186_v61 = vor.u32 %v2185_v16, %v2184_v18  ;;  %v2189_v36 = vor.u32 %v2188_v48, %v2187_v22  ;;  %v2192_v37 = vor.u32 %v2191_v17, %v2190_v26  ;;  %v2195_v39 = vor.u32 %v2194_v59, %v2193_v27  ;;  %12028 = vst [vmem:[#allocation5_spill] sm:$0xff] %v8293_v45 }
 0x10a   : > { %v2196_v51 = vshll.u32 %v11838_v58, %v2181_v62  ;;  %v471_v49 = vsub.s32 32, %v470_v29  ;;  %v8291_v55 = vshrl.u32 %v564_v24, 30  ;;  %v2175_v60 = vor.u32 8388608, %v2174_v15 }
 0x10b   : > { %v475_v63 = vsub.s32 4294967266, %v470_v29  ;;  %v2131_v47 = vclz %v7543_v31  ;;  %vm2199_vm7 = vcmp.lt.s32.totalorder %v2180_v32, 1  ;;  %vm2202_vm8 = vcmp.lt.s32.totalorder %v2180_v32, 4 }
 0x10c   : > { %v2198_v57 = vor.u32 %v2197_v28, %v2196_v51  ;;  %vm2201_vm9 = vcmp.lt.s32.totalorder %v2180_v32, 3  ;;  %v2204_v2 = vsel %vm2202_vm8, %v2192_v37, 2102212464  ;;  %v2207_v42 = vsel %vm2199_vm7, %v2186_v61, %v2189_v36 }
 0x10d   : > { %v2208_v1 = vsel %vm2202_vm8, %v2195_v39, 920167782  ;;  %v2183_v13 = vshrl.u32 %v11849_v50, %v2182_v12  ;;  %vm2200_vm10 = vcmp.lt.s32.totalorder %v2180_v32, 2  ;;  %v2211_v62 = vsel %vm2199_vm7, %v2189_v36, %v2192_v37 }
 0x10e   : > { %v2209_v14 = vsel %vm2201_vm9, %v2192_v37, %v2208_v1  ;;  %v566_v16 = vshll.u32 %v8291_v55, 30  ;;  %v2212_v17 = vsel %vm2202_vm8, %v2198_v57, 1326507024  ;;  %v2215_v59 = vshll.u32 %v2175_v60, 8 }
 0x10f   : > { %v2210_v48 = vsel %vm2200_vm10, %v2207_v42, %v2209_v14  ;;  %v2203_v15 = vsel %vm2199_vm7, %v2183_v13, %v2186_v61  ;;  %v2205_v18 = vsel %vm2201_vm9, %v2189_v36, %v2204_v2  ;;  %v2213_v22 = vsel %vm2201_vm9, %v2195_v39, %v2212_v17 }
 0x110   : > { %v610_v24 = vand.u32 2139095040, %v8293_v45  ;;  %v455_v26 = vadd.s32 %v8180_v41, %v8177_v40  ;;  %v2214_v27 = vsel %vm2200_vm10, %v2211_v62, %v2213_v22  ;;  %v7544_v31 = vadd.s32 4294967294, %v2131_v47 }
 0x111   : > { %v8302_v12 = vmul.u32.u64.low %v2215_v59, %v2210_v48  ;;  %v8303_v28 = vmul.u32.u64.high %v2215_v59, %v2210_v48, %v8302_v12  ;;  %v8306_v37 = vmul.u32.u64.low %v2215_v59, %v2214_v27  ;;  %v8307_v51 = vmul.u32.u64.high %v2215_v59, %v2214_v27, %v8306_v37 }
 0x112   : > { %v473_v57 = vshrl.u32 %v455_v26, %v471_v49  ;;  %v476_v60 = vadd.s32 127, %v475_v63  ;;  %v2206_v61 = vsel %vm2200_vm10, %v2203_v15, %v2205_v18  ;;  %v611_v36 = vshrl.u32 %v610_v24, 23  ;;  %v8344_v18 = vpop.f32.mrf.mxu1 }
 0x113   : > { %v8310_v39 = vsub.s32 %v563_v46, %v566_v16  ;;  %v472_v2 = vshll.u32 %v8239_v0, %v470_v29  ;;  %v2225_v40 = vadd.s32 1, %v8303_v28  ;;  %v8315_v42 = vmul.f32 0.1, %v8075_v3  ;;  %12034 = vst [vmem:[#allocation11_spill] sm:$0xff] %v8344_v18 }
 0x114   : > { %v7486_v41 = vadd.s32 4294967169, %v611_v36  ;;  %vm7545_vm11 = vcmp.lt.s32.totalorder %v7544_v31, 0  ;;  %v2222_v47 = vmul.u32 %v2215_v59, %v2206_v61  ;;  %vm2224_vm12 = vc.u32 %v8307_v51, %v8302_v12 }
 0x115   : > { %12029 = vst [vmem:[#allocation6_spill] sm:$0xff] %v8315_v42  ;;  %v8319_v49 = vor.u32 %v473_v57, %v472_v2  ;;  %v477_v32 = vshll.u32 %v476_v60, 23  ;;  %v2226_v63 = vsel %vm2224_vm12, %v2225_v40, %v8303_v28  ;;  %v8323_v1 = vmul.f32 0.1, %v8078_v4 }
 0x116   : > { %v617_v46 = vadd.s32 1, %v7486_v41  ;;  %v8326_v0 = vmul.f32 0.1, %v8085_v5  ;;  %v569_v3 = vsub.s32 0, %v8310_v39  ;;  %v2227_v29 = vadd.s32 %v2226_v63, %v2222_v47 }
 0x117   : > { %12030 = vst [vmem:[#allocation7_spill] sm:$0xff] %v8323_v1  ;;  %v8330_v13 = vmul.f32 0.1, %v8088_v6  ;;  %v8333_v14 = vmul.f32 0.1, %v8095_v7  ;;  %v8335_v62 = vsel %vm7545_vm11, 0, %v7544_v31  ;;  %v2119_v16 = vadd.s32 %v8211_v30, %v8217_v33 }
 0x118   : > { %12031 = vst [vmem:[#allocation8_spill] sm:$0xff] %v8326_v0  ;;  %vm618_vm13 = vcmp.gt.s32.totalorder %v617_v46, 0  ;;  %v2228_v4 = vadd.s32 536870912, %v2227_v29  ;;  %v11831_v48 = vand.u32 2147483647, %v8293_v45  ;;  %v481_v59 = vcvt.s32.f32 %v8319_v49 }
 0x119   : > { %12032 = vst [vmem:[#allocation9_spill] sm:$0xff] %v8330_v13  ;;  %12033 = vst [vmem:[#allocation10_spill] sm:$0xff] %v8333_v14  ;;  %v619_v5 = vsel %vm618_vm13, %v617_v46, 0  ;;  %v8340_v17 = vor.u32 4788187, %v477_v32  ;;  %v2149_v6 = vsub.s32 4, %v8253_v34  ;;  %v7483_v24 = vmin.u32 %v569_v3, %v8310_v39 }
 0x11a   : > { %v621_v15 = vand.u32 31, %v619_v5  ;;  %v2135_v7 = vsub.s32 32, %v8335_v62  ;;  %v2139_v22 = vsub.s32 4294967266, %v8335_v62  ;;  %v8349_v30 = vshrl.u32 %v2228_v4, 30 }
 0x11b   : > { %v614_v31 = vand.u32 8388607, %v11831_v48  ;;  %v620_v37 = vshrl.u32 %v619_v5, 5  ;;  %v2274_v60 = vand.u32 2139095040, %v8344_v18  ;;  %v571_v47 = vclz %v7483_v24 }
 0x11c   : > { %v622_v33 = vsub.s32 32, %v621_v15  ;;  %v624_v26 = vshll.u32 %v11849_v50, %v621_v15  ;;  %v627_v27 = vshll.u32 %v11846_v52, %v621_v15  ;;  %v630_v28 = vshll.u32 %v11841_v54, %v621_v15 }
 0x11d   : > { %v633_v57 = vshll.u32 %v11844_v56, %v621_v15  ;;  %v636_v40 = vshll.u32 %v11838_v58, %v621_v15  ;;  %v2140_v41 = vadd.s32 127, %v2139_v22  ;;  %v2230_v46 = vshll.u32 %v8349_v30, 30 }
 0x11e   : > { %v625_v61 = vshrl.u32 %v11846_v52, %v622_v33  ;;  %v628_v36 = vshrl.u32 %v11841_v54, %v622_v33  ;;  %v631_v2 = vshrl.u32 %v11844_v56, %v622_v33  ;;  %v634_v32 = vshrl.u32 %v11838_v58, %v622_v33 }
 0x11f   : > { %v637_v63 = vshrl.u32 %v11836_v9, %v622_v33  ;;  %v615_v48 = vor.u32 8388608, %v614_v31  ;;  %vm639_vm14 = vcmp.lt.s32.totalorder %v620_v37, 1  ;;  %v2275_v44 = vshrl.u32 %v2274_v60, 23 }
 0x120   : > { %v626_v3 = vor.u32 %v625_v61, %v624_v26  ;;  %v629_v4 = vor.u32 %v628_v36, %v627_v27  ;;  %v632_v5 = vor.u32 %v631_v2, %v630_v28  ;;  %v635_v11 = vor.u32 %v634_v32, %v633_v57 }
 0x121   : > { %v623_v23 = vshrl.u32 %v11849_v50, %v622_v33  ;;  %v638_v21 = vor.u32 %v637_v63, %v636_v40  ;;  %vm641_vm15 = vcmp.lt.s32.totalorder %v620_v37, 3  ;;  %vm642_vm0 = vcmp.lt.s32.totalorder %v620_v37, 4 }
 0x122   : > { %v479_v15 = vand.u32 2147483647, %v8340_v17  ;;  %v2137_v22 = vshrl.u32 %v2119_v16, %v2135_v7  ;;  %v2141_v24 = vshll.u32 %v2140_v41, 23  ;;  %vm640_vm2 = vcmp.lt.s32.totalorder %v620_v37, 2 }
 0x123   : > { %v8367_v9 = vsub.s32 %v2227_v29, %v2230_v46  ;;  %v644_v58 = vsel %vm642_vm0, %v632_v5, 2102212464  ;;  %v647_v26 = vsel %vm639_vm14, %v626_v3, %v629_v4  ;;  %v648_v27 = vsel %vm642_vm0, %v635_v11, 920167782 }
 0x124   : > { %v7484_v28 = vadd.s32 4294967294, %v571_v47  ;;  %v649_v31 = vsel %vm641_vm15, %v632_v5, %v648_v27  ;;  %v651_v57 = vsel %vm639_vm14, %v629_v4, %v632_v5  ;;  %v655_v33 = vshll.u32 %v615_v48, 8 }
 0x125   : > { %v643_v60 = vsel %vm639_vm14, %v623_v23, %v626_v3  ;;  %v650_v61 = vsel %vm640_vm2, %v647_v26, %v649_v31  ;;  %v652_v17 = vsel %vm642_vm0, %v638_v21, 1326507024  ;;  %v7550_v16 = vadd.s32 4294967169, %v2275_v44 }
 0x126   : > { %v645_v7 = vsel %vm641_vm15, %v629_v4, %v644_v58  ;;  %v653_v29 = vsel %vm641_vm15, %v635_v11, %v652_v17  ;;  %v8376_v36 = vmul.u32.u64.low %v655_v33, %v650_v61  ;;  %v8377_v2 = vmul.u32.u64.high %v655_v33, %v650_v61, %v8376_v36 }
 0x127   : > { %v2136_v40 = vshll.u32 %v8273_v10, %v8335_v62  ;;  %v2233_v41 = vsub.s32 0, %v8367_v9  ;;  %v654_v48 = vsel %vm640_vm2, %v651_v57, %v653_v29  ;;  %v2281_v23 = vadd.s32 1, %v7550_v16  ;;  %v8393_v10 = vpop.f32.mrf.mxu0 }
 0x128   : > { %v8385_v47 = vmul.f32 0.1, %v8098_v8  ;;  %vm7485_vm3 = vcmp.lt.s32.totalorder %v7484_v28, 0  ;;  %v8387_v21 = vmul.u32.u64.low %v655_v33, %v654_v48  ;;  %v8388_v44 = vmul.u32.u64.high %v655_v33, %v654_v48, %v8387_v21  ;;  %12036 = vst [vmem:[#allocation13_spill] sm:$0xff] %v8393_v10 }
 0x129   : > { %v482_v58 = vmul.f32 %v481_v59, %v479_v15  ;;  %v2138_v11 = vor.u32 %v2137_v22, %v2136_v40  ;;  %v646_v32 = vsel %vm640_vm2, %v643_v60, %v645_v7  ;;  %vm2282_vm4 = vcmp.gt.s32.totalorder %v2281_v23, 0 }
 0x12a   : > { %12035 = vst [vmem:[#allocation12_spill] sm:$0xff] %v8385_v47  ;;  %vm2065_vm5 = vcmp.lt.s32.totalorder %v8126_v20, 0  ;;  %v2142_v62 = vor.u32 4788187, %v2141_v24  ;;  %v665_v63 = vadd.s32 1, %v8377_v2  ;;  %v8405_v59 = vsel %vm7485_vm3, 0, %v7484_v28 }
 0x12b   : > { %v11840_v8 = vand.u32 2147483647, %v8344_v18  ;;  %v8403_v49 = vsel %vm2065_vm5, %v2149_v6, %v8253_v34  ;;  %v7547_v37 = vmin.u32 %v2233_v41, %v8367_v9  ;;  %v2283_v46 = vsel %vm2282_vm4, %v2281_v23, 0 }
 0x12c   : > { %12037 = vst [vmem:[#allocation14_spill] sm:$0xff] %v8403_v49  ;;  %v559_v3 = vadd.s32 %v8259_v43, %v8264_v53  ;;  %v662_v4 = vmul.u32 %v655_v33, %v646_v32  ;;  %vm664_vm6 = vc.u32 %v8388_v44, %v8376_v36  ;;  %v714_v5 = vand.u32 2139095040, %v8393_v10 }
 0x12d   : > { %v483_v15 = vxor.u32 2147483648, %v482_v58  ;;  %v2145_v22 = vcvt.s32.f32 %v2138_v11  ;;  %v666_v24 = vsel %vm664_vm6, %v665_v63, %v8377_v2  ;;  %v2285_v34 = vand.u32 31, %v2283_v46 }
 0x12e   : > { %vm11886_vm7 = vcmp.lt.s32.totalorder %v8124_v19, 0  ;;  %v2143_v6 = vand.u32 2147483647, %v2142_v62  ;;  %v579_v26 = vsub.s32 4294967266, %v8405_v59  ;;  %v667_v27 = vadd.s32 %v666_v24, %v662_v4 }
 0x12f   : > { %v2278_v43 = vand.u32 8388607, %v11840_v8  ;;  %v2235_v53 = vclz %v7547_v37  ;;  %v2286_v28 = vsub.s32 32, %v2285_v34  ;;  %v2288_v31 = vshll.u32 %v11849_v50, %v2285_v34 }
 0x130   : > { %v2291_v57 = vshll.u32 %v11846_v52, %v2285_v34  ;;  %v668_v33 = vadd.s32 536870912, %v667_v27  ;;  %v2294_v60 = vshll.u32 %v11841_v54, %v2285_v34  ;;  %v2297_v61 = vshll.u32 %v11844_v56, %v2285_v34 }
 0x131   : > { %v715_v17 = vshrl.u32 %v714_v5, 23  ;;  %v2284_v16 = vshrl.u32 %v2283_v46, 5  ;;  %v2289_v7 = vshrl.u32 %v11846_v52, %v2286_v28  ;;  %v2292_v29 = vshrl.u32 %v11841_v54, %v2286_v28 }
 0x132   : > { %v2295_v2 = vshrl.u32 %v11844_v56, %v2286_v28  ;;  %v2146_v40 = vmul.f32 %v2145_v22, %v2143_v6  ;;  %v575_v41 = vsub.s32 32, %v8405_v59  ;;  %v12038_v48 = vmov 920167782  }
 0x133   : > { %v2298_v23 = vshrl.u32 %v12038_v48, %v2286_v28  ;;  %v2300_v21 = vshll.u32 %v12038_v48, %v2285_v34  ;;  %v2279_v11 = vor.u32 8388608, %v2278_v43  ;;  %v2290_v32 = vor.u32 %v2289_v7, %v2288_v31 }
 0x134   : > { %v2293_v62 = vor.u32 %v2292_v29, %v2291_v57  ;;  %v12039_v63 = vmov 1326507024   ;;  %v8429_v4 = vshrl.u32 %v668_v33, 30  ;;  %v2296_v46 = vor.u32 %v2295_v2, %v2294_v60 }
 0x135   : > { %v2301_v37 = vshrl.u32 %v12039_v63, %v2286_v28  ;;  %v2299_v5 = vor.u32 %v2298_v23, %v2297_v61  ;;  %v7490_v24 = vadd.s32 4294967169, %v715_v17  ;;  %v580_v8 = vadd.s32 127, %v579_v26 }
 0x136   : > { %v7548_v54 = vadd.s32 4294967294, %v2235_v53  ;;  %vm2303_vm8 = vcmp.lt.s32.totalorder %v2284_v16, 1  ;;  %vm2305_vm9 = vcmp.lt.s32.totalorder %v2284_v16, 3  ;;  %v12040_v22 = vand.u32 2147483647, %v8124_v19 }
 0x137   : > { %v2287_v34 = vshrl.u32 %v11849_v50, %v2286_v28  ;;  %v2302_v43 = vor.u32 %v2301_v37, %v2300_v21  ;;  %vm2304_vm11 = vcmp.lt.s32.totalorder %v2284_v16, 2  ;;  %vm2306_vm12 = vcmp.lt.s32.totalorder %v2284_v16, 4 }
 0x138   : > { %vm8433_vm10 = vcmp.le.f32.partialorder %v12040_v22, 0.7853982  ;;  %v484_v31 = vsel %vm11886_vm7, %v483_v15, %v482_v58  ;;  %v2311_v57 = vsel %vm2303_vm8, %v2290_v32, %v2293_v62  ;;  %v2312_v26 = vsel %vm2306_vm12, %v2299_v5, 920167782 }
 0x139   : > { %v2319_v53 = vshll.u32 %v2279_v11, 8  ;;  %v670_v33 = vshll.u32 %v8429_v4, 30  ;;  %v2308_v60 = vsel %vm2306_vm12, %v2296_v46, 2102212464  ;;  %v2313_v61 = vsel %vm2305_vm9, %v2296_v46, %v2312_v26 }
 0x13a   : > { %v721_v17 = vadd.s32 1, %v7490_v24  ;;  %v2147_v7 = vxor.u32 2147483648, %v2146_v40  ;;  %v581_v28 = vshll.u32 %v580_v8, 23  ;;  %v2314_v29 = vsel %vm2304_vm11, %v2311_v57, %v2313_v61 }
 0x13b   : > { %v2315_v2 = vsel %vm2303_vm8, %v2293_v62, %v2296_v46  ;;  %v577_v23 = vshrl.u32 %v559_v3, %v575_v41  ;;  %vm7549_vm13 = vcmp.lt.s32.totalorder %v7548_v54, 0  ;;  %v2307_v58 = vsel %vm2303_vm8, %v2287_v34, %v2290_v32 }
 0x13c   : > { %v2316_v15 = vsel %vm2306_vm12, %v2302_v43, 1326507024  ;;  %v2309_v21 = vsel %vm2305_vm9, %v2293_v62, %v2308_v60  ;;  %v8451_v37 = vmul.u32.u64.low %v2319_v53, %v2314_v29  ;;  %v8452_v22 = vmul.u32.u64.high %v2319_v53, %v2314_v29, %v8451_v37  ;;  %v8489_v29 = vpop.f32.mrf.mxu1 }
 0x13d   : > { %v2317_v11 = vsel %vm2305_vm9, %v2299_v5, %v2316_v15  ;;  %v8455_v24 = vsub.s32 %v667_v27, %v670_v33  ;;  %v11843_v46 = vand.u32 2147483647, %v8393_v10  ;;  %vm722_vm14 = vcmp.gt.s32.totalorder %v721_v17, 0  ;;  %12044 = vst [vmem:[#allocation15_spill] sm:$0xff] %v8489_v29 }
 0x13e   : > { %v2318_v8 = vsel %vm2304_vm11, %v2315_v2, %v2317_v11  ;;  %v582_v3 = vor.u32 4788187, %v581_v28  ;;  %v723_v34 = vsel %vm722_vm14, %v721_v17, 0  ;;  %v576_v62 = vshll.u32 %v8310_v39, %v8405_v59 }
 0x13f   : > { %v8459_v41 = vmul.u32.u64.low %v2319_v53, %v2318_v8  ;;  %v8460_v32 = vmul.u32.u64.high %v2319_v53, %v2318_v8, %v8459_v41  ;;  %v8464_v5 = vsel %vm7549_vm13, 0, %v7548_v54  ;;  %v2310_v43 = vsel %vm2304_vm11, %v2307_v58, %v2309_v21 }
 0x140   : > { %v725_v57 = vand.u32 31, %v723_v34  ;;  %v8470_v27 = vsel %vm8433_vm10, %v8124_v19, %v484_v31  ;;  %v8474_v26 = vsel %vm2065_vm5, %v2147_v7, %v2146_v40  ;;  %v2223_v33 = vadd.s32 %v8302_v12, %v8307_v51 }
 0x141   : > { %v2329_v60 = vadd.s32 1, %v8452_v22  ;;  %v578_v39 = vor.u32 %v577_v23, %v576_v62  ;;  %v673_v54 = vsub.s32 0, %v8455_v24  ;;  %v718_v59 = vand.u32 8388607, %v11843_v46 }
 0x142   : > { %v726_v16 = vsub.s32 32, %v725_v57  ;;  %v583_v61 = vand.u32 2147483647, %v582_v3  ;;  %v2243_v31 = vsub.s32 4294967266, %v8464_v5  ;;  %v2326_v17 = vmul.u32 %v2319_v53, %v2310_v43 }
 0x143   : > { %vm2328_vm15 = vc.u32 %v8460_v32, %v8451_v37  ;;  %v728_v12 = vshll.u32 %v11849_v50, %v725_v57  ;;  %v731_v51 = vshll.u32 %v11846_v52, %v725_v57  ;;  %v12043_v7 = vmov 2131351028  }
 0x144   : > { %v2330_v40 = vsel %vm2328_vm15, %v2329_v60, %v8452_v22  ;;  %v734_v28 = vshll.u32 %v12043_v7, %v725_v57  ;;  %v724_v23 = vshrl.u32 %v723_v34, 5  ;;  %v729_v58 = vshrl.u32 %v11846_v52, %v726_v16 }
 0x145   : > { %v2331_v2 = vadd.s32 %v2330_v40, %v2326_v17  ;;  %v732_v15 = vshrl.u32 %v12043_v7, %v726_v16  ;;  %v7487_v53 = vmin.u32 %v673_v54, %v8455_v24  ;;  %v719_v21 = vor.u32 8388608, %v718_v59 }
 0x146   : > { %v735_v11 = vshrl.u32 %v11844_v56, %v726_v16  ;;  %v737_v22 = vshll.u32 %v11844_v56, %v725_v57  ;;  %v2244_v8 = vadd.s32 127, %v2243_v31  ;;  %v738_v41 = vshrl.u32 %v12038_v48, %v726_v16 }
 0x147   : > { %v2332_v3 = vadd.s32 536870912, %v2331_v2  ;;  %v2378_v62 = vand.u32 2139095040, %v8489_v29  ;;  %v730_v43 = vor.u32 %v729_v58, %v728_v12  ;;  %v733_v60 = vor.u32 %v732_v15, %v731_v51 }
 0x148   : > { %v736_v34 = vor.u32 %v735_v11, %v734_v28  ;;  %v740_v17 = vshll.u32 %v12038_v48, %v725_v57  ;;  %v739_v46 = vor.u32 %v738_v41, %v737_v22  ;;  %v741_v54 = vshrl.u32 %v12039_v63, %v726_v16 }
 0x149   : > { %v8499_v40 = vshrl.u32 %v2332_v3, 30  ;;  %vm743_vm0 = vcmp.lt.s32.totalorder %v724_v23, 1  ;;  %v585_v59 = vcvt.s32.f32 %v578_v39  ;;  %v2239_v56 = vsub.s32 32, %v8464_v5 }
 0x14a   : > { %v675_v31 = vclz %v7487_v53  ;;  %v727_v52 = vshrl.u32 %v11849_v50, %v726_v16  ;;  %v12045_v47 = vand.u32 2147483647, %v8126_v20  ;;  %v12046_v12 = vmov 0 }
 0x14b   : > { %v2334_v57 = vshll.u32 %v8499_v40, 30  ;;  %v742_v51 = vor.u32 %v741_v54, %v740_v17  ;;  %vm745_vm3 = vcmp.lt.s32.totalorder %v724_v23, 3  ;;  %vm746_vm4 = vcmp.lt.s32.totalorder %v724_v23, 4 }
 0x14c   : > { %vm8506_vm2 = vcmp.le.f32.partialorder %v12045_v47, 0.7853982  ;;  %v586_v28 = vmul.f32 %v585_v59, %v583_v61  ;;  %v2245_v58 = vshll.u32 %v2244_v8, 23  ;;  %vm744_vm5 = vcmp.lt.s32.totalorder %v724_v23, 2 }
 0x14d   : > { %v12047_v12 = vsel %vm8506_vm2, 4294967295, %v12046_v12  ;;  %v751_v39 = vsel %vm743_vm0, %v730_v43, %v733_v60  ;;  %v748_v15 = vsel %vm746_vm4, %v736_v34, 2102212464  ;;  %v752_v16 = vsel %vm746_vm4, %v739_v46, 920167782 }
 0x14e   : > { %12048 = vst [vmem:[#allocation16_spill] sm:$0xff] %v12047_v12  ;;  %v759_v53 = vshll.u32 %v719_v21, 8  ;;  %v2379_v11 = vshrl.u32 %v2378_v62, 23  ;;  %v7488_v47 = vadd.s32 4294967294, %v675_v31  ;;  %v8514_v22 = vsub.s32 %v2331_v2, %v2334_v57 }
 0x14f   : > { %v753_v3 = vsel %vm745_vm3, %v736_v34, %v752_v16  ;;  %v755_v41 = vsel %vm743_vm0, %v733_v60, %v736_v34  ;;  %vm505_vm6 = vcmp.lt.s32.totalorder %v8132_v25, 0  ;;  %v2241_v61 = vshrl.u32 %v2223_v33, %v2239_v56 }
 0x150   : > { %v747_v8 = vsel %vm743_vm0, %v727_v52, %v730_v43  ;;  %v754_v17 = vsel %vm744_vm5, %v751_v39, %v753_v3  ;;  %v756_v54 = vsel %vm746_vm4, %v742_v51, 1326507024  ;;  %v749_v59 = vsel %vm745_vm3, %v733_v60, %v748_v15 }
 0x151   : > { %v757_v21 = vsel %vm745_vm3, %v739_v46, %v756_v54  ;;  %v8524_v62 = vmul.u32.u64.low %v759_v53, %v754_v17  ;;  %v8525_v2 = vmul.u32.u64.high %v759_v53, %v754_v17, %v8524_v62  ;;  %v2240_v34 = vshll.u32 %v8367_v9, %v8464_v5  ;;  %v8553_v17 = vpop.f32.mrf.mxu0 }
 0x152   : > { %v2246_v31 = vor.u32 4788187, %v2245_v58  ;;  %v758_v56 = vsel %vm744_vm5, %v755_v41, %v757_v21  ;;  %v7554_v33 = vadd.s32 4294967169, %v2379_v11  ;;  %vm7489_vm8 = vcmp.lt.s32.totalorder %v7488_v47, 0  ;;  %12049 = vst [vmem:[#allocation17_spill] sm:$0xff] %v8553_v17 }
 0x153   : > { %v2337_v52 = vsub.s32 0, %v8514_v22  ;;  %v8532_v43 = vmul.u32.u64.low %v759_v53, %v758_v56  ;;  %v8533_v57 = vmul.u32.u64.high %v759_v53, %v758_v56, %v8532_v43  ;;  %v2242_v46 = vor.u32 %v2241_v61, %v2240_v34 }
 0x154   : > { %v750_v51 = vsel %vm744_vm5, %v747_v8, %v749_v59  ;;  %v2385_v39 = vadd.s32 1, %v7554_v33  ;;  %7885 = vcosq.f32 %v8470_v27  ;;  %v8542_v9 = vsel %vm8506_vm2, %v8126_v20, %v8474_v26 }
 0x155   : > { %v587_v5 = vxor.u32 2147483648, %v586_v28  ;;  %v769_v58 = vadd.s32 1, %v8525_v2  ;;  %v2247_v15 = vand.u32 2147483647, %v2246_v31  ;;  %v8545_v16 = vsel %vm7489_vm8, 0, %v7488_v47 }
 0x156   : > { %v11848_v11 = vand.u32 2147483647, %v8489_v29  ;;  %vm2386_vm9 = vcmp.gt.s32.totalorder %v2385_v39, 0  ;;  %v7551_v23 = vmin.u32 %v2337_v52, %v8514_v22  ;;  %v766_v3 = vmul.u32 %v759_v53, %v750_v51 }
 0x157   : > { %vm768_vm11 = vc.u32 %v8533_v57, %v8524_v62  ;;  %v2387_v41 = vsel %vm2386_vm9, %v2385_v39, 0  ;;  %7887 = vsinq.f32 %v8470_v27  ;;  %v2249_v26 = vcvt.s32.f32 %v2242_v46 }
 0x158   : > { %v770_v61 = vsel %vm768_vm11, %v769_v58, %v8525_v2  ;;  %v2389_v8 = vand.u32 31, %v2387_v41  ;;  %7889 = vcosq.f32 %v8542_v9  ;;  %v8558_v47 = vsel %vm505_vm6, %v587_v5, %v586_v28 }
 0x159   : > { %v663_v53 = vadd.s32 %v8376_v36, %v8388_v44  ;;  %v771_v54 = vadd.s32 %v770_v61, %v766_v3  ;;  %v8562_v59 = vmul.f32 %v2249_v26, %v2247_v15  ;;  %v683_v27 = vsub.s32 4294967266, %v8545_v16 }
 0x15a   : > { %v2382_v21 = vand.u32 8388607, %v11848_v11  ;;  %v2390_v2 = vsub.s32 32, %v2389_v8  ;;  %v679_v34 = vsub.s32 32, %v8545_v16  ;;  %v2339_v31 = vclz %v7551_v23 }
 0x15b   : > { %v772_v56 = vadd.s32 536870912, %v771_v54  ;;  %v818_v33 = vand.u32 2139095040, %v8553_v17  ;;  %v8569_v28 = vshrl.u32 %v2387_v41, 5  ;;  %v2392_v52 = vshll.u32 %v11849_v50, %v2389_v8 }
 0x15c   : > { %v12050_v36 = vmov 2475754826   ;;  %v2396_v46 = vshrl.u32 %v12043_v7, %v2390_v2  ;;  %v2398_v51 = vshll.u32 %v12043_v7, %v2389_v8  ;;  %v12051_v39 = vmov 2102212464  }
 0x15d   : > { %v2393_v44 = vshrl.u32 %v12050_v36, %v2390_v2  ;;  %v2395_v43 = vshll.u32 %v12050_v36, %v2389_v8  ;;  %v2399_v5 = vshrl.u32 %v12051_v39, %v2390_v2  ;;  %v2401_v58 = vshll.u32 %v12051_v39, %v2389_v8 }
 0x15e   : > { %v684_v15 = vadd.s32 127, %v683_v27  ;;  %v8578_v23 = vshrl.u32 %v772_v56, 30  ;;  %v2402_v3 = vshrl.u32 %v12038_v48, %v2390_v2  ;;  %v680_v26 = vshll.u32 %v8455_v24, %v8545_v16 }
 0x15f   : > { %v7552_v61 = vadd.s32 4294967294, %v2339_v31  ;;  %v2383_v11 = vor.u32 8388608, %v2382_v21  ;;  %v819_v60 = vshrl.u32 %v818_v33, 23  ;;  %v2394_v50 = vor.u32 %v2393_v44, %v2392_v52 }
 0x160   : > { %v2397_v14 = vor.u32 %v2396_v46, %v2395_v43  ;;  %v2403_v13 = vor.u32 %v2402_v3, %v2401_v58  ;;  %v2404_v0 = vshll.u32 %v12038_v48, %v2389_v8  ;;  %v681_v1 = vshrl.u32 %v663_v53, %v679_v34 }
 0x161   : > { %v2400_v42 = vor.u32 %v2399_v5, %v2398_v51  ;;  %v2405_v27 = vshrl.u32 %v12039_v63, %v2390_v2  ;;  %vm2407_vm12 = vcmp.lt.s32.totalorder %v8569_v28, 1  ;;  %v8587_v56 = vpop.eup %7885  ;;  %v12052_v41 = vand.u32 2147483647, %v8132_v25 }
 0x162   : > { %v12053_v24 = vmov 0  ;;  %v685_v16 = vshll.u32 %v684_v15, 23  ;;  %v774_v21 = vshll.u32 %v8578_v23, 30  ;;  %vm2409_vm14 = vcmp.lt.s32.totalorder %v8569_v28, 3 }
 0x163   : > { %vm8591_vm13 = vcmp.le.f32.partialorder %v12052_v41, 0.7853982  ;;  %vm2410_vm15 = vcmp.lt.s32.totalorder %v8569_v28, 4  ;;  %vm7553_vm0 = vcmp.lt.s32.totalorder %v7552_v61, 0  ;;  %v2406_v8 = vor.u32 %v2405_v27, %v2404_v0 }
 0x164   : > { %v12054_v24 = vsel %vm8591_vm13, 4294967295, %v12053_v24  ;;  %vm2408_vm3 = vcmp.lt.s32.totalorder %v8569_v28, 2  ;;  %v2423_v53 = vshll.u32 %v2383_v11, 8  ;;  %v12056_v34 = vmov 683565275   ;;  %v8604_v43 = vpop.eup %7887 }
 0x165   : > { %12055 = vst [vmem:[#allocation18_spill] sm:$0xff] %v12054_v24  ;;  %v2391_v31 = vshrl.u32 %v12056_v34, %v2390_v2  ;;  %v2415_v33 = vsel %vm2407_vm12, %v2394_v50, %v2397_v14  ;;  %v2416_v52 = vsel %vm2410_vm15, %v2403_v13, 920167782  ;;  %v7494_v44 = vadd.s32 4294967169, %v819_v60  ;;  %v8614_v2 = vpop.eup %7889 }
 0x166   : > { %v8606_v46 = vor.u32 %v681_v1, %v680_v26  ;;  %v2412_v51 = vsel %vm2410_vm15, %v2400_v42, 2102212464  ;;  %v2417_v0 = vsel %vm2409_vm14, %v2400_v42, %v2416_v52  ;;  %v2419_v11 = vsel %vm2407_vm12, %v2397_v14, %v2400_v42  ;;  %12057 = vst [vmem:[#allocation19_spill] sm:$0xff] %v8614_v2 }
 0x167   : > { %v8616_v5 = vsel %vm7553_vm0, 0, %v7552_v61  ;;  %v8618_v58 = vsub.s32 %v771_v54, %v774_v21  ;;  %v2418_v60 = vsel %vm2408_vm3, %v2415_v33, %v2417_v0  ;;  %v2420_v1 = vsel %vm2410_vm15, %v2406_v8, 1326507024 }
 0x168   : > { %v8624_v15 = vor.u32 4788187, %v685_v16  ;;  %v2421_v3 = vsel %vm2409_vm14, %v2403_v13, %v2420_v1  ;;  %v8628_v41 = vmul.u32.u64.low %v2423_v53, %v2418_v60  ;;  %v8629_v26 = vmul.u32.u64.high %v2423_v53, %v2418_v60, %v8628_v41 }
 0x169   : > { %v2411_v42 = vsel %vm2407_vm12, %v2391_v31, %v2394_v50  ;;  %v2413_v54 = vsel %vm2409_vm14, %v2397_v14, %v2412_v51  ;;  %v2422_v61 = vsel %vm2408_vm3, %v2419_v11, %v2421_v3  ;;  %v825_v27 = vadd.s32 1, %v7494_v44 }
 0x16a   : > { %v2347_v16 = vsub.s32 4294967266, %v8616_v5  ;;  %v8639_v21 = vmul.u32.u64.low %v2423_v53, %v2422_v61  ;;  %v8640_v8 = vmul.u32.u64.high %v2423_v53, %v2422_v61, %v8639_v21  ;;  %v12058_v13 = vand.u32 2147483647, %v8553_v17 }
 0x16b   : > { %7891 = vsinq.f32 %v8542_v9  ;;  %v12059_v50 = vsub.s32 4, %v8291_v55  ;;  %v777_v31 = vsub.s32 0, %v8618_v58  ;;  %vm826_vm4 = vcmp.gt.s32.totalorder %v825_v27, 0 }
 0x16c   : > { %v822_v33 = vand.u32 8388607, %v12058_v13  ;;  %v8657_v52 = vsel %vm8591_vm13, %v8132_v25, %v8558_v47  ;;  %v2414_v44 = vsel %vm2408_vm3, %v2411_v42, %v2413_v54  ;;  %v2433_v9 = vadd.s32 1, %v8629_v26 }
 0x16d   : > { %v8650_v14 = vsel %vm505_vm6, %v12059_v50, %v8291_v55  ;;  %v827_v51 = vsel %vm826_vm4, %v825_v27, 0  ;;  %v2327_v11 = vadd.s32 %v8451_v37, %v8460_v32  ;;  %v687_v1 = vand.u32 2147483647, %v8624_v15 }
 0x16e   : > { %12060 = vst [vmem:[#allocation20_spill] sm:$0xff] %v8650_v14  ;;  %v829_v60 = vand.u32 31, %v827_v51  ;;  %v2343_v3 = vsub.s32 32, %v8616_v5  ;;  %v2348_v47 = vadd.s32 127, %v2347_v16  ;;  %v823_v61 = vor.u32 8388608, %v822_v33 }
 0x16f   : > { %v7491_v28 = vmin.u32 %v777_v31, %v8618_v58  ;;  %v2430_v42 = vmul.u32 %v2423_v53, %v2414_v44  ;;  %vm2432_vm5 = vc.u32 %v8640_v8, %v8628_v41  ;;  %v828_v13 = vshrl.u32 %v827_v51, 5 }
 0x170   : > { %v830_v54 = vsub.s32 32, %v829_v60  ;;  %v2434_v27 = vsel %vm2432_vm5, %v2433_v9, %v8629_v26  ;;  %v832_v21 = vshll.u32 %v12056_v34, %v829_v60  ;;  %v835_v37 = vshll.u32 %v12050_v36, %v829_v60 }
 0x171   : > { %v838_v32 = vshll.u32 %v12043_v7, %v829_v60  ;;  %v2435_v15 = vadd.s32 %v2434_v27, %v2430_v42  ;;  %v2344_v53 = vshll.u32 %v8514_v22, %v8616_v5  ;;  %v2345_v50 = vshrl.u32 %v2327_v11, %v2343_v3  ;;  %v8686_v5 = vpop.f32.mrf.mxu1 }
 0x172   : > { %v833_v16 = vshrl.u32 %v12050_v36, %v830_v54  ;;  %v836_v33 = vshrl.u32 %v12043_v7, %v830_v54  ;;  %v839_v31 = vshrl.u32 %v12051_v39, %v830_v54  ;;  %v841_v26 = vshll.u32 %v12051_v39, %v829_v60  ;;  %12061 = vst [vmem:[#allocation21_spill] sm:$0xff] %v8686_v5 }
 0x173   : > { %v2349_v44 = vshll.u32 %v2348_v47, 23  ;;  %v779_v9 = vclz %v7491_v28  ;;  %v2436_v0 = vadd.s32 536870912, %v2435_v15  ;;  %v842_v55 = vshrl.u32 %v12038_v48, %v830_v54 }
 0x174   : > { %v834_v25 = vor.u32 %v833_v16, %v832_v21  ;;  %v837_v42 = vor.u32 %v836_v33, %v835_v37  ;;  %v840_v51 = vor.u32 %v839_v31, %v838_v32  ;;  %v844_v27 = vshll.u32 %v12038_v48, %v829_v60 }
 0x175   : > { %v8683_v24 = vshrl.u32 %v2436_v0, 30  ;;  %v843_v14 = vor.u32 %v842_v55, %v841_v26  ;;  %v845_v22 = vshrl.u32 %v12039_v63, %v830_v54  ;;  %vm847_vm6 = vcmp.lt.s32.totalorder %v828_v13, 1 }
 0x176   : > { %v831_v11 = vshrl.u32 %v12056_v34, %v830_v54  ;;  %vm849_vm8 = vcmp.lt.s32.totalorder %v828_v13, 3  ;;  %vm850_vm9 = vcmp.lt.s32.totalorder %v828_v13, 4  ;;  %v863_v3 = vshll.u32 %v823_v61, 8 }
 0x177   : > { %vm11877_vm11 = vcmp.lt.s32.totalorder %v8139_v38, 0  ;;  %v7492_v47 = vadd.s32 4294967294, %v779_v9  ;;  %v2438_v28 = vshll.u32 %v8683_v24, 30  ;;  %v846_v21 = vor.u32 %v845_v22, %v844_v27 }
 0x178   : > { %vm848_vm12 = vcmp.lt.s32.totalorder %v828_v13, 2  ;;  %v8691_v0 = vpop.eup %7891  ;;  %vm609_vm14 = vcmp.lt.s32.totalorder %v8293_v45, 0  ;;  %v852_v55 = vsel %vm850_vm9, %v840_v51, 2102212464  ;;  %v855_v60 = vsel %vm847_vm6, %v834_v25, %v837_v42 }
 0x179   : > { %12062 = vst [vmem:[#allocation22_spill] sm:$0xff] %v8691_v0  ;;  %v856_v54 = vsel %vm850_vm9, %v843_v14, 920167782  ;;  %v2482_v37 = vand.u32 2139095040, %v8686_v5  ;;  %v2346_v61 = vor.u32 %v2345_v50, %v2344_v53  ;;  %v2350_v32 = vor.u32 4788187, %v2349_v44 }
 0x17a   : > { %v8698_v16 = vsub.s32 %v2435_v15, %v2438_v28  ;;  %v857_v33 = vsel %vm849_vm8, %v840_v51, %v856_v54  ;;  %v12063_v31 = vand.u32 2147483647, %v8139_v38  ;;  %v12064_v26 = vmov 0 }
 0x17b   : > { %v851_v9 = vsel %vm847_vm6, %v831_v11, %v834_v25  ;;  %v853_v27 = vsel %vm849_vm8, %v837_v42, %v852_v55  ;;  %v858_v22 = vsel %vm848_vm12, %v855_v60, %v857_v33  ;;  %v859_v2 = vsel %vm847_vm6, %v837_v42, %v840_v51 }
 0x17c   : > { %vm8703_vm15 = vcmp.le.f32.partialorder %v12063_v31, 0.7853982  ;;  %v2441_v53 = vsub.s32 0, %v8698_v16  ;;  %v860_v15 = vsel %vm850_vm9, %v846_v21, 1326507024  ;;  %v12067_v28 = vcvt.s32.f32 %v8606_v46 }
 0x17d   : > { %v12065_v26 = vsel %vm8703_vm15, 4294967295, %v12064_v26  ;;  %v8713_v50 = vmul.u32.u64.low %v863_v3, %v858_v22  ;;  %v8714_v44 = vmul.u32.u64.high %v863_v3, %v858_v22, %v8713_v50  ;;  %vm7493_vm0 = vcmp.lt.s32.totalorder %v7492_v47, 0 }
 0x17e   : > { %12066 = vst [vmem:[#allocation23_spill] sm:$0xff] %v12065_v26  ;;  %v690_v54 = vmul.f32 %v12067_v28, %v687_v1  ;;  %v861_v25 = vsel %vm849_vm8, %v843_v14, %v860_v15  ;;  %v2483_v11 = vshrl.u32 %v2482_v37, 23  ;;  %v693_v55 = vsub.s32 4, %v8429_v4 }
 0x17f   : > { %v2351_v60 = vand.u32 2147483647, %v2350_v32  ;;  %v854_v42 = vsel %vm848_vm12, %v851_v9, %v853_v27  ;;  %v862_v51 = vsel %vm848_vm12, %v859_v2, %v861_v25  ;;  %v7555_v21 = vmin.u32 %v2441_v53, %v8698_v16 }
 0x180   : > { %v8724_v33 = vmul.u32.u64.low %v863_v3, %v862_v51  ;;  %v8725_v31 = vmul.u32.u64.high %v863_v3, %v862_v51, %v8724_v33  ;;  %v7558_v22 = vadd.s32 4294967169, %v2483_v11  ;;  %7893 = vcosq.f32 %v8657_v52 }
 0x181   : > { %v2353_v46 = vcvt.s32.f32 %v2346_v61  ;;  %v8728_v1 = vsel %vm7493_vm0, 0, %v7492_v47  ;;  %v873_v14 = vadd.s32 1, %v8714_v44  ;;  %v12068_v37 = vxor.u32 2147483648, %v8562_v59 }
 0x182   : > { %v691_v2 = vxor.u32 2147483648, %v690_v54  ;;  %v870_v32 = vmul.u32 %v863_v3, %v854_v42  ;;  %v2489_v9 = vadd.s32 1, %v7558_v22  ;;  %7895 = vsinq.f32 %v8657_v52 }
 0x183   : > { %v2252_v13 = vsel %vm11877_vm11, %v12068_v37, %v8562_v59  ;;  %v8740_v27 = vsel %vm609_vm14, %v693_v55, %v8429_v4  ;;  %v8742_v47 = vmul.f32 %v2353_v46, %v2351_v60  ;;  %v11855_v61 = vand.u32 2147483647, %v8686_v5  ;;  %v8761_v60 = vpop.f32.mrf.mxu0 }
 0x184   : > { %12069 = vst [vmem:[#allocation24_spill] sm:$0xff] %v8740_v27  ;;  %v787_v53 = vsub.s32 4294967266, %v8728_v1  ;;  %v2443_v15 = vclz %v7555_v21  ;;  %vm872_vm3 = vc.u32 %v8725_v31, %v8713_v50  ;;  %vm2490_vm4 = vcmp.gt.s32.totalorder %v2489_v9, 0  ;;  %12070 = vst [vmem:[#allocation25_spill] sm:$0xff] %v8761_v60 }
 0x185   : > { %v8751_v59 = vsel %vm8703_vm15, %v8139_v38, %v2252_v13  ;;  %v874_v4 = vsel %vm872_vm3, %v873_v14, %v8714_v44  ;;  %v2491_v3 = vsel %vm2490_vm4, %v2489_v9, 0  ;;  %v8757_v28 = vsel %vm609_vm14, %v691_v2, %v690_v54 }
 0x186   : > { %v767_v25 = vadd.s32 %v8524_v62, %v8533_v57  ;;  %v875_v11 = vadd.s32 %v874_v4, %v870_v32  ;;  %v2493_v55 = vand.u32 31, %v2491_v3  ;;  %v783_v51 = vsub.s32 32, %v8728_v1 }
 0x187   : > { %v2486_v44 = vand.u32 8388607, %v11855_v61  ;;  %v788_v33 = vadd.s32 127, %v787_v53  ;;  %v7556_v54 = vadd.s32 4294967294, %v2443_v15  ;;  %v922_v37 = vand.u32 2139095040, %v8761_v60 }
 0x188   : > { %v876_v22 = vadd.s32 536870912, %v875_v11  ;;  %v2494_v46 = vsub.s32 32, %v2493_v55  ;;  %v2496_v62 = vshll.u32 %v12056_v34, %v2493_v55  ;;  %v2499_v57 = vshll.u32 %v12050_v36, %v2493_v55 }
 0x189   : > { %v2505_v14 = vshll.u32 %v12051_v39, %v2493_v55  ;;  %v2502_v9 = vshll.u32 %v12043_v7, %v2493_v55  ;;  %v2487_v53 = vor.u32 8388608, %v2486_v44  ;;  %v2492_v15 = vshrl.u32 %v2491_v3, 5 }
 0x18a   : > { %v8773_v13 = vshrl.u32 %v876_v22, 30  ;;  %v2497_v2 = vshrl.u32 %v12050_v36, %v2494_v46  ;;  %v2500_v32 = vshrl.u32 %v12043_v7, %v2494_v46  ;;  %v2503_v4 = vshrl.u32 %v12051_v39, %v2494_v46 }
 0x18b   : > { %v2506_v61 = vshrl.u32 %v12038_v48, %v2494_v46  ;;  %v12071_v52 = vand.u32 2147483647, %v8293_v45  ;;  %v12072_v42 = vmov 0  ;;  %v785_v22 = vshrl.u32 %v767_v25, %v783_v51 }
 0x18c   : > { %v789_v21 = vshll.u32 %v788_v33, 23  ;;  %vm7557_vm6 = vcmp.lt.s32.totalorder %v7556_v54, 0  ;;  %v878_v27 = vshll.u32 %v8773_v13, 30  ;;  %v2498_v0 = vor.u32 %v2497_v2, %v2496_v62 }
 0x18d   : > { %vm8782_vm5 = vcmp.le.f32.partialorder %v12071_v52, 0.7853982  ;;  %v2501_v20 = vor.u32 %v2500_v32, %v2499_v57  ;;  %v2507_v12 = vor.u32 %v2506_v61, %v2505_v14  ;;  %v923_v44 = vshrl.u32 %v922_v37, 23  ;;  %v8787_v3 = vpop.eup %7893 }
 0x18e   : > { %v12073_v42 = vsel %vm8782_vm5, 4294967295, %v12072_v42  ;;  %12075 = vst [vmem:[#allocation27_spill] sm:$0xff] %v8787_v3  ;;  %vm2273_vm8 = vcmp.lt.s32.totalorder %v8344_v18, 0  ;;  %v8790_v49 = vsub.s32 %v875_v11, %v878_v27  ;;  %v2504_v26 = vor.u32 %v2503_v4, %v2502_v9 }
 0x18f   : > { %12074 = vst [vmem:[#allocation26_spill] sm:$0xff] %v12073_v42  ;;  %v2508_v52 = vshll.u32 %v12038_v48, %v2493_v55  ;;  %v2509_v38 = vshrl.u32 %v12039_v63, %v2494_v46  ;;  %v2495_v25 = vshrl.u32 %v12056_v34, %v2494_v46  ;;  %vm2511_vm9 = vcmp.lt.s32.totalorder %v2492_v15, 1  ;;  %v8795_v33 = vpop.eup %7895 }
 0x190   : > { %vm2513_vm12 = vcmp.lt.s32.totalorder %v2492_v15, 3  ;;  %v2527_v51 = vshll.u32 %v2487_v53, 8  ;;  %12076 = vst [vmem:[#allocation28_spill] sm:$0xff] %v8795_v33  ;;  %v8798_v61 = vsel %vm7557_vm6, 0, %v7556_v54  ;;  %vm2512_vm14 = vcmp.lt.s32.totalorder %v2492_v15, 2 }
 0x191   : > { %v2510_v62 = vor.u32 %v2509_v38, %v2508_v52  ;;  %vm2514_vm0 = vcmp.lt.s32.totalorder %v2492_v15, 4  ;;  %v881_v27 = vsub.s32 0, %v8790_v49  ;;  %v2519_v55 = vsel %vm2511_vm9, %v2498_v0, %v2501_v20 }
 0x192   : > { %v2516_v11 = vsel %vm2514_vm0, %v2504_v26, 2102212464  ;;  %v2520_v57 = vsel %vm2514_vm0, %v2507_v12, 920167782  ;;  %v12077_v14 = vand.u32 2147483647, %v8344_v18  ;;  %v2523_v54 = vsel %vm2511_vm9, %v2501_v20, %v2504_v26 }
 0x193   : > { %v12078_v46 = vmov 0  ;;  %v790_v37 = vor.u32 4788187, %v789_v21  ;;  %v2521_v2 = vsel %vm2513_vm12, %v2504_v26, %v2520_v57  ;;  %v7498_v38 = vadd.s32 4294967169, %v923_v44 }
 0x194   : > { %vm8804_vm3 = vcmp.le.f32.partialorder %v12077_v14, 0.7853982  ;;  %v2515_v32 = vsel %vm2511_vm9, %v2495_v25, %v2498_v0  ;;  %v2517_v9 = vsel %vm2513_vm12, %v2501_v20, %v2516_v11  ;;  %v2522_v53 = vsel %vm2512_vm14, %v2519_v55, %v2521_v2 }
 0x195   : > { %v12079_v46 = vsel %vm8804_vm3, 4294967295, %v12078_v46  ;;  %v2524_v4 = vsel %vm2514_vm0, %v2510_v62, 1326507024  ;;  %v2451_v52 = vsub.s32 4294967266, %v8798_v61  ;;  %7897 = vcosq.f32 %v8751_v59 }
 0x196   : > { %12080 = vst [vmem:[#allocation29_spill] sm:$0xff] %v12079_v46  ;;  %v2525_v14 = vsel %vm2513_vm12, %v2507_v12, %v2524_v4  ;;  %v8815_v3 = vmul.u32.u64.low %v2527_v51, %v2522_v53  ;;  %v8816_v33 = vmul.u32.u64.high %v2527_v51, %v2522_v53, %v8815_v3  ;;  %v695_v0 = vsel %vm8782_vm5, %v8293_v45, %v8757_v28 }
 0x197   : > { %v7495_v20 = vmin.u32 %v881_v27, %v8790_v49  ;;  %v2526_v26 = vsel %vm2512_vm14, %v2523_v54, %v2525_v14  ;;  %v12081_v21 = vshll.u32 %v8618_v58, %v8728_v1  ;;  %v2518_v12 = vsel %vm2512_vm14, %v2515_v32, %v2517_v9 }
 0x198   : > { %v8830_v25 = vmul.u32.u64.low %v2527_v51, %v2526_v26  ;;  %v8831_v62 = vmul.u32.u64.high %v2527_v51, %v2526_v26, %v8830_v25  ;;  %7899 = vsinq.f32 %v8751_v59  ;;  %v12082_v11 = vxor.u32 2147483648, %v8742_v47 }
 0x199   : > { %v786_v44 = vor.u32 %v785_v22, %v12081_v21  ;;  %v12083_v27 = vsub.s32 4, %v8499_v40  ;;  %v929_v1 = vadd.s32 1, %v7498_v38  ;;  %v791_v15 = vand.u32 2147483647, %v790_v37 }
 0x19a   : > { %v2356_v28 = vsel %vm2273_vm8, %v12082_v11, %v8742_v47  ;;  %v2452_v22 = vadd.s32 127, %v2451_v52  ;;  %v2537_v55 = vadd.s32 1, %v8816_v33  ;;  %v11865_v59 = vand.u32 2147483647, %v8761_v60 }
 0x19b   : > { %v8844_v58 = vsel %vm2273_vm8, %v12083_v27, %v8499_v40  ;;  %7901 = vcosq.f32 %v695_v0  ;;  %v883_v57 = vclz %v7495_v20  ;;  %v2534_v2 = vmul.u32 %v2527_v51, %v2518_v12  ;;  %v8859_v51 = vpop.f32.mrf.mxu1 }
 0x19c   : > { %12084 = vst [vmem:[#allocation30_spill] sm:$0xff] %v8844_v58  ;;  %vm930_vm4 = vcmp.gt.s32.totalorder %v929_v1, 0  ;;  %7903 = vsinq.f32 %v695_v0  ;;  %v793_v47 = vcvt.s32.f32 %v786_v44  ;;  %v2447_v32 = vsub.s32 32, %v8798_v61 }
 0x19d   : > { %v8853_v40 = vsel %vm8804_vm3, %v8344_v18, %v2356_v28  ;;  %v2431_v37 = vadd.s32 %v8628_v41, %v8640_v8  ;;  %vm2536_vm6 = vc.u32 %v8831_v62, %v8815_v3  ;;  %v931_v38 = vsel %vm930_vm4, %v929_v1, 0 }
 0x19e   : > { %v8861_v9 = vmul.f32 %v793_v47, %v791_v15  ;;  %v2453_v53 = vshll.u32 %v2452_v22, 23  ;;  %v2538_v4 = vsel %vm2536_vm6, %v2537_v55, %v8816_v33  ;;  %v926_v52 = vand.u32 8388607, %v11865_v59 }
 0x19f   : > { %v7496_v14 = vadd.s32 4294967294, %v883_v57  ;;  %v2539_v0 = vadd.s32 %v2538_v4, %v2534_v2  ;;  %v933_v20 = vand.u32 31, %v931_v38  ;;  %v2448_v41 = vshll.u32 %v8698_v16, %v8798_v61 }
 0x1a0   : > { %v2449_v8 = vshrl.u32 %v2431_v37, %v2447_v32  ;;  %v932_v21 = vshrl.u32 %v931_v38, 5  ;;  %v2586_v44 = vand.u32 2139095040, %v8859_v51  ;;  %v8872_v28 = vor.u32 4788187, %v2453_v53 }
 0x1a1   : > { %v2540_v12 = vadd.s32 536870912, %v2539_v0  ;;  %v934_v25 = vsub.s32 32, %v933_v20  ;;  %v936_v11 = vshll.u32 %v12056_v34, %v933_v20  ;;  %v939_v33 = vshll.u32 %v12050_v36, %v933_v20 }
 0x1a2   : > { %v927_v27 = vor.u32 8388608, %v926_v52  ;;  %v942_v1 = vshll.u32 %v12043_v7, %v933_v20  ;;  %v945_v15 = vshll.u32 %v12051_v39, %v933_v20  ;;  %vm7497_vm8 = vcmp.lt.s32.totalorder %v7496_v14, 0  ;;  %v8880_v55 = vpop.eup %7897 }
 0x1a3   : > { %v8876_v22 = vshrl.u32 %v2540_v12, 30  ;;  %v937_v16 = vshrl.u32 %v12050_v36, %v934_v25  ;;  %v940_v61 = vshrl.u32 %v12043_v7, %v934_v25  ;;  %12085 = vst [vmem:[#allocation31_spill] sm:$0xff] %v8880_v55  ;;  %v943_v57 = vshrl.u32 %v12051_v39, %v934_v25 }
 0x1a4   : > { %v946_v2 = vshrl.u32 %v12038_v48, %v934_v25  ;;  %v948_v47 = vshll.u32 %v12038_v48, %v933_v20  ;;  %v2587_v32 = vshrl.u32 %v2586_v44, 23  ;;  %vm951_vm9 = vcmp.lt.s32.totalorder %v932_v21, 1 }
 0x1a5   : > { %v2542_v37 = vshll.u32 %v8876_v22, 30  ;;  %v938_v38 = vor.u32 %v937_v16, %v936_v11  ;;  %v941_v53 = vor.u32 %v940_v61, %v939_v33  ;;  %v8886_v4 = vpop.eup %7899  ;;  %v935_v52 = vshrl.u32 %v12056_v34, %v934_v25 }
 0x1a6   : > { %v944_v12 = vor.u32 %v943_v57, %v942_v1  ;;  %v947_v59 = vor.u32 %v946_v2, %v945_v15  ;;  %v949_v54 = vshrl.u32 %v12039_v63, %v934_v25  ;;  %v886_v26 = vsel %vm7497_vm8, 0, %v7496_v14 }
 0x1a7   : > { %v8891_v18 = vsub.s32 %v2539_v0, %v2542_v37  ;;  %vm953_vm12 = vcmp.lt.s32.totalorder %v932_v21, 3  ;;  %vm954_vm14 = vcmp.lt.s32.totalorder %v932_v21, 4  ;;  %vm713_vm0 = vcmp.lt.s32.totalorder %v8393_v10, 0 }
 0x1a8   : > { %v8893_v20 = vpop.eup %7901  ;;  %v950_v44 = vor.u32 %v949_v54, %v948_v47  ;;  %vm952_vm4 = vcmp.lt.s32.totalorder %v932_v21, 2  ;;  %v956_v11 = vsel %vm954_vm14, %v944_v12, 2102212464  ;;  %v967_v33 = vshll.u32 %v927_v27, 8 }
 0x1a9   : > { %12086 = vst [vmem:[#allocation32_spill] sm:$0xff] %v8893_v20  ;;  %v8897_v16 = vpop.eup %7903  ;;  %v2545_v1 = vsub.s32 0, %v8891_v18  ;;  %v959_v25 = vsel %vm951_vm9, %v938_v38, %v941_v53  ;;  %v960_v14 = vsel %vm954_vm14, %v947_v59, 920167782  ;;  %v7562_v0 = vadd.s32 4294967169, %v2587_v32 }
 0x1aa   : > { %12087 = vst [vmem:[#allocation33_spill] sm:$0xff] %v8897_v16  ;;  %v955_v15 = vsel %vm951_vm9, %v935_v52, %v938_v38  ;;  %v957_v61 = vsel %vm953_vm12, %v941_v53, %v956_v11  ;;  %v961_v57 = vsel %vm953_vm12, %v944_v12, %v960_v14  ;;  %v963_v54 = vsel %vm951_vm9, %v941_v53, %v944_v12 }
 0x1ab   : > { %v891_v2 = vsub.s32 4294967266, %v886_v26  ;;  %v7559_v27 = vmin.u32 %v2545_v1, %v8891_v18  ;;  %v962_v47 = vsel %vm952_vm4, %v959_v25, %v961_v57  ;;  %v964_v37 = vsel %vm954_vm14, %v950_v44, 1326507024 }
 0x1ac   : > { %v965_v46 = vsel %vm953_vm12, %v947_v59, %v964_v37  ;;  %v8910_v58 = vmul.u32.u64.low %v967_v33, %v962_v47  ;;  %v8911_v45 = vmul.u32.u64.high %v967_v33, %v962_v47, %v8910_v58  ;;  %v12088_v32 = vand.u32 2147483647, %v8859_v51 }
 0x1ad   : > { %v887_v52 = vsub.s32 32, %v886_v26  ;;  %v2547_v11 = vclz %v7559_v27  ;;  %v958_v53 = vsel %vm952_vm4, %v955_v15, %v957_v61  ;;  %v966_v12 = vsel %vm952_vm4, %v963_v54, %v965_v46 }
 0x1ae   : > { %v2590_v38 = vand.u32 8388607, %v12088_v32  ;;  %v2450_v1 = vor.u32 %v2449_v8, %v2448_v41  ;;  %v8918_v14 = vmul.u32.u64.low %v967_v33, %v966_v12  ;;  %v8919_v25 = vmul.u32.u64.high %v967_v33, %v966_v12, %v8918_v14 }
 0x1af   : > { %v2593_v44 = vadd.s32 1, %v7562_v0  ;;  %v795_v59 = vxor.u32 2147483648, %v8861_v9  ;;  %v871_v57 = vadd.s32 %v8713_v50, %v8725_v31  ;;  %v892_v47 = vadd.s32 127, %v891_v2 }
 0x1b0   : > { %v7560_v37 = vadd.s32 4294967294, %v2547_v11  ;;  %v2455_v32 = vand.u32 2147483647, %v8872_v28  ;;  %v974_v20 = vmul.u32 %v967_v33, %v958_v53  ;;  %v977_v27 = vadd.s32 1, %v8911_v45 }
 0x1b1   : > { %vm2594_vm6 = vcmp.gt.s32.totalorder %v2593_v44, 0  ;;  %v12089_v46 = vsub.s32 4, %v8578_v23  ;;  %v889_v8 = vshrl.u32 %v871_v57, %v887_v52  ;;  %v2591_v21 = vor.u32 8388608, %v2590_v38  ;;  %v8946_v38 = vpop.f32.mrf.mxu0 }
 0x1b2   : > { %v2595_v0 = vsel %vm2594_vm6, %v2593_v44, 0  ;;  %7905 = vcosq.f32 %v8853_v40  ;;  %v2457_v50 = vcvt.s32.f32 %v2450_v1  ;;  %vm7561_vm8 = vcmp.lt.s32.totalorder %v7560_v37, 0  ;;  %12091 = vst [vmem:[#allocation35_spill] sm:$0xff] %v8946_v38 }
 0x1b3   : > { %v8931_v41 = vsel %vm713_vm0, %v12089_v46, %v8578_v23  ;;  %vm976_vm9 = vc.u32 %v8919_v25, %v8910_v58  ;;  %v888_v28 = vshll.u32 %v8790_v49, %v886_v26  ;;  %v893_v33 = vshll.u32 %v892_v47, 23 }
 0x1b4   : > { %12090 = vst [vmem:[#allocation34_spill] sm:$0xff] %v8931_v41  ;;  %v978_v15 = vsel %vm976_vm9, %v977_v27, %v8911_v45  ;;  %v8942_v23 = vsel %vm713_vm0, %v795_v59, %v8861_v9  ;;  %v8944_v61 = vmul.f32 %v2457_v50, %v2455_v32  ;;  %v2597_v2 = vand.u32 31, %v2595_v0 }
 0x1b5   : > { %v979_v54 = vadd.s32 %v978_v15, %v974_v20  ;;  %v8948_v52 = vor.u32 %v889_v8, %v888_v28  ;;  %v8950_v11 = vsel %vm7561_vm8, 0, %v7560_v37  ;;  %v2596_v53 = vshrl.u32 %v2595_v0, 5 }
 0x1b6   : > { %v8952_v49 = vshll.u32 %v2591_v21, 8  ;;  %v2598_v45 = vsub.s32 32, %v2597_v2  ;;  %v2600_v12 = vshll.u32 %v12056_v34, %v2597_v2  ;;  %v2603_v9 = vshll.u32 %v12050_v36, %v2597_v2 }
 0x1b7   : > { %v980_v26 = vadd.s32 536870912, %v979_v54  ;;  %v8956_v1 = vor.u32 4788187, %v893_v33  ;;  %v2606_v20 = vshll.u32 %v12043_v7, %v2597_v2  ;;  %v2609_v14 = vshll.u32 %v12051_v39, %v2597_v2 }
 0x1b8   : > { %v1026_v44 = vand.u32 2139095040, %v8946_v38  ;;  %v2555_v59 = vsub.s32 4294967266, %v8950_v11  ;;  %v2601_v47 = vshrl.u32 %v12050_v36, %v2598_v45  ;;  %v2604_v37 = vshrl.u32 %v12043_v7, %v2598_v45 }
 0x1b9   : > { %v8962_v57 = vshrl.u32 %v980_v26, 30  ;;  %v2607_v32 = vshrl.u32 %v12051_v39, %v2598_v45  ;;  %v2610_v27 = vshrl.u32 %v12038_v48, %v2598_v45  ;;  %vm2615_vm12 = vcmp.lt.s32.totalorder %v2596_v53, 1 }
 0x1ba   : > { %vm2617_vm14 = vcmp.lt.s32.totalorder %v2596_v53, 3  ;;  %v2602_v8 = vor.u32 %v2601_v47, %v2600_v12  ;;  %v2605_v21 = vor.u32 %v2604_v37, %v2603_v9  ;;  %vm2618_vm0 = vcmp.lt.s32.totalorder %v2596_v53, 4 }
 0x1bb   : > { %v982_v46 = vshll.u32 %v8962_v57, 30  ;;  %v2599_v0 = vshrl.u32 %v12056_v34, %v2598_v45  ;;  %v2608_v50 = vor.u32 %v2607_v32, %v2606_v20  ;;  %v2611_v28 = vor.u32 %v2610_v27, %v2609_v14 }
 0x1bc   : > { %v2612_v33 = vshll.u32 %v12038_v48, %v2597_v2  ;;  %v12092_v15 = vand.u32 2147483647, %v8393_v10  ;;  %v12093_v26 = vmov 0  ;;  %v2613_v41 = vshrl.u32 %v12039_v63, %v2598_v45 }
 0x1bd   : > { %v8977_v31 = vsub.s32 %v979_v54, %v982_v46  ;;  %vm2616_vm6 = vcmp.lt.s32.totalorder %v2596_v53, 2  ;;  %v1027_v12 = vshrl.u32 %v1026_v44, 23  ;;  %v2551_v9 = vsub.s32 32, %v8950_v11 }
 0x1be   : > { %vm8973_vm4 = vcmp.le.f32.partialorder %v12092_v15, 0.7853982  ;;  %v2620_v47 = vsel %vm2618_vm0, %v2608_v50, 2102212464  ;;  %v2623_v20 = vsel %vm2615_vm12, %v2602_v8, %v2605_v21  ;;  %v2624_v2 = vsel %vm2618_vm0, %v2611_v28, 920167782 }
 0x1bf   : > { %v12094_v26 = vsel %vm8973_vm4, 4294967295, %v12093_v26  ;;  %vm2377_vm8 = vcmp.lt.s32.totalorder %v8489_v29, 0  ;;  %v2556_v14 = vadd.s32 127, %v2555_v59  ;;  %v985_v37 = vsub.s32 0, %v8977_v31  ;;  %v8987_v27 = vpop.eup %7905 }
 0x1c0   : > { %12095 = vst [vmem:[#allocation36_spill] sm:$0xff] %v12094_v26  ;;  %v2614_v32 = vor.u32 %v2613_v41, %v2612_v33  ;;  %v2625_v54 = vsel %vm2617_vm14, %v2608_v50, %v2624_v2  ;;  %12096 = vst [vmem:[#allocation37_spill] sm:$0xff] %v8987_v27  ;;  %v2619_v45 = vsel %vm2615_vm12, %v2599_v0, %v2602_v8  ;;  %v11875_v0 = vand.u32 2147483647, %v8946_v38 }
 0x1c1   : > { %v2621_v44 = vsel %vm2617_vm14, %v2605_v21, %v2620_v47  ;;  %v2626_v46 = vsel %vm2616_vm6, %v2623_v20, %v2625_v54  ;;  %v2627_v15 = vsel %vm2615_vm12, %v2605_v21, %v2608_v50  ;;  %v7499_v16 = vmin.u32 %v985_v37, %v8977_v31 }
 0x1c2   : > { %v2628_v42 = vsel %vm2618_vm0, %v2614_v32, 1326507024  ;;  %v8996_v59 = vmul.u32.u64.low %v8952_v49, %v2626_v46  ;;  %v8997_v55 = vmul.u32.u64.high %v8952_v49, %v2626_v46, %v8996_v59  ;;  %v2535_v41 = vadd.s32 %v8815_v3, %v8831_v62 }
 0x1c3   : > { %v2629_v8 = vsel %vm2617_vm14, %v2611_v28, %v2628_v42  ;;  %v7502_v33 = vadd.s32 4294967169, %v1027_v12  ;;  %v895_v47 = vand.u32 2147483647, %v8956_v1  ;;  %v987_v21 = vclz %v7499_v16 }
 0x1c4   : > { %v2622_v50 = vsel %vm2616_vm6, %v2619_v45, %v2621_v44  ;;  %v2630_v20 = vsel %vm2616_vm6, %v2627_v15, %v2629_v8  ;;  %v897_v2 = vcvt.s32.f32 %v8948_v52  ;;  %v2553_v3 = vshrl.u32 %v2535_v41, %v2551_v9 }
 0x1c5   : > { %v9009_v37 = vmul.u32.u64.low %v8952_v49, %v2630_v20  ;;  %v9010_v32 = vmul.u32.u64.high %v8952_v49, %v2630_v20, %v9009_v37  ;;  %v1033_v54 = vadd.s32 1, %v7502_v33  ;;  %v2557_v62 = vshll.u32 %v2556_v14, 23 }
 0x1c6   : > { %v7500_v42 = vadd.s32 4294967294, %v987_v21  ;;  %v2641_v28 = vadd.s32 1, %v8997_v55  ;;  %v9017_v16 = vsel %vm8973_vm4, %v8393_v10, %v8942_v23  ;;  %v2638_v53 = vmul.u32 %v8952_v49, %v2622_v50 }
 0x1c7   : > { %v1030_v52 = vand.u32 8388607, %v11875_v0  ;;  %vm1034_vm9 = vcmp.gt.s32.totalorder %v1033_v54, 0  ;;  %v2459_v1 = vxor.u32 2147483648, %v8944_v61  ;;  %v9023_v12 = vmul.f32 %v897_v2, %v895_v47 }
 0x1c8   : > { %v2552_v9 = vshll.u32 %v8891_v18, %v8950_v11  ;;  %v1035_v14 = vsel %vm1034_vm9, %v1033_v54, 0  ;;  %7907 = vsinq.f32 %v8853_v40  ;;  %v12097_v23 = vsub.s32 4, %v8683_v24 }
 0x1c9   : > { %vm7501_vm12 = vcmp.lt.s32.totalorder %v7500_v42, 0  ;;  %vm2640_vm14 = vc.u32 %v9010_v32, %v8996_v59  ;;  %7909 = vcosq.f32 %v9017_v16  ;;  %v2558_v44 = vor.u32 4788187, %v2557_v62 }
 0x1ca   : > { %v9033_v49 = vsel %vm2377_vm8, %v12097_v23, %v8683_v24  ;;  %v2554_v45 = vor.u32 %v2553_v3, %v2552_v9  ;;  %v2642_v18 = vsel %vm2640_vm14, %v2641_v28, %v8997_v55  ;;  %v1031_v46 = vor.u32 8388608, %v1030_v52 }
 0x1cb   : > { %12098 = vst [vmem:[#allocation38_spill] sm:$0xff] %v9033_v49  ;;  %v2643_v40 = vadd.s32 %v2642_v18, %v2638_v53  ;;  %v1037_v15 = vand.u32 31, %v1035_v14  ;;  %v2460_v24 = vsel %vm2377_vm8, %v2459_v1, %v8944_v61  ;;  %v899_v41 = vxor.u32 2147483648, %v9023_v12 }
 0x1cc   : > { %v9044_v8 = vsel %vm7501_vm12, 0, %v7500_v42  ;;  %v1036_v33 = vshrl.u32 %v1035_v14, 5  ;;  %v2559_v20 = vand.u32 2147483647, %v2558_v44  ;;  %v2561_v2 = vcvt.s32.f32 %v2554_v45  ;;  %v9066_v14 = vpop.f32.mrf.mxu1 }
 0x1cd   : > { %v2644_v47 = vadd.s32 536870912, %v2643_v40  ;;  %v1038_v21 = vsub.s32 32, %v1037_v15  ;;  %v1040_v50 = vshll.u32 %v12056_v34, %v1037_v15  ;;  %v1043_v55 = vshll.u32 %v12050_v36, %v1037_v15  ;;  %12103 = vst [vmem:[#allocation40_spill] sm:$0xff] %v9066_v14 }
 0x1ce   : > { %v1046_v37 = vshll.u32 %v12043_v7, %v1037_v15  ;;  %v1049_v54 = vshll.u32 %v12051_v39, %v1037_v15  ;;  %v9054_v42 = vshll.u32 %v1031_v46, 8  ;;  %v12099_v28 = vand.u32 2147483647, %v8489_v29 }
 0x1cf   : > { %v9050_v3 = vshrl.u32 %v2644_v47, 30  ;;  %v1041_v61 = vshrl.u32 %v12050_v36, %v1038_v21  ;;  %v1044_v62 = vshrl.u32 %v12043_v7, %v1038_v21  ;;  %v12100_v53 = vmov 0 }
 0x1d0   : > { %vm9058_vm0 = vcmp.le.f32.partialorder %v12099_v28, 0.7853982  ;;  %vm817_vm6 = vcmp.lt.s32.totalorder %v8553_v17, 0  ;;  %v995_v52 = vsub.s32 4294967266, %v9044_v8  ;;  %v1047_v1 = vshrl.u32 %v12051_v39, %v1038_v21 }
 0x1d1   : > { %v12101_v53 = vsel %vm9058_vm0, 4294967295, %v12100_v53  ;;  %v1050_v9 = vshrl.u32 %v12038_v48, %v1038_v21  ;;  %vm1055_vm8 = vcmp.lt.s32.totalorder %v1036_v33, 1  ;;  %v1042_v23 = vor.u32 %v1041_v61, %v1040_v50 }
 0x1d2   : > { %12102 = vst [vmem:[#allocation39_spill] sm:$0xff] %v12101_v53  ;;  %v1045_v45 = vor.u32 %v1044_v62, %v1043_v55  ;;  %vm1057_vm9 = vcmp.lt.s32.totalorder %v1036_v33, 3  ;;  %vm1058_vm12 = vcmp.lt.s32.totalorder %v1036_v33, 4  ;;  %v1039_v44 = vshrl.u32 %v12056_v34, %v1038_v21 }
 0x1d3   : > { %v1048_v18 = vor.u32 %v1047_v1, %v1046_v37  ;;  %v1051_v46 = vor.u32 %v1050_v9, %v1049_v54  ;;  %v1052_v47 = vshll.u32 %v12038_v48, %v1037_v15  ;;  %v2646_v28 = vshll.u32 %v9050_v3, 30 }
 0x1d4   : > { %v1053_v0 = vshrl.u32 %v12039_v63, %v1038_v21  ;;  %vm1056_vm14 = vcmp.lt.s32.totalorder %v1036_v33, 2  ;;  %v2690_v11 = vand.u32 2139095040, %v9066_v14  ;;  %v12104_v49 = vand.u32 2147483647, %v8553_v17 }
 0x1d5   : > { %v12105_v50 = vmov 0  ;;  %v996_v55 = vadd.s32 127, %v995_v52  ;;  %v1060_v61 = vsel %vm1058_vm12, %v1048_v18, 2102212464  ;;  %v1063_v37 = vsel %vm1055_vm8, %v1042_v23, %v1045_v45  ;;  %v9084_v9 = vpop.eup %7907 }
 0x1d6   : > { %vm9075_vm1 = vcmp.le.f32.partialorder %v12104_v49, 0.7853982  ;;  %v1064_v15 = vsel %vm1058_vm12, %v1051_v46, 920167782  ;;  %v2562_v54 = vmul.f32 %v2561_v2, %v2559_v20  ;;  %v991_v62 = vsub.s32 32, %v9044_v8  ;;  %12108 = vst [vmem:[#allocation42_spill] sm:$0xff] %v9084_v9  ;;  %v9091_v26 = vpop.eup %7909 }
 0x1d7   : > { %v12106_v50 = vsel %vm9075_vm1, 4294967295, %v12105_v50  ;;  %v1054_v21 = vor.u32 %v1053_v0, %v1052_v47  ;;  %v1065_v1 = vsel %vm1057_vm9, %v1048_v18, %v1064_v15  ;;  %vm2481_vm11 = vcmp.lt.s32.totalorder %v8686_v5, 0  ;;  %12109 = vst [vmem:[#allocation43_spill] sm:$0xff] %v9091_v26 }
 0x1d8   : > { %12107 = vst [vmem:[#allocation41_spill] sm:$0xff] %v12106_v50  ;;  %v1059_v49 = vsel %vm1055_vm8, %v1039_v44, %v1042_v23  ;;  %v1061_v52 = vsel %vm1057_vm9, %v1045_v45, %v1060_v61  ;;  %v1066_v27 = vsel %vm1056_vm14, %v1063_v37, %v1065_v1  ;;  %v1067_v10 = vsel %vm1055_vm8, %v1045_v45, %v1048_v18 }
 0x1d9   : > { %v9093_v20 = vsub.s32 %v2643_v40, %v2646_v28  ;;  %v1068_v0 = vsel %vm1058_vm12, %v1054_v21, 1326507024  ;;  %v9097_v2 = vmul.u32.u64.low %v9054_v42, %v1066_v27  ;;  %v9098_v47 = vmul.u32.u64.high %v9054_v42, %v1066_v27, %v9097_v2 }
 0x1da   : > { %v975_v23 = vadd.s32 %v8910_v58, %v8919_v25  ;;  %v997_v44 = vshll.u32 %v996_v55, 23  ;;  %v1069_v61 = vsel %vm1057_vm9, %v1051_v46, %v1068_v0  ;;  %v2691_v37 = vshrl.u32 %v2690_v11, 23 }
 0x1db   : > { %v2463_v45 = vsel %vm9058_vm0, %v8489_v29, %v2460_v24  ;;  %v900_v40 = vsel %vm817_vm6, %v899_v41, %v9023_v12  ;;  %v12110_v18 = vand.u32 2147483647, %v8686_v5  ;;  %v12111_v27 = vmov 0 }
 0x1dc   : > { %v1062_v58 = vsel %vm1056_vm14, %v1059_v49, %v1061_v52  ;;  %v1070_v25 = vsel %vm1056_vm14, %v1067_v10, %v1069_v61  ;;  %v993_v46 = vshrl.u32 %v975_v23, %v991_v62  ;;  %v7566_v24 = vadd.s32 4294967169, %v2691_v37  ;;  %v9146_v61 = vpop.f32.mrf.mxu0 }
 0x1dd   : > { %vm9112_vm8 = vcmp.le.f32.partialorder %v12110_v18, 0.7853982  ;;  %v9119_v11 = vmul.u32.u64.low %v9054_v42, %v1070_v25  ;;  %v9120_v28 = vmul.u32.u64.high %v9054_v42, %v1070_v25, %v9119_v11  ;;  %7911 = vsinq.f32 %v9017_v16  ;;  %12116 = vst [vmem:[#allocation46_spill] sm:$0xff] %v9146_v61 }
 0x1de   : > { %v12112_v27 = vsel %vm9112_vm8, 4294967295, %v12111_v27  ;;  %v2563_v55 = vxor.u32 2147483648, %v2562_v54  ;;  %v2649_v12 = vsub.s32 0, %v9093_v20  ;;  %v1081_v41 = vadd.s32 1, %v9098_v47 }
 0x1df   : > { %12113 = vst [vmem:[#allocation44_spill] sm:$0xff] %v12112_v27  ;;  %v992_v15 = vshll.u32 %v8977_v31, %v9044_v8  ;;  %v998_v21 = vor.u32 4788187, %v997_v44  ;;  %v1078_v33 = vmul.u32 %v9054_v42, %v1062_v58  ;;  %v2697_v10 = vadd.s32 1, %v7566_v24 }
 0x1e0   : > { %7913 = vcosq.f32 %v2463_v45  ;;  %v12114_v62 = vsub.s32 4, %v8773_v13  ;;  %v903_v16 = vsel %vm9075_vm1, %v8553_v17, %v900_v40  ;;  %v2565_v49 = vsub.s32 4, %v8876_v22 }
 0x1e1   : > { %v994_v52 = vor.u32 %v993_v46, %v992_v15  ;;  %vm1080_vm9 = vc.u32 %v9120_v28, %v9097_v2  ;;  %v11882_v31 = vand.u32 2147483647, %v9066_v14  ;;  %vm2698_vm12 = vcmp.gt.s32.totalorder %v2697_v10, 0 }
 0x1e2   : > { %v9133_v1 = vsel %vm817_vm6, %v12114_v62, %v8773_v13  ;;  %7915 = vsinq.f32 %v2463_v45  ;;  %v2564_v8 = vsel %vm2481_vm11, %v2563_v55, %v2562_v54  ;;  %v7563_v13 = vmin.u32 %v2649_v12, %v9093_v20 }
 0x1e3   : > { %12115 = vst [vmem:[#allocation45_spill] sm:$0xff] %v9133_v1  ;;  %v1082_v42 = vsel %vm1080_vm9, %v1081_v41, %v9098_v47  ;;  %7917 = vcosq.f32 %v903_v16  ;;  %v999_v0 = vand.u32 2147483647, %v998_v21  ;;  %v2699_v44 = vsel %vm2698_vm12, %v2697_v10, 0 }
 0x1e4   : > { %v1083_v23 = vadd.s32 %v1082_v42, %v1078_v33  ;;  %7919 = vsinq.f32 %v903_v16  ;;  %v9151_v37 = vsel %vm2481_vm11, %v2565_v49, %v8876_v22  ;;  %v2701_v40 = vand.u32 31, %v2699_v44 }
 0x1e5   : > { %12117 = vst [vmem:[#allocation47_spill] sm:$0xff] %v9151_v37  ;;  %v9157_v54 = vsel %vm9112_vm8, %v8686_v5, %v2564_v8  ;;  %v1001_v47 = vcvt.s32.f32 %v994_v52  ;;  %v2694_v58 = vand.u32 8388607, %v11882_v31  ;;  %v2651_v25 = vclz %v7563_v13 }
 0x1e6   : > { %v1084_v18 = vadd.s32 536870912, %v1083_v23  ;;  %v2702_v46 = vsub.s32 32, %v2701_v40  ;;  %v1130_v22 = vand.u32 2139095040, %v9146_v61  ;;  %v2704_v12 = vshll.u32 %v12056_v34, %v2701_v40 }
 0x1e7   : > { %v9163_v24 = vmul.f32 %v1001_v47, %v999_v0  ;;  %v2707_v41 = vshll.u32 %v12050_v36, %v2701_v40  ;;  %v2700_v15 = vshrl.u32 %v2699_v44, 5  ;;  %v2710_v33 = vshll.u32 %v12043_v7, %v2701_v40 }
 0x1e8   : > { %v9165_v55 = vshrl.u32 %v1084_v18, 30  ;;  %v2705_v21 = vshrl.u32 %v12050_v36, %v2702_v46  ;;  %v2713_v10 = vshll.u32 %v12051_v39, %v2701_v40  ;;  %v2695_v16 = vor.u32 8388608, %v2694_v58 }
 0x1e9   : > { %v2708_v49 = vshrl.u32 %v12043_v7, %v2702_v46  ;;  %v2711_v52 = vshrl.u32 %v12051_v39, %v2702_v46  ;;  %vm921_vm11 = vcmp.lt.s32.totalorder %v8761_v60, 0  ;;  %v7564_v8 = vadd.s32 4294967294, %v2651_v25 }
 0x1ea   : > { %v1086_v62 = vshll.u32 %v9165_v55, 30  ;;  %v2714_v13 = vshrl.u32 %v12038_v48, %v2702_v46  ;;  %v2716_v42 = vshll.u32 %v12038_v48, %v2701_v40  ;;  %v1131_v0 = vshrl.u32 %v1130_v22, 23  ;;  %v9178_v44 = vpop.eup %7911 }
 0x1eb   : > { %v2703_v18 = vshrl.u32 %v12056_v34, %v2702_v46  ;;  %v2706_v31 = vor.u32 %v2705_v21, %v2704_v12  ;;  %v2709_v58 = vor.u32 %v2708_v49, %v2707_v41  ;;  %v2712_v45 = vor.u32 %v2711_v52, %v2710_v33 }
 0x1ec   : > { %v9180_v47 = vsub.s32 %v1083_v23, %v1086_v62  ;;  %v2715_v11 = vor.u32 %v2714_v13, %v2713_v10  ;;  %v2717_v5 = vshrl.u32 %v12039_v63, %v2702_v46  ;;  %vm2719_vm6 = vcmp.lt.s32.totalorder %v2700_v15, 1 }
 0x1ed   : > { %v9184_v27 = vpop.eup %7913  ;;  %vm2721_vm14 = vcmp.lt.s32.totalorder %v2700_v15, 3  ;;  %vm2722_vm9 = vcmp.lt.s32.totalorder %v2700_v15, 4  ;;  %v2735_v40 = vshll.u32 %v2695_v16, 8  ;;  %vm7565_vm12 = vcmp.lt.s32.totalorder %v7564_v8, 0 }
 0x1ee   : > { %12118 = vst [vmem:[#allocation48_spill] sm:$0xff] %v9184_v27  ;;  %v1089_v25 = vsub.s32 0, %v9180_v47  ;;  %v2718_v22 = vor.u32 %v2717_v5, %v2716_v42  ;;  %vm2720_vm7 = vcmp.lt.s32.totalorder %v2700_v15, 2  ;;  %v2724_v23 = vsel %vm2722_vm9, %v2712_v45, 2102212464 }
 0x1ef   : > { %v9188_v62 = vpop.eup %7915  ;;  %v2727_v41 = vsel %vm2719_vm6, %v2706_v31, %v2709_v58  ;;  %v2728_v46 = vsel %vm2722_vm9, %v2715_v11, 920167782  ;;  %v7506_v21 = vadd.s32 4294967169, %v1131_v0  ;;  %v2723_v10 = vsel %vm2719_vm6, %v2703_v18, %v2706_v31 }
 0x1f0   : > { %12119 = vst [vmem:[#allocation49_spill] sm:$0xff] %v9188_v62  ;;  %v7503_v12 = vmin.u32 %v1089_v25, %v9180_v47  ;;  %v9193_v33 = vpop.eup %7917  ;;  %v2725_v16 = vsel %vm2721_vm14, %v2709_v58, %v2724_v23  ;;  %v2729_v5 = vsel %vm2721_vm14, %v2712_v45, %v2728_v46  ;;  %v2731_v49 = vsel %vm2719_vm6, %v2709_v58, %v2712_v45  ;;  %v9210_v23 = vpop.f32.mrf.mxu1 }
 0x1f1   : > { %12120 = vst [vmem:[#allocation50_spill] sm:$0xff] %v9193_v33  ;;  %v9199_v52 = vpop.eup %7919  ;;  %v2654_v13 = vsel %vm7565_vm12, 0, %v7564_v8  ;;  %v2730_v42 = vsel %vm2720_vm7, %v2727_v41, %v2729_v5  ;;  %v2732_v25 = vsel %vm2722_vm9, %v2718_v22, 1326507024  ;;  %v12122_v37 = vand.u32 2147483647, %v9146_v61 }
 0x1f2   : > { %12121 = vst [vmem:[#allocation51_spill] sm:$0xff] %v9199_v52  ;;  %v1091_v17 = vclz %v7503_v12  ;;  %v2733_v33 = vsel %vm2721_vm14, %v2715_v11, %v2732_v25  ;;  %v9206_v31 = vmul.u32.u64.low %v2735_v40, %v2730_v42  ;;  %v9207_v18 = vmul.u32.u64.high %v2735_v40, %v2730_v42, %v9206_v31  ;;  %12123 = vst [vmem:[#allocation52_spill] sm:$0xff] %v9210_v23 }
 0x1f3   : > { %v1134_v0 = vand.u32 8388607, %v12122_v37  ;;  %v1003_v45 = vxor.u32 2147483648, %v9163_v24  ;;  %v12124_v8 = vsub.s32 4, %v8962_v57  ;;  %v2726_v37 = vsel %vm2720_vm7, %v2723_v10, %v2725_v16 }
 0x1f4   : > { %v2734_v22 = vsel %vm2720_vm7, %v2731_v49, %v2733_v33  ;;  %7921 = vcosq.f32 %v9157_v54  ;;  %v1137_v41 = vadd.s32 1, %v7506_v21  ;;  %v2655_v46 = vsub.s32 32, %v2654_v13 }
 0x1f5   : > { %v9218_v58 = vsel %vm921_vm11, %v12124_v8, %v8962_v57  ;;  %v9223_v11 = vmul.u32.u64.low %v2735_v40, %v2734_v22  ;;  %v9224_v12 = vmul.u32.u64.high %v2735_v40, %v2734_v22, %v9223_v11  ;;  %v2659_v5 = vsub.s32 4294967266, %v2654_v13 }
 0x1f6   : > { %12125 = vst [vmem:[#allocation53_spill] sm:$0xff] %v9218_v58  ;;  %v1135_v42 = vor.u32 8388608, %v1134_v0  ;;  %v2794_v25 = vand.u32 2139095040, %v9210_v23  ;;  %v7504_v52 = vadd.s32 4294967294, %v1091_v17  ;;  %v2742_v50 = vmul.u32 %v2735_v40, %v2726_v37 }
 0x1f7   : > { %v2745_v57 = vadd.s32 1, %v9207_v18  ;;  %vm1138_vm6 = vcmp.gt.s32.totalorder %v1137_v41, 0  ;;  %v9231_v15 = vsel %vm921_vm11, %v1003_v45, %v9163_v24  ;;  %v2639_v33 = vadd.s32 %v8996_v59, %v9010_v32 }
 0x1f8   : > { %v1139_v10 = vsel %vm1138_vm6, %v1137_v41, 0  ;;  %v2656_v16 = vshll.u32 %v9093_v20, %v2654_v13  ;;  %v1079_v17 = vadd.s32 %v9097_v2, %v9120_v28  ;;  %vm2744_vm7 = vc.u32 %v9224_v12, %v9206_v31 }
 0x1f9   : > { %v1141_v40 = vand.u32 31, %v1139_v10  ;;  %v2657_v49 = vshrl.u32 %v2639_v33, %v2655_v46  ;;  %v2660_v0 = vadd.s32 127, %v2659_v5  ;;  %v2746_v24 = vsel %vm2744_vm7, %v2745_v57, %v9207_v18 }
 0x1fa   : > { %v9242_v45 = vshll.u32 %v1135_v42, 8  ;;  %vm7505_vm11 = vcmp.lt.s32.totalorder %v7504_v52, 0  ;;  %v2747_v59 = vadd.s32 %v2746_v24, %v2742_v50  ;;  %v2795_v8 = vshrl.u32 %v2794_v25, 23 }
 0x1fb   : > { %v1142_v32 = vsub.s32 32, %v1141_v40  ;;  %v1140_v37 = vshrl.u32 %v1139_v10, 5  ;;  %v1144_v20 = vshll.u32 %v12056_v34, %v1141_v40  ;;  %v1147_v13 = vshll.u32 %v12050_v36, %v1141_v40 }
 0x1fc   : > { %v1153_v2 = vshll.u32 %v12051_v39, %v1141_v40  ;;  %v2748_v28 = vadd.s32 536870912, %v2747_v59  ;;  %v1150_v18 = vshll.u32 %v12043_v7, %v1141_v40  ;;  %v9250_v41 = vor.u32 %v2657_v49, %v2656_v16 }
 0x1fd   : > { %v1145_v22 = vshrl.u32 %v12050_v36, %v1142_v32  ;;  %v1148_v11 = vshrl.u32 %v12043_v7, %v1142_v32  ;;  %v2661_v46 = vshll.u32 %v2660_v0, 23  ;;  %v1151_v50 = vshrl.u32 %v12051_v39, %v1142_v32 }
 0x1fe   : > { %v1154_v5 = vshrl.u32 %v12038_v48, %v1142_v32  ;;  %v1094_v42 = vsel %vm7505_vm11, 0, %v7504_v52  ;;  %v9255_v25 = vshrl.u32 %v2748_v28, 30  ;;  %v1143_v57 = vshrl.u32 %v12056_v34, %v1142_v32 }
 0x1ff   : > { %v1156_v33 = vshll.u32 %v12038_v48, %v1141_v40  ;;  %v1146_v10 = vor.u32 %v1145_v22, %v1144_v20  ;;  %v1149_v24 = vor.u32 %v1148_v11, %v1147_v13  ;;  %v1157_v58 = vshrl.u32 %v12039_v63, %v1142_v32 }
 0x200   : > { %v1155_v21 = vor.u32 %v1154_v5, %v1153_v2  ;;  %v2750_v16 = vshll.u32 %v9255_v25, 30  ;;  %v1152_v49 = vor.u32 %v1151_v50, %v1150_v18  ;;  %vm1159_vm14 = vcmp.lt.s32.totalorder %v1140_v37, 1 }
 0x201   : > { %v7570_v0 = vadd.s32 4294967169, %v2795_v8  ;;  %v9261_v1 = vpop.eup %7921  ;;  %v1099_v27 = vsub.s32 4294967266, %v1094_v42  ;;  %v1158_v52 = vor.u32 %v1157_v58, %v1156_v33  ;;  %vm1161_vm9 = vcmp.lt.s32.totalorder %v1140_v37, 3 }
 0x202   : > { %12126 = vst [vmem:[#allocation54_spill] sm:$0xff] %v9261_v1  ;;  %vm1162_vm12 = vcmp.lt.s32.totalorder %v1140_v37, 4  ;;  %v1095_v28 = vsub.s32 32, %v1094_v42  ;;  %v9263_v62 = vsub.s32 %v2747_v59, %v2750_v16  ;;  %vm1160_vm6 = vcmp.lt.s32.totalorder %v1140_v37, 2 }
 0x203   : > { %v1164_v40 = vsel %vm1162_vm12, %v1152_v49, 2102212464  ;;  %v12127_v20 = vand.u32 2147483647, %v8761_v60  ;;  %v12128_v32 = vmov 0  ;;  %v1163_v8 = vsel %vm1159_vm14, %v1143_v57, %v1146_v10 }
 0x204   : > { %v2662_v13 = vor.u32 4788187, %v2661_v46  ;;  %v1167_v2 = vsel %vm1159_vm14, %v1146_v10, %v1149_v24  ;;  %v1168_v58 = vsel %vm1162_vm12, %v1155_v21, 920167782  ;;  %v2753_v22 = vsub.s32 0, %v9263_v62 }
 0x205   : > { %vm9268_vm7 = vcmp.le.f32.partialorder %v12127_v20, 0.7853982  ;;  %v1165_v59 = vsel %vm1161_vm9, %v1149_v24, %v1164_v40  ;;  %v1169_v11 = vsel %vm1161_vm9, %v1152_v49, %v1168_v58  ;;  %v1171_v18 = vsel %vm1159_vm14, %v1149_v24, %v1152_v49 }
 0x206   : > { %v12129_v32 = vsel %vm9268_vm7, 4294967295, %v12128_v32  ;;  %v1096_v50 = vshll.u32 %v9180_v47, %v1094_v42  ;;  %v1100_v5 = vadd.s32 127, %v1099_v27  ;;  %v1170_v33 = vsel %vm1160_vm6, %v1167_v2, %v1169_v11 }
 0x207   : > { %12130 = vst [vmem:[#allocation55_spill] sm:$0xff] %v12129_v32  ;;  %v1172_v46 = vsel %vm1162_vm12, %v1158_v52, 1326507024  ;;  %v1097_v57 = vshrl.u32 %v1079_v17, %v1095_v28  ;;  %v7567_v10 = vmin.u32 %v2753_v22, %v9263_v62  ;;  %v2801_v20 = vadd.s32 1, %v7570_v0 }
 0x208   : > { %v1173_v16 = vsel %vm1161_vm9, %v1155_v21, %v1172_v46  ;;  %v1166_v1 = vsel %vm1160_vm6, %v1163_v8, %v1165_v59  ;;  %v9287_v58 = vmul.u32.u64.low %v9242_v45, %v1170_v33  ;;  %v9288_v24 = vmul.u32.u64.high %v9242_v45, %v1170_v33, %v9287_v58 }
 0x209   : > { %v1174_v40 = vsel %vm1160_vm6, %v1171_v18, %v1173_v16  ;;  %v2663_v27 = vand.u32 2147483647, %v2662_v13  ;;  %v2755_v47 = vclz %v7567_v10  ;;  %v2665_v17 = vcvt.s32.f32 %v9250_v41 }
 0x20a   : > { %v9292_v42 = vmul.u32.u64.low %v9242_v45, %v1174_v40  ;;  %v9293_v49 = vmul.u32.u64.high %v9242_v45, %v1174_v40, %v9292_v42  ;;  %v1101_v52 = vshll.u32 %v1100_v5, 23  ;;  %v12131_v21 = vand.u32 2147483647, %v9210_v23 }
 0x20b   : > { %vm2802_vm11 = vcmp.gt.s32.totalorder %v2801_v20, 0  ;;  %v9298_v37 = vor.u32 %v1097_v57, %v1096_v50  ;;  %v7568_v28 = vadd.s32 4294967294, %v2755_v47  ;;  %v1182_v8 = vmul.u32 %v9242_v45, %v1166_v1  ;;  %v9317_v50 = vpop.f32.mrf.mxu0 }
 0x20c   : > { %v2798_v0 = vand.u32 8388607, %v12131_v21  ;;  %v2803_v2 = vsel %vm2802_vm11, %v2801_v20, 0  ;;  %7923 = vsinq.f32 %v9157_v54  ;;  %v1185_v22 = vadd.s32 1, %v9288_v24  ;;  %12132 = vst [vmem:[#allocation56_spill] sm:$0xff] %v9317_v50 }
 0x20d   : > { %v2805_v59 = vand.u32 31, %v2803_v2  ;;  %v9308_v41 = vsel %vm9268_vm7, %v8761_v60, %v9231_v15  ;;  %v9310_v11 = vmul.f32 %v2665_v17, %v2663_v27  ;;  %vm7569_vm14 = vcmp.lt.s32.totalorder %v7568_v28, 0 }
 0x20e   : > { %vm1184_vm9 = vc.u32 %v9293_v49, %v9287_v58  ;;  %v9314_v1 = vor.u32 4788187, %v1101_v52  ;;  %v2799_v45 = vor.u32 8388608, %v2798_v0  ;;  %v2743_v15 = vadd.s32 %v9206_v31, %v9224_v12 }
 0x20f   : > { %v1186_v54 = vsel %vm1184_vm9, %v1185_v22, %v9288_v24  ;;  %v2806_v18 = vsub.s32 32, %v2805_v59  ;;  %v9322_v33 = vsel %vm7569_vm14, 0, %v7568_v28  ;;  %v2808_v57 = vshll.u32 %v12056_v34, %v2805_v59 }
 0x210   : > { %v1187_v46 = vadd.s32 %v1186_v54, %v1182_v8  ;;  %v2811_v16 = vshll.u32 %v12050_v36, %v2805_v59  ;;  %v2804_v24 = vshrl.u32 %v2803_v2, 5  ;;  %v2814_v27 = vshll.u32 %v12043_v7, %v2805_v59 }
 0x211   : > { %v2809_v10 = vshrl.u32 %v12050_v36, %v2806_v18  ;;  %v2812_v20 = vshrl.u32 %v12043_v7, %v2806_v18  ;;  %v1234_v47 = vand.u32 2139095040, %v9317_v50  ;;  %v1103_v42 = vand.u32 2147483647, %v9314_v1 }
 0x212   : > { %v1188_v40 = vadd.s32 536870912, %v1187_v46  ;;  %v2815_v31 = vshrl.u32 %v12051_v39, %v2806_v18  ;;  %v2817_v12 = vshll.u32 %v12051_v39, %v2805_v59  ;;  %v9333_v17 = vshll.u32 %v2799_v45, 8 }
 0x213   : > { %v2763_v52 = vsub.s32 4294967266, %v9322_v33  ;;  %v2807_v0 = vshrl.u32 %v12056_v34, %v2806_v18  ;;  %v2818_v28 = vshrl.u32 %v12038_v48, %v2806_v18  ;;  %v2810_v8 = vor.u32 %v2809_v10, %v2808_v57 }
 0x214   : > { %v9336_v21 = vshrl.u32 %v1188_v40, 30  ;;  %v2813_v2 = vor.u32 %v2812_v20, %v2811_v16  ;;  %v2820_v22 = vshll.u32 %v12038_v48, %v2805_v59  ;;  %v2821_v1 = vshrl.u32 %v12039_v63, %v2806_v18 }
 0x215   : > { %v2816_v13 = vor.u32 %v2815_v31, %v2814_v27  ;;  %vm2823_vm12 = vcmp.lt.s32.totalorder %v2804_v24, 1  ;;  %v1235_v45 = vshrl.u32 %v1234_v47, 23  ;;  %v2759_v5 = vsub.s32 32, %v9322_v33 }
 0x216   : > { %v1190_v54 = vshll.u32 %v9336_v21, 30  ;;  %v2819_v60 = vor.u32 %v2818_v28, %v2817_v12  ;;  %v2822_v40 = vor.u32 %v2821_v1, %v2820_v22  ;;  %vm2825_vm6 = vcmp.lt.s32.totalorder %v2804_v24, 3 }
 0x217   : > { %vm2585_vm11 = vcmp.lt.s32.totalorder %v8859_v51, 0  ;;  %v2764_v32 = vadd.s32 127, %v2763_v52  ;;  %vm2824_vm14 = vcmp.lt.s32.totalorder %v2804_v24, 2  ;;  %vm2826_vm9 = vcmp.lt.s32.totalorder %v2804_v24, 4 }
 0x218   : > { %v9345_v29 = vsub.s32 %v1187_v46, %v1190_v54  ;;  %v2827_v59 = vsel %vm2823_vm12, %v2807_v0, %v2810_v8  ;;  %v2828_v18 = vsel %vm2826_vm9, %v2816_v13, 2102212464  ;;  %v2831_v57 = vsel %vm2823_vm12, %v2810_v8, %v2813_v2 }
 0x219   : > { %v2832_v10 = vsel %vm2826_vm9, %v2819_v60, 920167782  ;;  %v9349_v16 = vpop.eup %7923  ;;  %v2760_v20 = vshll.u32 %v9263_v62, %v9322_v33  ;;  %v2829_v47 = vsel %vm2825_vm6, %v2813_v2, %v2828_v18  ;;  %v2761_v31 = vshrl.u32 %v2743_v15, %v2759_v5 }
 0x21a   : > { %12133 = vst [vmem:[#allocation57_spill] sm:$0xff] %v9349_v16  ;;  %v1193_v27 = vsub.s32 0, %v9345_v29  ;;  %v2833_v46 = vsel %vm2825_vm6, %v2816_v13, %v2832_v10  ;;  %v2835_v52 = vsel %vm2823_vm12, %v2813_v2, %v2816_v13  ;;  %v2836_v0 = vsel %vm2826_vm9, %v2822_v40, 1326507024 }
 0x21b   : > { %v2834_v12 = vsel %vm2824_vm14, %v2831_v57, %v2833_v46  ;;  %v2765_v28 = vshll.u32 %v2764_v32, 23  ;;  %v2830_v22 = vsel %vm2824_vm14, %v2827_v59, %v2829_v47  ;;  %v2837_v1 = vsel %vm2825_vm6, %v2819_v60, %v2836_v0 }
 0x21c   : > { %v7507_v8 = vmin.u32 %v1193_v27, %v9345_v29  ;;  %v2838_v62 = vsel %vm2824_vm14, %v2835_v52, %v2837_v1  ;;  %v9363_v33 = vmul.u32.u64.low %v9333_v17, %v2834_v12  ;;  %v9364_v54 = vmul.u32.u64.high %v9333_v17, %v2834_v12, %v9363_v33 }
 0x21d   : > { %v7510_v5 = vadd.s32 4294967169, %v1235_v45  ;;  %v9368_v18 = vmul.u32.u64.low %v9333_v17, %v2838_v62  ;;  %v9369_v13 = vmul.u32.u64.high %v9333_v17, %v2838_v62, %v9368_v18  ;;  %v11900_v32 = vand.u32 2147483647, %v9317_v50 }
 0x21e   : > { %v1195_v15 = vclz %v7507_v8  ;;  %7925 = vcosq.f32 %v9308_v41  ;;  %v2667_v2 = vxor.u32 2147483648, %v9310_v11  ;;  %vm11901_vm12 = vcmp.lt.s32.totalorder %v8946_v38, 0 }
 0x21f   : > { %v12134_v60 = vcvt.s32.f32 %v9298_v37  ;;  %v1241_v40 = vadd.s32 1, %v7510_v5  ;;  %v2762_v59 = vor.u32 %v2761_v31, %v2760_v20  ;;  %v2766_v57 = vor.u32 4788187, %v2765_v28 }
 0x220   : > { %v7508_v45 = vadd.s32 4294967294, %v1195_v15  ;;  %v2846_v10 = vmul.u32 %v9333_v17, %v2830_v22  ;;  %7927 = vsinq.f32 %v9308_v41  ;;  %v12135_v27 = vsub.s32 4, %v9050_v3 }
 0x221   : > { %v1106_v24 = vmul.f32 %v12134_v60, %v1103_v42  ;;  %v2849_v46 = vadd.s32 1, %v9364_v54  ;;  %vm1242_vm6 = vcmp.gt.s32.totalorder %v1241_v40, 0  ;;  %vm2848_vm9 = vc.u32 %v9369_v13, %v9363_v33 }
 0x222   : > { %v9384_v47 = vsel %vm2585_vm11, %v12135_v27, %v9050_v3  ;;  %vm7509_vm14 = vcmp.lt.s32.totalorder %v7508_v45, 0  ;;  %v1238_v37 = vand.u32 8388607, %v11900_v32  ;;  %v1243_v42 = vsel %vm1242_vm6, %v1241_v40, 0  ;;  %v9407_v40 = vpop.f32.mrf.mxu1 }
 0x223   : > { %12136 = vst [vmem:[#allocation58_spill] sm:$0xff] %v9384_v47  ;;  %v9394_v41 = vsel %vm2585_vm11, %v2667_v2, %v9310_v11  ;;  %v2850_v3 = vsel %vm2848_vm9, %v2849_v46, %v9364_v54  ;;  %v1245_v20 = vand.u32 31, %v1243_v42  ;;  %v1107_v31 = vxor.u32 2147483648, %v1106_v24  ;;  %12137 = vst [vmem:[#allocation59_spill] sm:$0xff] %v9407_v40 }
 0x224   : > { %v2767_v12 = vand.u32 2147483647, %v2766_v57  ;;  %v2769_v52 = vcvt.s32.f32 %v2762_v59  ;;  %v2851_v0 = vadd.s32 %v2850_v3, %v2846_v10  ;;  %v9398_v28 = vsel %vm7509_vm14, 0, %v7508_v45 }
 0x225   : > { %v1246_v8 = vsub.s32 32, %v1245_v20  ;;  %v1248_v22 = vshll.u32 %v12056_v34, %v1245_v20  ;;  %v1251_v1 = vshll.u32 %v12050_v36, %v1245_v20  ;;  %v1239_v5 = vor.u32 8388608, %v1238_v37 }
 0x226   : > { %v2852_v62 = vadd.s32 536870912, %v2851_v0  ;;  %v1244_v11 = vshrl.u32 %v1243_v42, 5  ;;  %v1254_v15 = vshll.u32 %v12043_v7, %v1245_v20  ;;  %v1257_v60 = vshll.u32 %v12051_v39, %v1245_v20 }
 0x227   : > { %v1249_v18 = vshrl.u32 %v12050_v36, %v1246_v8  ;;  %v1252_v54 = vshrl.u32 %v12043_v7, %v1246_v8  ;;  %v1255_v2 = vshrl.u32 %v12051_v39, %v1246_v8  ;;  %v1108_v59 = vsel %vm11901_vm12, %v1107_v31, %v1106_v24 }
 0x228   : > { %v1203_v57 = vsub.s32 4294967266, %v9398_v28  ;;  %v9412_v45 = vshrl.u32 %v2852_v62, 30  ;;  %v1258_v10 = vshrl.u32 %v12038_v48, %v1246_v8  ;;  %v2770_v27 = vmul.f32 %v2769_v52, %v2767_v12 }
 0x229   : > { %v1250_v46 = vor.u32 %v1249_v18, %v1248_v22  ;;  %v1253_v37 = vor.u32 %v1252_v54, %v1251_v1  ;;  %v1260_v42 = vshll.u32 %v12038_v48, %v1245_v20  ;;  %v12138_v3 = vand.u32 2147483647, %v8859_v51 }
 0x22a   : > { %v12139_v32 = vmov 0  ;;  %v2854_v17 = vshll.u32 %v9412_v45, 30  ;;  %v1247_v24 = vshrl.u32 %v12056_v34, %v1246_v8  ;;  %v9424_v31 = vshll.u32 %v1239_v5, 8 }
 0x22b   : > { %vm9418_vm11 = vcmp.le.f32.partialorder %v12138_v3, 0.7853982  ;;  %v2898_v62 = vand.u32 2139095040, %v9407_v40  ;;  %v12141_v12 = vand.u32 2147483647, %v8946_v38  ;;  %v12142_v52 = vmov 0  ;;  %v9434_v18 = vpop.eup %7925 }
 0x22c   : > { %v12140_v32 = vsel %vm9418_vm11, 4294967295, %v12139_v32  ;;  %v1256_v20 = vor.u32 %v1255_v2, %v1254_v15  ;;  %v1259_v22 = vor.u32 %v1258_v10, %v1257_v60  ;;  %v1261_v1 = vshrl.u32 %v12039_v63, %v1246_v8  ;;  %12145 = vst [vmem:[#allocation61_spill] sm:$0xff] %v9434_v18 }
 0x22d   : > { %vm9429_vm6 = vcmp.le.f32.partialorder %v12141_v12, 0.7853982  ;;  %vm1263_vm14 = vcmp.lt.s32.totalorder %v1244_v11, 1  ;;  %v1199_v5 = vsub.s32 32, %v9398_v28  ;;  %v1204_v54 = vadd.s32 127, %v1203_v57  ;;  %v9441_v15 = vpop.eup %7927 }
 0x22e   : > { %v12143_v52 = vsel %vm9429_vm6, 4294967295, %v12142_v52  ;;  %v9438_v3 = vsub.s32 %v2851_v0, %v2854_v17  ;;  %vm1265_vm12 = vcmp.lt.s32.totalorder %v1244_v11, 3  ;;  %v1262_v47 = vor.u32 %v1261_v1, %v1260_v42  ;;  %12146 = vst [vmem:[#allocation62_spill] sm:$0xff] %v9441_v15 }
 0x22f   : > { %12144 = vst [vmem:[#allocation60_spill] sm:$0xff] %v12143_v52  ;;  %vm1264_vm8 = vcmp.lt.s32.totalorder %v1244_v11, 2  ;;  %vm1266_vm7 = vcmp.lt.s32.totalorder %v1244_v11, 4  ;;  %v1271_v12 = vsel %vm1263_vm14, %v1250_v46, %v1253_v37  ;;  %v1267_v2 = vsel %vm1263_vm14, %v1247_v24, %v1250_v46 }
 0x230   : > { %v2857_v8 = vsub.s32 0, %v9438_v3  ;;  %v1268_v60 = vsel %vm1266_vm7, %v1256_v20, 2102212464  ;;  %v1272_v10 = vsel %vm1266_vm7, %v1259_v22, 920167782  ;;  %v12148_v57 = vmov 0 }
 0x231   : > { %v12147_v16 = vand.u32 2147483647, %v9066_v14  ;;  %v1269_v17 = vsel %vm1265_vm12, %v1253_v37, %v1268_v60  ;;  %v1273_v0 = vsel %vm1265_vm12, %v1256_v20, %v1272_v10  ;;  %v1275_v42 = vsel %vm1263_vm14, %v1253_v37, %v1256_v20 }
 0x232   : > { %v1276_v1 = vsel %vm1266_vm7, %v1262_v47, 1326507024  ;;  %v1183_v18 = vadd.s32 %v9287_v58, %v9293_v49  ;;  %v1205_v15 = vshll.u32 %v1204_v54, 23  ;;  %v7571_v46 = vmin.u32 %v2857_v8, %v9438_v3 }
 0x233   : > { %vm9447_vm9 = vcmp.le.f32.partialorder %v12147_v16, 0.7853982  ;;  %v1274_v24 = vsel %vm1264_vm8, %v1271_v12, %v1273_v0  ;;  %v2771_v53 = vxor.u32 2147483648, %v2770_v27  ;;  %v1277_v16 = vsel %vm1265_vm12, %v1259_v22, %v1276_v1 }
 0x234   : > { %v12149_v57 = vsel %vm9447_vm9, 4294967295, %v12148_v57  ;;  %v9460_v9 = vmul.u32.u64.low %v9424_v31, %v1274_v24  ;;  %v9461_v26 = vmul.u32.u64.high %v9424_v31, %v1274_v24, %v9460_v9  ;;  %v1201_v60 = vshrl.u32 %v1183_v18, %v1199_v5 }
 0x235   : > { %12150 = vst [vmem:[#allocation63_spill] sm:$0xff] %v12149_v57  ;;  %v1270_v37 = vsel %vm1264_vm8, %v1267_v2, %v1269_v17  ;;  %v1278_v47 = vsel %vm1264_vm8, %v1275_v42, %v1277_v16  ;;  %v2899_v20 = vshrl.u32 %v2898_v62, 23  ;;  %v2671_v58 = vsel %vm9418_vm11, %v8859_v51, %v9394_v41  ;;  %v9502_v42 = vpop.f32.mrf.mxu0 }
 0x236   : > { %v2859_v49 = vclz %v7571_v46  ;;  %v9471_v54 = vmul.u32.u64.low %v9424_v31, %v1278_v47  ;;  %v9472_v22 = vmul.u32.u64.high %v9424_v31, %v1278_v47, %v9471_v54  ;;  %v1111_v12 = vsel %vm9429_vm6, %v8946_v38, %v1108_v59  ;;  %12155 = vst [vmem:[#allocation65_spill] sm:$0xff] %v9502_v42 }
 0x237   : > { %v1200_v18 = vshll.u32 %v9345_v29, %v9398_v28  ;;  %v1206_v11 = vor.u32 4788187, %v1205_v15  ;;  %v7574_v5 = vadd.s32 4294967169, %v2899_v20  ;;  %vm12151_vm8 = vcmp.lt.s32.totalorder %v9066_v14, 0 }
 0x238   : > { %v2772_v62 = vsel %vm12151_vm8, %v2771_v53, %v2770_v27  ;;  %v1286_v8 = vmul.u32 %v9424_v31, %v1270_v37  ;;  %v1289_v41 = vadd.s32 1, %v9461_v26  ;;  %v11911_v2 = vand.u32 2147483647, %v9407_v40 }
 0x239   : > { %7929 = vcosq.f32 %v2671_v58  ;;  %v12152_v10 = vsub.s32 4, %v9165_v55  ;;  %vm12153_vm7 = vcmp.lt.s32.totalorder %v8946_v38, 0  ;;  %v1202_v29 = vor.u32 %v1201_v60, %v1200_v18 }
 0x23a   : > { %v2905_v28 = vadd.s32 1, %v7574_v5  ;;  %7931 = vsinq.f32 %v2671_v58  ;;  %v7572_v53 = vadd.s32 4294967294, %v2859_v49  ;;  %vm1288_vm12 = vc.u32 %v9472_v22, %v9460_v9 }
 0x23b   : > { %v9489_v59 = vsel %vm12153_vm7, %v12152_v10, %v9165_v55  ;;  %7933 = vcosq.f32 %v1111_v12  ;;  %v9497_v27 = vsel %vm9447_vm9, %v9066_v14, %v2772_v62  ;;  %v1207_v31 = vand.u32 2147483647, %v1206_v11 }
 0x23c   : > { %12154 = vst [vmem:[#allocation64_spill] sm:$0xff] %v9489_v59  ;;  %v1290_v17 = vsel %vm1288_vm12, %v1289_v41, %v9461_v26  ;;  %7935 = vsinq.f32 %v1111_v12  ;;  %v2902_v0 = vand.u32 8388607, %v11911_v2  ;;  %vm2906_vm14 = vcmp.gt.s32.totalorder %v2905_v28, 0 }
 0x23d   : > { %v1291_v55 = vadd.s32 %v1290_v17, %v1286_v8  ;;  %v1209_v1 = vcvt.s32.f32 %v1202_v29  ;;  %v2907_v24 = vsel %vm2906_vm14, %v2905_v28, 0  ;;  %v11910_v16 = vand.u32 2147483647, %v9502_v42 }
 0x23e   : > { %7937 = vcosq.f32 %v9497_v27  ;;  %vm7573_vm8 = vcmp.lt.s32.totalorder %v7572_v53, 0  ;;  %v2909_v37 = vand.u32 31, %v2907_v24  ;;  %v2847_v47 = vadd.s32 %v9363_v33, %v9369_v13 }
 0x23f   : > { %v1292_v60 = vadd.s32 536870912, %v1291_v55  ;;  %v9507_v26 = vmul.f32 %v1209_v1, %v1207_v31  ;;  %v1338_v58 = vand.u32 2139095040, %v9502_v42  ;;  %v2903_v54 = vor.u32 8388608, %v2902_v0 }
 0x240   : > { %v2910_v12 = vsub.s32 32, %v2909_v37  ;;  %v2912_v18 = vshll.u32 %v12056_v34, %v2909_v37  ;;  %v9516_v11 = vsel %vm7573_vm8, 0, %v7572_v53  ;;  %v2915_v5 = vshll.u32 %v12050_v36, %v2909_v37 }
 0x241   : > { %v9513_v49 = vshrl.u32 %v1292_v60, 30  ;;  %v2921_v62 = vshll.u32 %v12051_v39, %v2909_v37  ;;  %v9522_v8 = vand.u32 8388607, %v11910_v16  ;;  %v2908_v13 = vshrl.u32 %v2907_v24, 5 }
 0x242   : > { %v2913_v41 = vshrl.u32 %v12050_v36, %v2910_v12  ;;  %v2918_v10 = vshll.u32 %v12043_v7, %v2909_v37  ;;  %v2916_v29 = vshrl.u32 %v12043_v7, %v2910_v12  ;;  %v2919_v28 = vshrl.u32 %v12051_v39, %v2910_v12 }
 0x243   : > { %v1294_v33 = vshll.u32 %v9513_v49, 30  ;;  %v2922_v53 = vshrl.u32 %v12038_v48, %v2910_v12  ;;  %v1339_v31 = vshrl.u32 %v1338_v58, 23  ;;  %v2863_v17 = vsub.s32 32, %v9516_v11 }
 0x244   : > { %v2914_v1 = vor.u32 %v2913_v41, %v2912_v18  ;;  %v2924_v24 = vshll.u32 %v12038_v48, %v2909_v37  ;;  %v2867_v60 = vsub.s32 4294967266, %v9516_v11  ;;  %v2911_v16 = vshrl.u32 %v12056_v34, %v2910_v12 }
 0x245   : > { %v9532_v0 = vsub.s32 %v1291_v55, %v1294_v33  ;;  %v2917_v2 = vor.u32 %v2916_v29, %v2915_v5  ;;  %v2923_v20 = vor.u32 %v2922_v53, %v2921_v62  ;;  %v2920_v15 = vor.u32 %v2919_v28, %v2918_v10 }
 0x246   : > { %v9538_v46 = vpop.eup %7929  ;;  %v2925_v57 = vshrl.u32 %v12039_v63, %v2910_v12  ;;  %vm2927_vm14 = vcmp.lt.s32.totalorder %v2908_v13, 1  ;;  %vm2928_vm8 = vcmp.lt.s32.totalorder %v2908_v13, 2  ;;  %vm2929_vm7 = vcmp.lt.s32.totalorder %v2908_v13, 3 }
 0x247   : > { %v1297_v58 = vsub.s32 0, %v9532_v0  ;;  %v9542_v55 = vpop.eup %7931  ;;  %vm2930_vm9 = vcmp.lt.s32.totalorder %v2908_v13, 4  ;;  %v7514_v37 = vadd.s32 4294967169, %v1339_v31  ;;  %v2935_v41 = vsel %vm2927_vm14, %v2914_v1, %v2917_v2 }
 0x248   : > { %v9544_v18 = vpop.eup %7933  ;;  %v2926_v5 = vor.u32 %v2925_v57, %v2924_v24  ;;  %v2932_v62 = vsel %vm2930_vm9, %v2920_v15, 2102212464  ;;  %v2864_v12 = vshll.u32 %v9438_v3, %v9516_v11  ;;  %v2931_v10 = vsel %vm2927_vm14, %v2911_v16, %v2914_v1 }
 0x249   : > { %12156 = vst [vmem:[#allocation66_spill] sm:$0xff] %v9544_v18  ;;  %v7511_v33 = vmin.u32 %v1297_v58, %v9532_v0  ;;  %v9549_v29 = vpop.eup %7935  ;;  %v2936_v28 = vsel %vm2930_vm9, %v2923_v20, 920167782  ;;  %v2943_v53 = vshll.u32 %v2903_v54, 8  ;;  %v2933_v18 = vsel %vm2929_vm7, %v2917_v2, %v2932_v62 }
 0x24a   : > { %12157 = vst [vmem:[#allocation67_spill] sm:$0xff] %v9549_v29  ;;  %v2937_v58 = vsel %vm2929_vm7, %v2920_v15, %v2936_v28  ;;  %v2939_v57 = vsel %vm2927_vm14, %v2917_v2, %v2920_v15  ;;  %v2865_v38 = vshrl.u32 %v2847_v47, %v2863_v17  ;;  %v2940_v52 = vsel %vm2930_vm9, %v2926_v5, 1326507024  ;;  %v9598_v5 = vpop.f32.mrf.mxu1 }
 0x24b   : > { %v1299_v31 = vclz %v7511_v33  ;;  %v9558_v24 = vpop.eup %7937  ;;  %v2938_v29 = vsel %vm2928_vm8, %v2935_v41, %v2937_v58  ;;  %v1343_v3 = vor.u32 8388608, %v9522_v8  ;;  %v2868_v16 = vadd.s32 127, %v2867_v60  ;;  %12168 = vst [vmem:[#allocation72_spill] sm:$0xff] %v9598_v5 }
 0x24c   : > { %12158 = vst [vmem:[#allocation68_spill] sm:$0xff] %v9558_v24  ;;  %v2941_v54 = vsel %vm2929_vm7, %v2923_v20, %v2940_v52  ;;  %v1345_v1 = vadd.s32 1, %v7514_v37  ;;  %v2934_v33 = vsel %vm2928_vm8, %v2931_v10, %v2933_v18  ;;  %v12159_v8 = vsub.s32 4, %v9255_v25 }
 0x24d   : > { %v7512_v11 = vadd.s32 4294967294, %v1299_v31  ;;  %v2942_v62 = vsel %vm2928_vm8, %v2939_v57, %v2941_v54  ;;  %v9566_v28 = vmul.u32.u64.low %v2943_v53, %v2938_v29  ;;  %v9567_v2 = vmul.u32.u64.high %v2943_v53, %v2938_v29, %v9566_v28 }
 0x24e   : > { %v9570_v15 = vmul.u32.u64.low %v2943_v53, %v2942_v62  ;;  %v9571_v47 = vmul.u32.u64.high %v2943_v53, %v2942_v62, %v9570_v15  ;;  %vm1346_vm9 = vcmp.gt.s32.totalorder %v1345_v1, 0  ;;  %vm12160_vm12 = vcmp.lt.s32.totalorder %v9066_v14, 0 }
 0x24f   : > { %vm7513_vm14 = vcmp.lt.s32.totalorder %v7512_v11, 0  ;;  %v9578_v52 = vsel %vm12160_vm12, %v12159_v8, %v9255_v25  ;;  %7939 = vsinq.f32 %v9497_v27  ;;  %v12162_v20 = vsub.s32 4, %v9336_v21 }
 0x250   : > { %12161 = vst [vmem:[#allocation69_spill] sm:$0xff] %v9578_v52  ;;  %vm12163_vm7 = vcmp.lt.s32.totalorder %v9146_v61, 0  ;;  %v1347_v17 = vsel %vm1346_vm9, %v1345_v1, 0  ;;  %v12165_v37 = vsub.s32 4, %v9412_v45  ;;  %vm12166_vm8 = vcmp.lt.s32.totalorder %v9210_v23, 0 }
 0x251   : > { %v9586_v13 = vsel %vm12163_vm7, %v12162_v20, %v9336_v21  ;;  %v9596_v25 = vsel %vm7513_vm14, 0, %v7512_v11  ;;  %v2950_v27 = vmul.u32 %v2943_v53, %v2934_v33  ;;  %v1287_v41 = vadd.s32 %v9460_v9, %v9472_v22 }
 0x252   : > { %12164 = vst [vmem:[#allocation70_spill] sm:$0xff] %v9586_v13  ;;  %v9594_v18 = vsel %vm12166_vm8, %v12165_v37, %v9412_v45  ;;  %v2953_v21 = vadd.s32 1, %v9567_v2  ;;  %v1349_v29 = vand.u32 31, %v1347_v17  ;;  %v9604_v31 = vor.u32 %v2865_v38, %v2864_v12 }
 0x253   : > { %12167 = vst [vmem:[#allocation71_spill] sm:$0xff] %v9594_v18  ;;  %v2869_v58 = vshll.u32 %v2868_v16, 23  ;;  %vm2952_vm12 = vc.u32 %v9571_v47, %v9566_v28  ;;  %v9608_v45 = vshll.u32 %v1343_v3, 8  ;;  %v1307_v53 = vsub.s32 4294967266, %v9596_v25 }
 0x254   : > { %v2954_v57 = vsel %vm2952_vm12, %v2953_v21, %v9567_v2  ;;  %v1350_v11 = vsub.s32 32, %v1349_v29  ;;  %v1352_v9 = vshll.u32 %v12056_v34, %v1349_v29  ;;  %v1348_v54 = vshrl.u32 %v1347_v17, 5 }
 0x255   : > { %v2955_v22 = vadd.s32 %v2954_v57, %v2950_v27  ;;  %v1355_v1 = vshll.u32 %v12050_v36, %v1349_v29  ;;  %v3002_v38 = vand.u32 2139095040, %v9598_v5  ;;  %v1358_v3 = vshll.u32 %v12043_v7, %v1349_v29 }
 0x256   : > { %v1353_v12 = vshrl.u32 %v12050_v36, %v1350_v11  ;;  %v1356_v16 = vshrl.u32 %v12043_v7, %v1350_v11  ;;  %v1359_v33 = vshrl.u32 %v12051_v39, %v1350_v11  ;;  %v2870_v62 = vor.u32 4788187, %v2869_v58 }
 0x257   : > { %v2873_v2 = vcvt.s32.f32 %v9604_v31  ;;  %v2956_v15 = vadd.s32 536870912, %v2955_v22  ;;  %v1361_v8 = vshll.u32 %v12051_v39, %v1349_v29  ;;  %v1303_v20 = vsub.s32 32, %v9596_v25 }
 0x258   : > { %v1308_v17 = vadd.s32 127, %v1307_v53  ;;  %v1354_v37 = vor.u32 %v1353_v12, %v1352_v9  ;;  %v1362_v27 = vshrl.u32 %v12038_v48, %v1350_v11  ;;  %v1357_v57 = vor.u32 %v1356_v16, %v1355_v1 }
 0x259   : > { %v9623_v21 = vshrl.u32 %v2956_v15, 30  ;;  %v1364_v60 = vshll.u32 %v12038_v48, %v1349_v29  ;;  %v1365_v10 = vshrl.u32 %v12039_v63, %v1350_v11  ;;  %v1360_v18 = vor.u32 %v1359_v33, %v1358_v3 }
 0x25a   : > { %v1363_v58 = vor.u32 %v1362_v27, %v1361_v8  ;;  %vm1367_vm14 = vcmp.lt.s32.totalorder %v1348_v54, 1  ;;  %v3003_v31 = vshrl.u32 %v3002_v38, 23  ;;  %v1304_v24 = vshll.u32 %v9532_v0, %v9596_v25 }
 0x25b   : > { %v2958_v14 = vshll.u32 %v9623_v21, 30  ;;  %v1351_v53 = vshrl.u32 %v12056_v34, %v1350_v11  ;;  %v1366_v9 = vor.u32 %v1365_v10, %v1364_v60  ;;  %v1305_v12 = vshrl.u32 %v1287_v41, %v1303_v20 }
 0x25c   : > { %v1309_v15 = vshll.u32 %v1308_v17, 23  ;;  %vm1369_vm9 = vcmp.lt.s32.totalorder %v1348_v54, 3  ;;  %vm1370_vm7 = vcmp.lt.s32.totalorder %v1348_v54, 4  ;;  %v9631_v1 = vpop.eup %7939  ;;  %vm1368_vm8 = vcmp.lt.s32.totalorder %v1348_v54, 2 }
 0x25d   : > { %12169 = vst [vmem:[#allocation73_spill] sm:$0xff] %v9631_v1  ;;  %v9633_v29 = vsub.s32 %v2955_v22, %v2958_v14  ;;  %v1372_v16 = vsel %vm1370_vm7, %v1360_v18, 2102212464  ;;  %v1375_v38 = vsel %vm1367_vm14, %v1354_v37, %v1357_v57  ;;  %v1376_v3 = vsel %vm1370_vm7, %v1363_v58, 920167782 }
 0x25e   : > { %v1379_v0 = vsel %vm1367_vm14, %v1357_v57, %v1360_v18  ;;  %v1380_v25 = vsel %vm1370_vm7, %v1366_v9, 1326507024  ;;  %v7578_v33 = vadd.s32 4294967169, %v3003_v31  ;;  %v1371_v60 = vsel %vm1367_vm14, %v1351_v53, %v1354_v37 }
 0x25f   : > { %v2961_v11 = vsub.s32 0, %v9633_v29  ;;  %v1373_v41 = vsel %vm1369_vm9, %v1357_v57, %v1372_v16  ;;  %v1377_v10 = vsel %vm1369_vm9, %v1360_v18, %v1376_v3  ;;  %v2871_v8 = vand.u32 2147483647, %v2870_v62 }
 0x260   : > { %v1378_v14 = vsel %vm1368_vm8, %v1375_v38, %v1377_v10  ;;  %v1381_v22 = vsel %vm1369_vm9, %v1363_v58, %v1380_v25  ;;  %v12170_v20 = vand.u32 2147483647, %v9598_v5  ;;  %v9645_v27 = vor.u32 %v1305_v12, %v1304_v24  ;;  %v9661_v24 = vpop.f32.mrf.mxu0 }
 0x261   : > { %v7575_v31 = vmin.u32 %v2961_v11, %v9633_v29  ;;  %v1382_v9 = vsel %vm1368_vm8, %v1379_v0, %v1381_v22  ;;  %v3009_v1 = vadd.s32 1, %v7578_v33  ;;  %v9649_v37 = vor.u32 4788187, %v1309_v15  ;;  %12171 = vst [vmem:[#allocation74_spill] sm:$0xff] %v9661_v24 }
 0x262   : > { %v3006_v17 = vand.u32 8388607, %v12170_v20  ;;  %v1374_v57 = vsel %vm1368_vm8, %v1371_v60, %v1373_v41  ;;  %v9653_v18 = vmul.u32.u64.low %v9608_v45, %v1382_v9  ;;  %v9654_v62 = vmul.u32.u64.high %v9608_v45, %v1382_v9, %v9653_v18 }
 0x263   : > { %v2963_v53 = vclz %v7575_v31  ;;  %v9657_v58 = vmul.u32.u64.low %v9608_v45, %v1378_v14  ;;  %v9658_v16 = vmul.u32.u64.high %v9608_v45, %v1378_v14, %v9657_v58  ;;  %vm3010_vm12 = vcmp.gt.s32.totalorder %v3009_v1, 0 }
 0x264   : > { %v12172_v12 = vxor.u32 2147483648, %v9507_v26  ;;  %vm12173_vm14 = vcmp.lt.s32.totalorder %v9146_v61, 0  ;;  %v9670_v15 = vmul.f32 %v2873_v2, %v2871_v8  ;;  %v3007_v38 = vor.u32 8388608, %v3006_v17 }
 0x265   : > { %v3011_v3 = vsel %vm3010_vm12, %v3009_v1, 0  ;;  %v2951_v25 = vadd.s32 %v9566_v28, %v9571_v47  ;;  %v7576_v33 = vadd.s32 4294967294, %v2963_v53  ;;  %v1390_v41 = vmul.u32 %v9608_v45, %v1374_v57 }
 0x266   : > { %v9668_v54 = vsel %vm12173_vm14, %v12172_v12, %v9507_v26  ;;  %v3013_v11 = vand.u32 31, %v3011_v3  ;;  %vm1392_vm9 = vc.u32 %v9654_v62, %v9657_v58  ;;  %v1442_v26 = vand.u32 2139095040, %v9661_v24 }
 0x267   : > { %vm7577_vm7 = vcmp.lt.s32.totalorder %v7576_v33, 0  ;;  %v1393_v2 = vadd.s32 1, %v9658_v16  ;;  %v9681_v1 = vshrl.u32 %v3011_v3, 5  ;;  %v12174_v0 = vand.u32 2147483647, %v9146_v61 }
 0x268   : > { %v3014_v10 = vsub.s32 32, %v3013_v11  ;;  %v2966_v8 = vsel %vm7577_vm7, 0, %v7576_v33  ;;  %v3016_v28 = vshll.u32 %v12056_v34, %v3013_v11  ;;  %v3019_v47 = vshll.u32 %v12050_v36, %v3013_v11 }
 0x269   : > { %v3025_v14 = vshll.u32 %v12051_v39, %v3013_v11  ;;  %v2967_v22 = vsub.s32 32, %v2966_v8  ;;  %v2968_v45 = vshll.u32 %v9633_v29, %v2966_v8  ;;  %v2971_v20 = vsub.s32 4294967266, %v2966_v8 }
 0x26a   : > { %v1394_v17 = vsel %vm1392_vm9, %v1393_v2, %v9658_v16  ;;  %v3017_v9 = vshrl.u32 %v12050_v36, %v3014_v10  ;;  %v3020_v57 = vshrl.u32 %v12043_v7, %v3014_v10  ;;  %v3022_v18 = vshll.u32 %v12043_v7, %v3013_v11 }
 0x26b   : > { %v1395_v31 = vadd.s32 %v1394_v17, %v1390_v41  ;;  %v2969_v53 = vshrl.u32 %v2951_v25, %v2967_v22  ;;  %v2972_v12 = vadd.s32 127, %v2971_v20  ;;  %v3023_v3 = vshrl.u32 %v12051_v39, %v3014_v10 }
 0x26c   : > { %v3026_v33 = vshrl.u32 %v12038_v48, %v3014_v10  ;;  %vm9695_vm8 = vcmp.le.f32.partialorder %v12174_v0, 0.7853982  ;;  %v12175_v29 = vmov 0  ;;  %v3015_v41 = vshrl.u32 %v12056_v34, %v3014_v10 }
 0x26d   : > { %v12176_v29 = vsel %vm9695_vm8, 4294967295, %v12175_v29  ;;  %v1396_v16 = vadd.s32 536870912, %v1395_v31  ;;  %v3018_v2 = vor.u32 %v3017_v9, %v3016_v28  ;;  %v3028_v8 = vshll.u32 %v12038_v48, %v3013_v11 }
 0x26e   : > { %12177 = vst [vmem:[#allocation75_spill] sm:$0xff] %v12176_v29  ;;  %v2970_v17 = vor.u32 %v2969_v53, %v2968_v45  ;;  %v2973_v60 = vshll.u32 %v2972_v12, 23  ;;  %v3021_v25 = vor.u32 %v3020_v57, %v3019_v47  ;;  %v3027_v22 = vor.u32 %v3026_v33, %v3025_v14 }
 0x26f   : > { %v9701_v20 = vshrl.u32 %v1396_v16, 30  ;;  %v3024_v52 = vor.u32 %v3023_v3, %v3022_v18  ;;  %v3029_v13 = vshrl.u32 %v12039_v63, %v3014_v10  ;;  %vm3031_vm12 = vcmp.lt.s32.totalorder %v9681_v1, 1 }
 0x270   : > { %v2974_v0 = vor.u32 4788187, %v2973_v60  ;;  %vm3033_vm14 = vcmp.lt.s32.totalorder %v9681_v1, 3  ;;  %vm3034_vm9 = vcmp.lt.s32.totalorder %v9681_v1, 4  ;;  %v3047_v59 = vshll.u32 %v3007_v38, 8 }
 0x271   : > { %v1398_v28 = vshll.u32 %v9701_v20, 30  ;;  %v3030_v11 = vor.u32 %v3029_v13, %v3028_v8  ;;  %vm3032_vm7 = vcmp.lt.s32.totalorder %v9681_v1, 2  ;;  %v11923_v47 = vand.u32 2147483647, %v9661_v24  ;;  %v9762_v1 = vpop.f32.mrf.mxu1 }
 0x272   : > { %v3036_v14 = vsel %vm3034_vm9, %v3024_v52, 2102212464  ;;  %v3039_v10 = vsel %vm3031_vm12, %v3018_v2, %v3021_v25  ;;  %v3040_v60 = vsel %vm3034_vm9, %v3027_v22, 920167782  ;;  %v1443_v45 = vshrl.u32 %v1442_v26, 23  ;;  %12180 = vst [vmem:[#allocation76_spill] sm:$0xff] %v9762_v1 }
 0x273   : > { %v2977_v9 = vcvt.s32.f32 %v2970_v17  ;;  %v9716_v57 = vsub.s32 %v1395_v31, %v1398_v28  ;;  %v3035_v13 = vsel %vm3031_vm12, %v3015_v41, %v3018_v2  ;;  %v3041_v38 = vsel %vm3033_vm14, %v3024_v52, %v3040_v60 }
 0x274   : > { %v2975_v18 = vand.u32 2147483647, %v2974_v0  ;;  %v3037_v53 = vsel %vm3033_vm14, %v3021_v25, %v3036_v14  ;;  %v3042_v12 = vsel %vm3032_vm7, %v3039_v10, %v3041_v38  ;;  %v3043_v3 = vsel %vm3031_vm12, %v3021_v25, %v3024_v52 }
 0x275   : > { %v1401_v26 = vsub.s32 0, %v9716_v57  ;;  %v3044_v31 = vsel %vm3034_vm9, %v3030_v11, 1326507024  ;;  %v9731_v33 = vmul.u32.u64.low %v3047_v59, %v3042_v12  ;;  %v9732_v16 = vmul.u32.u64.high %v3047_v59, %v3042_v12, %v9731_v33 }
 0x276   : > { %v1215_v41 = vsel %vm9695_vm8, %v9146_v61, %v9668_v54  ;;  %v2875_v2 = vxor.u32 2147483648, %v9670_v15  ;;  %v3045_v8 = vsel %vm3033_vm14, %v3027_v22, %v3044_v31  ;;  %v7518_v52 = vadd.s32 4294967169, %v1443_v45 }
 0x277   : > { %v12178_v17 = vand.u32 2147483647, %v9649_v37  ;;  %v12179_v25 = vcvt.s32.f32 %v9645_v27  ;;  %v7515_v28 = vmin.u32 %v1401_v26, %v9716_v57  ;;  %v3038_v11 = vsel %vm3032_vm7, %v3035_v13, %v3037_v53 }
 0x278   : > { %v3046_v54 = vsel %vm3032_vm7, %v3043_v3, %v3045_v8  ;;  %v9753_v14 = vmul.f32 %v2977_v9, %v2975_v18  ;;  %v1449_v22 = vadd.s32 1, %v7518_v52  ;;  %7941 = vcosq.f32 %v1215_v41 }
 0x279   : > { %v9746_v0 = vmul.f32 %v12179_v25, %v12178_v17  ;;  %v9755_v10 = vmul.u32.u64.low %v3047_v59, %v3046_v54  ;;  %v9756_v60 = vmul.u32.u64.high %v3047_v59, %v3046_v54, %v9755_v10  ;;  %v1403_v37 = vclz %v7515_v28 }
 0x27a   : > { %v3057_v27 = vadd.s32 1, %v9732_v16  ;;  %v1446_v45 = vand.u32 8388607, %v11923_v47  ;;  %7943 = vsinq.f32 %v1215_v41  ;;  %v3054_v13 = vmul.u32 %v3047_v59, %v3038_v11 }
 0x27b   : > { %vm1450_vm12 = vcmp.gt.s32.totalorder %v1449_v22, 0  ;;  %vm12181_vm14 = vcmp.lt.s32.totalorder %v9210_v23, 0  ;;  %v7516_v53 = vadd.s32 4294967294, %v1403_v37  ;;  %v1391_v26 = vadd.s32 %v9657_v58, %v9654_v62 }
 0x27c   : > { %v9767_v9 = vsel %vm12181_vm14, %v2875_v2, %v9670_v15  ;;  %v1451_v12 = vsel %vm1450_vm12, %v1449_v22, 0  ;;  %vm3056_vm9 = vc.u32 %v9756_v60, %v9731_v33  ;;  %v1447_v41 = vor.u32 8388608, %v1446_v45 }
 0x27d   : > { %v1453_v59 = vand.u32 31, %v1451_v12  ;;  %vm7517_vm7 = vcmp.lt.s32.totalorder %v7516_v53, 0  ;;  %v3058_v31 = vsel %vm3056_vm9, %v3057_v27, %v9732_v16  ;;  %v3106_v15 = vand.u32 2139095040, %v9762_v1 }
 0x27e   : > { %v1406_v2 = vsel %vm7517_vm7, 0, %v7516_v53  ;;  %v3059_v8 = vadd.s32 %v3058_v31, %v3054_v13  ;;  %v9777_v52 = vshrl.u32 %v1451_v12, 5  ;;  %v12182_v22 = vand.u32 2147483647, %v9210_v23 }
 0x27f   : > { %v1454_v17 = vsub.s32 32, %v1453_v59  ;;  %v1407_v25 = vsub.s32 32, %v1406_v2  ;;  %v1408_v28 = vshll.u32 %v9716_v57, %v1406_v2  ;;  %v1411_v11 = vsub.s32 4294967266, %v1406_v2 }
 0x280   : > { %v1456_v62 = vshll.u32 %v12056_v34, %v1453_v59  ;;  %v3060_v58 = vadd.s32 536870912, %v3059_v8  ;;  %v1459_v10 = vshll.u32 %v12050_v36, %v1453_v59  ;;  %vm9786_vm12 = vcmp.le.f32.partialorder %v12182_v22, 0.7853982 }
 0x281   : > { %v1457_v54 = vshrl.u32 %v12050_v36, %v1454_v17  ;;  %v1460_v16 = vshrl.u32 %v12043_v7, %v1454_v17  ;;  %v12183_v37 = vmov 0  ;;  %v1409_v27 = vshrl.u32 %v1391_v26, %v1407_v25 }
 0x282   : > { %v12184_v37 = vsel %vm9786_vm12, 4294967295, %v12183_v37  ;;  %v1412_v45 = vadd.s32 127, %v1411_v11  ;;  %v1462_v57 = vshll.u32 %v12043_v7, %v1453_v59  ;;  %v1463_v13 = vshrl.u32 %v12051_v39, %v1454_v17 }
 0x283   : > { %12185 = vst [vmem:[#allocation77_spill] sm:$0xff] %v12184_v37  ;;  %v9793_v53 = vshrl.u32 %v3060_v58, 30  ;;  %v1455_v12 = vshrl.u32 %v12056_v34, %v1454_v17  ;;  %v1465_v31 = vshll.u32 %v12051_v39, %v1453_v59  ;;  %v9797_v2 = vshll.u32 %v1447_v41, 8 }
 0x284   : > { %v1410_v22 = vor.u32 %v1409_v27, %v1408_v28  ;;  %v1413_v47 = vshll.u32 %v1412_v45, 23  ;;  %v1458_v38 = vor.u32 %v1457_v54, %v1456_v62  ;;  %v1466_v26 = vshrl.u32 %v12038_v48, %v1454_v17 }
 0x285   : > { %v3062_v25 = vshll.u32 %v9793_v53, 30  ;;  %v1461_v11 = vor.u32 %v1460_v16, %v1459_v10  ;;  %v1468_v3 = vshll.u32 %v12038_v48, %v1453_v59  ;;  %v1469_v58 = vshrl.u32 %v12039_v63, %v1454_v17  ;;  %v9805_v41 = vpop.eup %7941 }
 0x286   : > { %v1414_v18 = vor.u32 4788187, %v1413_v47  ;;  %v1464_v61 = vor.u32 %v1463_v13, %v1462_v57  ;;  %v1467_v29 = vor.u32 %v1466_v26, %v1465_v31  ;;  %v12186_v28 = vand.u32 2147483647, %v9317_v50 }
 0x287   : > { %v12187_v62 = vmov 0  ;;  %v1417_v54 = vcvt.s32.f32 %v1410_v22  ;;  %v9813_v27 = vsub.s32 %v3059_v8, %v3062_v25  ;;  %v1470_v10 = vor.u32 %v1469_v58, %v1468_v3  ;;  %v9815_v16 = vpop.eup %7943 }
 0x288   : > { %vm9809_vm14 = vcmp.le.f32.partialorder %v12186_v28, 0.7853982  ;;  %v3107_v59 = vshrl.u32 %v3106_v15, 23  ;;  %v12190_v47 = vand.u32 2147483647, %v9407_v40  ;;  %v12191_v17 = vmov 0 }
 0x289   : > { %v12188_v62 = vsel %vm9809_vm14, 4294967295, %v12187_v62  ;;  %v1415_v45 = vand.u32 2147483647, %v1414_v18  ;;  %vm1472_vm7 = vcmp.lt.s32.totalorder %v9777_v52, 2  ;;  %vm1473_vm8 = vcmp.lt.s32.totalorder %v9777_v52, 3 }
 0x28a   : > { %12189 = vst [vmem:[#allocation78_spill] sm:$0xff] %v12188_v62  ;;  %vm9819_vm9 = vcmp.le.f32.partialorder %v12190_v47, 0.7853982  ;;  %vm1474_vm6 = vcmp.lt.s32.totalorder %v9777_v52, 4  ;;  %v3065_v8 = vsub.s32 0, %v9813_v27  ;;  %vm12194_vm11 = vcmp.lt.s32.totalorder %v9777_v52, 1 }
 0x28b   : > { %v12192_v17 = vsel %vm9819_vm9, 4294967295, %v12191_v17  ;;  %v1476_v57 = vsel %vm1474_vm6, %v1464_v61, 2102212464  ;;  %v1479_v3 = vsel %vm12194_vm11, %v1458_v38, %v1461_v11  ;;  %v1480_v15 = vsel %vm1474_vm6, %v1467_v29, 920167782  ;;  %vm12195_vm1 = vmmov %vm12194_vm11 }
 0x28c   : > { %12193 = vst [vmem:[#allocation79_spill] sm:$0xff] %v12192_v17  ;;  %v1475_v13 = vsel %vm12195_vm1, %v1455_v12, %v1458_v38  ;;  %v1477_v31 = vsel %vm1473_vm8, %v1461_v11, %v1476_v57  ;;  %v1481_v22 = vsel %vm1473_vm8, %v1464_v61, %v1480_v15  ;;  %vm12196_vm0 = vmmov %vm12195_vm1  ;;  %v2879_v26 = vsel %vm9786_vm12, %v9210_v23, %v9767_v9 }
 0x28d   : > { %v1483_v18 = vsel %vm12196_vm0, %v1461_v11, %v1464_v61  ;;  %v7579_v25 = vmin.u32 %v3065_v8, %v9813_v27  ;;  %v1482_v58 = vsel %vm1472_vm7, %v1479_v3, %v1481_v22  ;;  %v1484_v28 = vsel %vm1474_vm6, %v1470_v10, 1326507024 }
 0x28e   : > { %v12197_v47 = vxor.u32 2147483648, %v9746_v0  ;;  %vm12198_vm1 = vcmp.lt.s32.totalorder %v9317_v50, 0  ;;  %v1485_v12 = vsel %vm1473_vm8, %v1467_v29, %v1484_v28  ;;  %vm11940_vm0 = vcmp.lt.s32.totalorder %v9502_v42, 0 }
 0x28f   : > { %v9846_v61 = vmul.u32.u64.low %v9797_v2, %v1482_v58  ;;  %v9847_v11 = vmul.u32.u64.high %v9797_v2, %v1482_v58, %v9846_v61  ;;  %v3067_v9 = vclz %v7579_v25  ;;  %v1478_v8 = vsel %vm1472_vm7, %v1475_v13, %v1477_v31  ;;  %vm12202_vm6 = vmmov %vm12198_vm1 }
 0x290   : > { %v1316_v38 = vsel %vm12198_vm1, %v12197_v47, %v9746_v0  ;;  %v1486_v10 = vsel %vm1472_vm7, %v1483_v18, %v1485_v12  ;;  %v7582_v57 = vadd.s32 4294967169, %v3107_v59  ;;  %v12199_v3 = vxor.u32 2147483648, %v9753_v14 }
 0x291   : > { %vm12200_vm11 = vcmp.lt.s32.totalorder %v9407_v40, 0  ;;  %v1418_v0 = vmul.f32 %v1417_v54, %v1415_v45  ;;  %v9861_v15 = vmul.u32.u64.low %v9797_v2, %v1486_v10  ;;  %v9862_v22 = vmul.u32.u64.high %v9797_v2, %v1486_v10, %v9861_v15 }
 0x292   : > { %v2980_v29 = vsel %vm12200_vm11, %v12199_v3, %v9753_v14  ;;  %7945 = vcosq.f32 %v2879_v26  ;;  %v12201_v25 = vsub.s32 4, %v9513_v49  ;;  %v7580_v59 = vadd.s32 4294967294, %v3067_v9 }
 0x293   : > { %v3113_v13 = vadd.s32 1, %v7582_v57  ;;  %7947 = vsinq.f32 %v2879_v26  ;;  %v1319_v14 = vsel %vm9809_vm14, %v9317_v50, %v1316_v38  ;;  %v1494_v54 = vmul.u32 %v9797_v2, %v1478_v8 }
 0x294   : > { %v9869_v52 = vsel %vm12202_vm6, %v12201_v25, %v9513_v49  ;;  %v1497_v45 = vadd.s32 1, %v9847_v11  ;;  %v9879_v31 = vsel %vm9819_vm9, %v9407_v40, %v2980_v29  ;;  %vm7581_vm8 = vcmp.lt.s32.totalorder %v7580_v59, 0 }
 0x295   : > { %12203 = vst [vmem:[#allocation80_spill] sm:$0xff] %v9869_v52  ;;  %v11932_v49 = vand.u32 2147483647, %v9762_v1  ;;  %vm3114_vm7 = vcmp.gt.s32.totalorder %v3113_v13, 0  ;;  %v1419_v18 = vxor.u32 2147483648, %v1418_v0  ;;  %v3070_v58 = vsel %vm7581_vm8, 0, %v7580_v59 }
 0x296   : > { %vm1496_vm1 = vc.u32 %v9862_v22, %v9846_v61  ;;  %v3115_v26 = vsel %vm3114_vm7, %v3113_v13, 0  ;;  %7949 = vcosq.f32 %v1319_v14  ;;  %v3075_v28 = vsub.s32 4294967266, %v3070_v58 }
 0x297   : > { %v1498_v47 = vsel %vm1496_vm1, %v1497_v45, %v9847_v11  ;;  %7951 = vsinq.f32 %v1319_v14  ;;  %v3117_v9 = vand.u32 31, %v3115_v26  ;;  %v3055_v8 = vadd.s32 %v9731_v33, %v9756_v60 }
 0x298   : > { %v1499_v12 = vadd.s32 %v1498_v47, %v1494_v54  ;;  %7953 = vcosq.f32 %v9879_v31  ;;  %v3071_v10 = vsub.s32 32, %v3070_v58  ;;  %v3110_v57 = vand.u32 8388607, %v11932_v49  ;;  %v9899_v54 = vpop.f32.mrf.mxu0 }
 0x299   : > { %v9894_v3 = vsel %vm11940_vm0, %v1419_v18, %v1418_v0  ;;  %v3076_v29 = vadd.s32 127, %v3075_v28  ;;  %v3118_v15 = vsub.s32 32, %v3117_v9  ;;  %v3116_v25 = vshrl.u32 %v3115_v26, 5  ;;  %12204 = vst [vmem:[#allocation81_spill] sm:$0xff] %v9899_v54 }
 0x29a   : > { %v1500_v11 = vadd.s32 536870912, %v1499_v12  ;;  %v3120_v59 = vshll.u32 %v12056_v34, %v3117_v9  ;;  %v3123_v13 = vshll.u32 %v12050_v36, %v3117_v9  ;;  %v3129_v14 = vshll.u32 %v12051_v39, %v3117_v9 }
 0x29b   : > { %v3121_v60 = vshrl.u32 %v12050_v36, %v3118_v15  ;;  %v3124_v45 = vshrl.u32 %v12043_v7, %v3118_v15  ;;  %v3126_v0 = vshll.u32 %v12043_v7, %v3117_v9  ;;  %v3072_v18 = vshll.u32 %v9813_v27, %v3070_v58 }
 0x29c   : > { %v9901_v33 = vshrl.u32 %v1500_v11, 30  ;;  %v3073_v28 = vshrl.u32 %v3055_v8, %v3071_v10  ;;  %v3127_v26 = vshrl.u32 %v12051_v39, %v3118_v15  ;;  %v3130_v47 = vshrl.u32 %v12038_v48, %v3118_v15 }
 0x29d   : > { %v3077_v49 = vshll.u32 %v3076_v29, 23  ;;  %v3111_v2 = vor.u32 8388608, %v3110_v57  ;;  %v1546_v11 = vand.u32 2139095040, %v9899_v54  ;;  %v3122_v17 = vor.u32 %v3121_v60, %v3120_v59 }
 0x29e   : > { %v1502_v38 = vshll.u32 %v9901_v33, 30  ;;  %v3125_v50 = vor.u32 %v3124_v45, %v3123_v13  ;;  %v3131_v62 = vor.u32 %v3130_v47, %v3129_v14  ;;  %v3132_v52 = vshll.u32 %v12038_v48, %v3117_v9 }
 0x29f   : > { %v9912_v23 = vpop.eup %7945  ;;  %v3128_v27 = vor.u32 %v3127_v26, %v3126_v0  ;;  %v3133_v58 = vshrl.u32 %v12039_v63, %v3118_v15  ;;  %vm3135_vm11 = vcmp.lt.s32.totalorder %v3116_v25, 1  ;;  %v12207_v10 = vand.u32 2147483647, %v9502_v42 }
 0x2a0   : > { %12205 = vst [vmem:[#allocation82_spill] sm:$0xff] %v9912_v23  ;;  %v9914_v37 = vsub.s32 %v1499_v12, %v1502_v38  ;;  %v9917_v8 = vpop.eup %7947  ;;  %v12208_v57 = vmov 0  ;;  %v3074_v29 = vor.u32 %v3073_v28, %v3072_v18  ;;  %v3119_v59 = vshrl.u32 %v12056_v34, %v3118_v15 }
 0x2a1   : > { %12206 = vst [vmem:[#allocation83_spill] sm:$0xff] %v9917_v8  ;;  %vm9921_vm6 = vcmp.le.f32.partialorder %v12207_v10, 0.7853982  ;;  %vm3137_vm8 = vcmp.lt.s32.totalorder %v3116_v25, 3  ;;  %vm3138_vm7 = vcmp.lt.s32.totalorder %v3116_v25, 4  ;;  %v3134_v12 = vor.u32 %v3133_v58, %v3132_v52 }
 0x2a2   : > { %v12209_v57 = vsel %vm9921_vm6, 4294967295, %v12208_v57  ;;  %v1505_v38 = vsub.s32 0, %v9914_v37  ;;  %vm3136_vm1 = vcmp.lt.s32.totalorder %v3116_v25, 2  ;;  %v3140_v9 = vsel %vm3138_vm7, %v3128_v27, 2102212464 }
 0x2a3   : > { %v3078_v13 = vor.u32 4788187, %v3077_v49  ;;  %v3143_v14 = vsel %vm3135_vm11, %v3122_v17, %v3125_v50  ;;  %v3144_v60 = vsel %vm3138_vm7, %v3131_v62, 920167782  ;;  %v3151_v45 = vshll.u32 %v3111_v2, 8  ;;  %v9930_v0 = vpop.eup %7949 }
 0x2a4   : > { %12210 = vst [vmem:[#allocation84_spill] sm:$0xff] %v9930_v0  ;;  %vm11948_vm0 = vcmp.lt.s32.totalorder %v9598_v5, 0  ;;  %v7519_v15 = vmin.u32 %v1505_v38, %v9914_v37  ;;  %v3145_v18 = vsel %vm3137_vm8, %v3128_v27, %v3144_v60  ;;  %v3147_v28 = vsel %vm3135_vm11, %v3125_v50, %v3128_v27  ;;  %v9937_v26 = vpop.eup %7951 }
 0x2a5   : > { %12211 = vst [vmem:[#allocation85_spill] sm:$0xff] %v9937_v26  ;;  %v3139_v49 = vsel %vm3135_vm11, %v3119_v59, %v3122_v17  ;;  %v3141_v47 = vsel %vm3137_vm8, %v3125_v50, %v3140_v9  ;;  %v3146_v2 = vsel %vm3136_vm1, %v3143_v14, %v3145_v18  ;;  %v3148_v58 = vsel %vm3138_vm7, %v3134_v12, 1326507024  ;;  %v9943_v10 = vpop.eup %7953 }
 0x2a6   : > { %12212 = vst [vmem:[#allocation86_spill] sm:$0xff] %v9943_v10  ;;  %v3081_v0 = vcvt.s32.f32 %v3074_v29  ;;  %v1507_v38 = vclz %v7519_v15  ;;  %v3149_v60 = vsel %vm3137_vm8, %v3131_v62, %v3148_v58  ;;  %v1547_v23 = vshrl.u32 %v1546_v11, 23 }
 0x2a7   : > { %v3079_v27 = vand.u32 2147483647, %v3078_v13  ;;  %v3150_v52 = vsel %vm3136_vm1, %v3147_v28, %v3149_v60  ;;  %v9947_v8 = vmul.u32.u64.low %v3151_v45, %v3146_v2  ;;  %v9948_v26 = vmul.u32.u64.high %v3151_v45, %v3146_v2, %v9947_v8 }
 0x2a8   : > { %v7520_v17 = vadd.s32 4294967294, %v1507_v38  ;;  %v3142_v50 = vsel %vm3136_vm1, %v3139_v49, %v3141_v47  ;;  %v9952_v59 = vmul.u32.u64.low %v3151_v45, %v3150_v52  ;;  %v9953_v9 = vmul.u32.u64.high %v3151_v45, %v3150_v52, %v9952_v59 }
 0x2a9   : > { %v12213_v29 = vsub.s32 4, %v9623_v21  ;;  %vm12214_vm11 = vcmp.lt.s32.totalorder %v9407_v40, 0  ;;  %7955 = vsinq.f32 %v9879_v31  ;;  %v12216_v11 = vsub.s32 4, %v9701_v20  ;;  %v9979_v31 = vpop.f32.mrf.mxu1 }
 0x2aa   : > { %vm12217_vm8 = vcmp.lt.s32.totalorder %v9502_v42, 0  ;;  %v7522_v25 = vadd.s32 4294967169, %v1547_v23  ;;  %v9974_v13 = vsel %vm9921_vm6, %v9502_v42, %v9894_v3  ;;  %v3085_v14 = vsub.s32 4, %v9793_v53  ;;  %12218 = vst [vmem:[#allocation88_spill] sm:$0xff] %v9979_v31 }
 0x2ab   : > { %v9960_v62 = vsel %vm12214_vm11, %v12213_v29, %v9623_v21  ;;  %v9968_v12 = vsel %vm12217_vm8, %v12216_v11, %v9701_v20  ;;  %v1495_v21 = vadd.s32 %v9846_v61, %v9862_v22  ;;  %vm7521_vm7 = vcmp.lt.s32.totalorder %v7520_v17, 0 }
 0x2ac   : > { %12215 = vst [vmem:[#allocation87_spill] sm:$0xff] %v9960_v62  ;;  %v1510_v15 = vsel %vm7521_vm7, 0, %v7520_v17  ;;  %v3158_v18 = vmul.u32 %v3151_v45, %v3142_v50  ;;  %v3161_v20 = vadd.s32 1, %v9948_v26  ;;  %v1553_v28 = vadd.s32 1, %v7522_v25 }
 0x2ad   : > { %v9982_v23 = vmul.f32 %v3081_v0, %v3079_v27  ;;  %v1511_v52 = vsub.s32 32, %v1510_v15  ;;  %v1515_v49 = vsub.s32 4294967266, %v1510_v15  ;;  %v12219_v3 = vand.u32 2147483647, %v9899_v54 }
 0x2ae   : > { %v1512_v2 = vshll.u32 %v9914_v37, %v1510_v15  ;;  %vm3160_vm1 = vc.u32 %v9953_v9, %v9947_v8  ;;  %vm1554_vm11 = vcmp.gt.s32.totalorder %v1553_v28, 0  ;;  %v3210_v61 = vand.u32 2139095040, %v9979_v31 }
 0x2af   : > { %v1550_v47 = vand.u32 8388607, %v12219_v3  ;;  %v1513_v22 = vshrl.u32 %v1495_v21, %v1511_v52  ;;  %v1516_v45 = vadd.s32 127, %v1515_v49  ;;  %v3162_v58 = vsel %vm3160_vm1, %v3161_v20, %v9948_v26 }
 0x2b0   : > { %v1555_v38 = vsel %vm1554_vm11, %v1553_v28, 0  ;;  %7957 = vcosq.f32 %v9974_v13  ;;  %v9995_v0 = vsel %vm11948_vm0, %v3085_v14, %v9793_v53  ;;  %v3163_v60 = vadd.s32 %v3162_v58, %v3158_v18 }
 0x2b1   : > { %12220 = vst [vmem:[#allocation89_spill] sm:$0xff] %v9995_v0  ;;  %v1557_v37 = vand.u32 31, %v1555_v38  ;;  %v3083_v27 = vxor.u32 2147483648, %v9982_v23  ;;  %v1517_v17 = vshll.u32 %v1516_v45, 23  ;;  %v1551_v50 = vor.u32 8388608, %v1550_v47 }
 0x2b2   : > { %v11951_v59 = vand.u32 2147483647, %v9979_v31  ;;  %v3164_v29 = vadd.s32 536870912, %v3163_v60  ;;  %v1514_v21 = vor.u32 %v1513_v22, %v1512_v2  ;;  %v1556_v15 = vshrl.u32 %v1555_v38, 5 }
 0x2b3   : > { %v1558_v11 = vsub.s32 32, %v1557_v37  ;;  %v1560_v26 = vshll.u32 %v12056_v34, %v1557_v37  ;;  %v1563_v25 = vshll.u32 %v12050_v36, %v1557_v37  ;;  %v1569_v20 = vshll.u32 %v12051_v39, %v1557_v37 }
 0x2b4   : > { %v3211_v53 = vshrl.u32 %v3210_v61, 23  ;;  %v10002_v14 = vshrl.u32 %v3164_v29, 30  ;;  %v1566_v52 = vshll.u32 %v12043_v7, %v1557_v37  ;;  %v1518_v49 = vor.u32 4788187, %v1517_v17 }
 0x2b5   : > { %v1561_v18 = vshrl.u32 %v12050_v36, %v1558_v11  ;;  %v1564_v28 = vshrl.u32 %v12043_v7, %v1558_v11  ;;  %v1567_v3 = vshrl.u32 %v12051_v39, %v1558_v11  ;;  %v1570_v47 = vshrl.u32 %v12038_v48, %v1558_v11 }
 0x2b6   : > { %v1572_v45 = vshll.u32 %v12038_v48, %v1557_v37  ;;  %v3166_v2 = vshll.u32 %v10002_v14, 30  ;;  %v3214_v61 = vand.u32 8388607, %v11951_v59  ;;  %v10013_v38 = vpop.eup %7955  ;;  %v1559_v29 = vshrl.u32 %v12056_v34, %v1558_v11 }
 0x2b7   : > { %v1562_v22 = vor.u32 %v1561_v18, %v1560_v26  ;;  %v1565_v58 = vor.u32 %v1564_v28, %v1563_v25  ;;  %12221 = vst [vmem:[#allocation90_spill] sm:$0xff] %v10013_v38  ;;  %v1571_v0 = vor.u32 %v1570_v47, %v1569_v20  ;;  %v1573_v17 = vshrl.u32 %v12039_v63, %v1558_v11 }
 0x2b8   : > { %v7586_v10 = vadd.s32 4294967169, %v3211_v53  ;;  %v12222_v40 = vand.u32 2147483647, %v9598_v5  ;;  %v12223_v62 = vmov 0  ;;  %v1521_v37 = vcvt.s32.f32 %v1514_v21 }
 0x2b9   : > { %v10023_v26 = vsub.s32 %v3163_v60, %v3166_v2  ;;  %v1568_v25 = vor.u32 %v1567_v3, %v1566_v52  ;;  %vm1575_vm7 = vcmp.lt.s32.totalorder %v1556_v15, 1  ;;  %v1519_v18 = vand.u32 2147483647, %v1518_v49 }
 0x2ba   : > { %vm10019_vm8 = vcmp.le.f32.partialorder %v12222_v40, 0.7853982  ;;  %v1574_v28 = vor.u32 %v1573_v17, %v1572_v45  ;;  %vm1577_vm1 = vcmp.lt.s32.totalorder %v1556_v15, 3  ;;  %vm1578_vm11 = vcmp.lt.s32.totalorder %v1556_v15, 4 }
 0x2bb   : > { %v12224_v62 = vsel %vm10019_vm8, 4294967295, %v12223_v62  ;;  %v3169_v20 = vsub.s32 0, %v10023_v26  ;;  %v1580_v11 = vsel %vm1578_vm11, %v1568_v25, 2102212464  ;;  %v1583_v53 = vsel %vm1575_vm7, %v1562_v22, %v1565_v58 }
 0x2bc   : > { %12225 = vst [vmem:[#allocation91_spill] sm:$0xff] %v12224_v62  ;;  %7959 = vsinq.f32 %v9974_v13  ;;  %v1579_v40 = vsel %vm1575_vm7, %v1559_v29, %v1562_v22  ;;  %v1584_v60 = vsel %vm1578_vm11, %v1571_v0, 920167782  ;;  %v1591_v21 = vshll.u32 %v1551_v50, 8 }
 0x2bd   : > { %v7583_v52 = vmin.u32 %v3169_v20, %v10023_v26  ;;  %v1581_v49 = vsel %vm1577_vm1, %v1565_v58, %v1580_v11  ;;  %v1585_v3 = vsel %vm1577_vm1, %v1568_v25, %v1584_v60  ;;  %v1587_v47 = vsel %vm1575_vm7, %v1565_v58, %v1568_v25  ;;  %v10035_v45 = vpop.eup %7957 }
 0x2be   : > { %12226 = vst [vmem:[#allocation92_spill] sm:$0xff] %v10035_v45  ;;  %vm12227_vm0 = vcmp.lt.s32.totalorder %v9598_v5, 0  ;;  %vm12228_vm9 = vcmp.lt.s32.totalorder %v1556_v15, 2  ;;  %v1588_v22 = vsel %vm1578_vm11, %v1574_v28, 1326507024  ;;  %v3215_v29 = vor.u32 8388608, %v3214_v61  ;;  %v10054_v61 = vpop.f32.mrf.mxu0 }
 0x2bf   : > { %v3084_v2 = vsel %vm12227_vm0, %v3083_v27, %v9982_v23  ;;  %v1586_v13 = vsel %vm12228_vm9, %v1583_v53, %v1585_v3  ;;  %v10042_v50 = vmul.f32 %v1521_v37, %v1519_v18  ;;  %v3171_v17 = vclz %v7583_v52  ;;  %vm12229_vm6 = vmmov %vm12228_vm9  ;;  %12231 = vst [vmem:[#allocation93_spill] sm:$0xff] %v10054_v61 }
 0x2c0   : > { %v1589_v20 = vsel %vm1577_vm1, %v1571_v0, %v1588_v22  ;;  %v3217_v11 = vadd.s32 1, %v7586_v10  ;;  %v1582_v60 = vsel %vm12229_vm6, %v1579_v40, %v1581_v49  ;;  %vm12230_vm7 = vmmov %vm12229_vm6  ;;  %v10059_v0 = vsel %vm10019_vm8, %v9598_v5, %v3084_v2 }
 0x2c1   : > { %v1590_v58 = vsel %vm12230_vm7, %v1587_v47, %v1589_v20  ;;  %v10047_v25 = vmul.u32.u64.low %v1591_v21, %v1586_v13  ;;  %v10048_v59 = vmul.u32.u64.high %v1591_v21, %v1586_v13, %v10047_v25  ;;  %v7584_v23 = vadd.s32 4294967294, %v3171_v17 }
 0x2c2   : > { %v10051_v27 = vmul.u32.u64.low %v1591_v21, %v1590_v58  ;;  %v10052_v53 = vmul.u32.u64.high %v1591_v21, %v1590_v58, %v10051_v27  ;;  %vm3218_vm9 = vcmp.gt.s32.totalorder %v3217_v11, 0  ;;  %vm1441_vm0 = vcmp.lt.s32.totalorder %v9661_v24, 0 }
 0x2c3   : > { %v3219_v15 = vsel %vm3218_vm9, %v3217_v11, 0  ;;  %v3159_v18 = vadd.s32 %v9947_v8, %v9953_v9  ;;  %vm7585_vm6 = vcmp.lt.s32.totalorder %v7584_v23, 0  ;;  %v10066_v40 = vshll.u32 %v3215_v29, 8 }
 0x2c4   : > { %v3221_v28 = vand.u32 31, %v3219_v15  ;;  %v1523_v52 = vxor.u32 2147483648, %v10042_v50  ;;  %v3174_v49 = vsel %vm7585_vm6, 0, %v7584_v23  ;;  %v1598_v3 = vmul.u32 %v1591_v21, %v1582_v60 }
 0x2c5   : > { %v1601_v47 = vadd.s32 1, %v10048_v59  ;;  %v3175_v2 = vsub.s32 32, %v3174_v49  ;;  %v3176_v13 = vshll.u32 %v10023_v26, %v3174_v49  ;;  %v3179_v22 = vsub.s32 4294967266, %v3174_v49 }
 0x2c6   : > { %v1650_v17 = vand.u32 2139095040, %v10054_v61  ;;  %vm1600_vm1 = vc.u32 %v10052_v53, %v10047_v25  ;;  %v3222_v8 = vsub.s32 32, %v3221_v28  ;;  %v3224_v9 = vshll.u32 %v12056_v34, %v3221_v28 }
 0x2c7   : > { %v3227_v29 = vshll.u32 %v12050_v36, %v3221_v28  ;;  %v3177_v20 = vshrl.u32 %v3159_v18, %v3175_v2  ;;  %v3180_v11 = vadd.s32 127, %v3179_v22  ;;  %v1602_v21 = vsel %vm1600_vm1, %v1601_v47, %v10048_v59 }
 0x2c8   : > { %v3230_v60 = vshll.u32 %v12043_v7, %v3221_v28  ;;  %v1603_v58 = vadd.s32 %v1602_v21, %v1598_v3  ;;  %v3220_v23 = vshrl.u32 %v3219_v15, 5  ;;  %v3225_v26 = vshrl.u32 %v12050_v36, %v3222_v8 }
 0x2c9   : > { %v3228_v27 = vshrl.u32 %v12043_v7, %v3222_v8  ;;  %v10080_v49 = vpop.eup %7959  ;;  %v12233_v10 = vand.u32 2147483647, %v9661_v24  ;;  %v12234_v37 = vmov 0  ;;  %v3178_v18 = vor.u32 %v3177_v20, %v3176_v13 }
 0x2ca   : > { %12232 = vst [vmem:[#allocation94_spill] sm:$0xff] %v10080_v49  ;;  %v3181_v2 = vshll.u32 %v3180_v11, 23  ;;  %v3231_v59 = vshrl.u32 %v12051_v39, %v3222_v8  ;;  %v3233_v47 = vshll.u32 %v12051_v39, %v3221_v28  ;;  %v1604_v3 = vadd.s32 536870912, %v1603_v58 }
 0x2cb   : > { %vm10084_vm11 = vcmp.le.f32.partialorder %v12233_v10, 0.7853982  ;;  %v3223_v15 = vshrl.u32 %v12056_v34, %v3222_v8  ;;  %v3226_v22 = vor.u32 %v3225_v26, %v3224_v9  ;;  %v3234_v21 = vshrl.u32 %v12038_v48, %v3222_v8 }
 0x2cc   : > { %v12235_v37 = vsel %vm10084_vm11, 4294967295, %v12234_v37  ;;  %v3182_v5 = vor.u32 4788187, %v3181_v2  ;;  %v3229_v62 = vor.u32 %v3228_v27, %v3227_v29  ;;  %v3232_v38 = vor.u32 %v3231_v59, %v3230_v60 }
 0x2cd   : > { %12236 = vst [vmem:[#allocation95_spill] sm:$0xff] %v12235_v37  ;;  %v3236_v10 = vshll.u32 %v12038_v48, %v3221_v28  ;;  %v10093_v45 = vshrl.u32 %v1604_v3, 30  ;;  %v3235_v49 = vor.u32 %v3234_v21, %v3233_v47  ;;  %v3237_v13 = vshrl.u32 %v12039_v63, %v3222_v8 }
 0x2ce   : > { %vm3239_vm7 = vcmp.lt.s32.totalorder %v3220_v23, 1  ;;  %v3183_v20 = vand.u32 2147483647, %v3182_v5  ;;  %v3185_v11 = vcvt.s32.f32 %v3178_v18  ;;  %vm3241_vm9 = vcmp.lt.s32.totalorder %v3220_v23, 3 }
 0x2cf   : > { %vm3242_vm6 = vcmp.lt.s32.totalorder %v3220_v23, 4  ;;  %v1524_v9 = vsel %vm1441_vm0, %v1523_v52, %v10042_v50  ;;  %v1606_v26 = vshll.u32 %v10093_v45, 30  ;;  %v3238_v29 = vor.u32 %v3237_v13, %v3236_v10 }
 0x2d0   : > { %vm3240_vm1 = vcmp.lt.s32.totalorder %v3220_v23, 2  ;;  %vm11965_vm8 = vcmp.lt.s32.totalorder %v9762_v1, 0  ;;  %v3244_v28 = vsel %vm3242_vm6, %v3232_v38, 2102212464  ;;  %v3247_v60 = vsel %vm3239_vm7, %v3226_v22, %v3229_v62  ;;  %v10143_v23 = vpop.f32.mrf.mxu1 }
 0x2d1   : > { %v3248_v8 = vsel %vm3242_vm6, %v3235_v49, 920167782  ;;  %v1651_v5 = vshrl.u32 %v1650_v17, 23  ;;  %v10104_v27 = vsub.s32 %v1603_v58, %v1606_v26  ;;  %v3243_v18 = vsel %vm3239_vm7, %v3223_v15, %v3226_v22  ;;  %12240 = vst [vmem:[#allocation97_spill] sm:$0xff] %v10143_v23 }
 0x2d2   : > { %v3249_v2 = vsel %vm3241_vm9, %v3232_v38, %v3248_v8  ;;  %v12237_v50 = vand.u32 2147483647, %v10054_v61  ;;  %v3186_v59 = vmul.f32 %v3185_v11, %v3183_v20  ;;  %v3245_v47 = vsel %vm3241_vm9, %v3229_v62, %v3244_v28 }
 0x2d3   : > { %v3250_v3 = vsel %vm3240_vm1, %v3247_v60, %v3249_v2  ;;  %v3251_v21 = vsel %vm3239_vm7, %v3229_v62, %v3232_v38  ;;  %v1609_v10 = vsub.s32 0, %v10104_v27  ;;  %v3252_v17 = vsel %vm3242_vm6, %v3238_v29, 1326507024 }
 0x2d4   : > { %v1654_v52 = vand.u32 8388607, %v12237_v50  ;;  %v10116_v58 = vmul.u32.u64.low %v10066_v40, %v3250_v3  ;;  %v10117_v13 = vmul.u32.u64.high %v10066_v40, %v3250_v3, %v10116_v58  ;;  %7961 = vcosq.f32 %v10059_v0 }
 0x2d5   : > { %v12238_v15 = vsub.s32 4, %v9901_v33  ;;  %v3253_v62 = vsel %vm3241_vm9, %v3235_v49, %v3252_v17  ;;  %v7526_v38 = vadd.s32 4294967169, %v1651_v5  ;;  %v1527_v20 = vsel %vm10084_vm11, %v9661_v24, %v1524_v9 }
 0x2d6   : > { %v7523_v11 = vmin.u32 %v1609_v10, %v10104_v27  ;;  %v3246_v26 = vsel %vm3240_vm1, %v3243_v18, %v3245_v47  ;;  %v3254_v29 = vsel %vm3240_vm1, %v3251_v21, %v3253_v62  ;;  %7963 = vsinq.f32 %v10059_v0 }
 0x2d7   : > { %v10126_v22 = vsel %vm1441_vm0, %v12238_v15, %v9901_v33  ;;  %v10137_v28 = vmul.u32.u64.low %v10066_v40, %v3254_v29  ;;  %v10138_v60 = vmul.u32.u64.high %v10066_v40, %v3254_v29, %v10137_v28  ;;  %v1657_v33 = vadd.s32 1, %v7526_v38 }
 0x2d8   : > { %12239 = vst [vmem:[#allocation96_spill] sm:$0xff] %v10126_v22  ;;  %v3187_v8 = vxor.u32 2147483648, %v3186_v59  ;;  %v1611_v49 = vclz %v7523_v11  ;;  %v3265_v5 = vadd.s32 1, %v10117_v13  ;;  %v1655_v2 = vor.u32 8388608, %v1654_v52 }
 0x2d9   : > { %7965 = vcosq.f32 %v1527_v20  ;;  %v3262_v50 = vmul.u32 %v10066_v40, %v3246_v26  ;;  %vm1658_vm0 = vcmp.gt.s32.totalorder %v1657_v33, 0  ;;  %v1599_v3 = vadd.s32 %v10047_v25, %v10052_v53 }
 0x2da   : > { %7967 = vsinq.f32 %v1527_v20  ;;  %v7524_v0 = vadd.s32 4294967294, %v1611_v49  ;;  %v1659_v18 = vsel %vm1658_vm0, %v1657_v33, 0  ;;  %vm3264_vm7 = vc.u32 %v10138_v60, %v10116_v58 }
 0x2db   : > { %v1661_v52 = vand.u32 31, %v1659_v18  ;;  %v3188_v40 = vsel %vm11965_vm8, %v3187_v8, %v3186_v59  ;;  %v3266_v10 = vsel %vm3264_vm7, %v3265_v5, %v10117_v13  ;;  %v10154_v17 = vshll.u32 %v1655_v2, 8 }
 0x2dc   : > { %vm7525_vm9 = vcmp.lt.s32.totalorder %v7524_v0, 0  ;;  %v3267_v62 = vadd.s32 %v3266_v10, %v3262_v50  ;;  %v10156_v38 = vshrl.u32 %v1659_v18, 5  ;;  %v12241_v25 = vand.u32 2147483647, %v9762_v1 }
 0x2dd   : > { %v1614_v15 = vsel %vm7525_vm9, 0, %v7524_v0  ;;  %v1662_v20 = vsub.s32 32, %v1661_v52  ;;  %v12242_v53 = vmov 0  ;;  %v1664_v29 = vshll.u32 %v12056_v34, %v1661_v52 }
 0x2de   : > { %vm10160_vm6 = vcmp.le.f32.partialorder %v12241_v25, 0.7853982  ;;  %v1615_v11 = vsub.s32 32, %v1614_v15  ;;  %v1616_v26 = vshll.u32 %v10104_v27, %v1614_v15  ;;  %v1619_v59 = vsub.s32 4294967266, %v1614_v15 }
 0x2df   : > { %v12243_v53 = vsel %vm10160_vm6, 4294967295, %v12242_v53  ;;  %v3268_v13 = vadd.s32 536870912, %v3267_v62  ;;  %v1665_v28 = vshrl.u32 %v12050_v36, %v1662_v20  ;;  %v1667_v33 = vshll.u32 %v12050_v36, %v1661_v52 }
 0x2e0   : > { %12244 = vst [vmem:[#allocation98_spill] sm:$0xff] %v12243_v53  ;;  %v1668_v8 = vshrl.u32 %v12043_v7, %v1662_v20  ;;  %v1617_v49 = vshrl.u32 %v1599_v3, %v1615_v11  ;;  %v1620_v5 = vadd.s32 127, %v1619_v59  ;;  %v1670_v2 = vshll.u32 %v12043_v7, %v1661_v52 }
 0x2e1   : > { %v1671_v50 = vshrl.u32 %v12051_v39, %v1662_v20  ;;  %v10171_v0 = vshrl.u32 %v3268_v13, 30  ;;  %v1663_v27 = vshrl.u32 %v12056_v34, %v1662_v20  ;;  %v1673_v18 = vshll.u32 %v12051_v39, %v1661_v52  ;;  %v10176_v15 = vpop.eup %7961 }
 0x2e2   : > { %v3314_v10 = vand.u32 2139095040, %v10143_v23  ;;  %12245 = vst [vmem:[#allocation99_spill] sm:$0xff] %v10176_v15  ;;  %v1618_v25 = vor.u32 %v1617_v49, %v1616_v26  ;;  %v1621_v47 = vshll.u32 %v1620_v5, 23  ;;  %v1666_v3 = vor.u32 %v1665_v28, %v1664_v29 }
 0x2e3   : > { %v1674_v11 = vshrl.u32 %v12038_v48, %v1662_v20  ;;  %v3270_v59 = vshll.u32 %v10171_v0, 30  ;;  %v1669_v21 = vor.u32 %v1668_v8, %v1667_v33  ;;  %v1676_v13 = vshll.u32 %v12038_v48, %v1661_v52  ;;  %v10183_v24 = vpop.eup %7963 }
 0x2e4   : > { %v1677_v9 = vshrl.u32 %v12039_v63, %v1662_v20  ;;  %v1622_v37 = vor.u32 4788187, %v1621_v47  ;;  %v1672_v22 = vor.u32 %v1671_v50, %v1670_v2  ;;  %vm1679_vm0 = vcmp.lt.s32.totalorder %v10156_v38, 1 }
 0x2e5   : > { %v1675_v42 = vor.u32 %v1674_v11, %v1673_v18  ;;  %v1625_v15 = vcvt.s32.f32 %v1618_v25  ;;  %v10186_v26 = vsub.s32 %v3267_v62, %v3270_v59  ;;  %v3315_v28 = vshrl.u32 %v3314_v10, 23 }
 0x2e6   : > { %v1678_v29 = vor.u32 %v1677_v9, %v1676_v13  ;;  %v10188_v49 = vpop.eup %7965  ;;  %v1623_v5 = vand.u32 2147483647, %v1622_v37  ;;  %vm1680_vm7 = vcmp.lt.s32.totalorder %v10156_v38, 2  ;;  %vm1681_vm9 = vcmp.lt.s32.totalorder %v10156_v38, 3 }
 0x2e7   : > { %12246 = vst [vmem:[#allocation100_spill] sm:$0xff] %v10188_v49  ;;  %vm1682_vm1 = vcmp.lt.s32.totalorder %v10156_v38, 4  ;;  %v10193_v52 = vpop.eup %7967  ;;  %vm11973_vm8 = vcmp.lt.s32.totalorder %v9979_v31, 0  ;;  %v3273_v47 = vsub.s32 0, %v10186_v26  ;;  %v1687_v9 = vsel %vm1679_vm0, %v1666_v3, %v1669_v21 }
 0x2e8   : > { %v1684_v20 = vsel %vm1682_vm1, %v1672_v22, 2102212464  ;;  %v1688_v62 = vsel %vm1682_vm1, %v1675_v42, 920167782  ;;  %v1683_v37 = vsel %vm1679_vm0, %v1663_v27, %v1666_v3  ;;  %v1691_v2 = vsel %vm1679_vm0, %v1669_v21, %v1672_v22 }
 0x2e9   : > { %v1685_v33 = vsel %vm1681_vm9, %v1669_v21, %v1684_v20  ;;  %v1689_v8 = vsel %vm1681_vm9, %v1672_v22, %v1688_v62  ;;  %v3191_v50 = vsel %vm10160_vm6, %v9762_v1, %v3188_v40  ;;  %v7587_v18 = vmin.u32 %v3273_v47, %v10186_v26 }
 0x2ea   : > { %v1690_v10 = vsel %vm1680_vm7, %v1687_v9, %v1689_v8  ;;  %v1692_v25 = vsel %vm1682_vm1, %v1678_v29, 1326507024  ;;  %v1626_v27 = vmul.f32 %v1625_v15, %v1623_v5  ;;  %v1686_v21 = vsel %vm1680_vm7, %v1683_v37, %v1685_v33  ;;  %v10242_v9 = vpop.f32.mrf.mxu0 }
 0x2eb   : > { %v1693_v3 = vsel %vm1681_vm9, %v1675_v42, %v1692_v25  ;;  %v10216_v11 = vmul.u32.u64.low %v10154_v17, %v1690_v10  ;;  %v10217_v59 = vmul.u32.u64.high %v10154_v17, %v1690_v10, %v10216_v11  ;;  %v3275_v22 = vclz %v7587_v18  ;;  %12253 = vst [vmem:[#allocation103_spill] sm:$0xff] %v10242_v9 }
 0x2ec   : > { %v1694_v40 = vsel %vm1680_vm7, %v1691_v2, %v1693_v3  ;;  %v7590_v13 = vadd.s32 4294967169, %v3315_v28  ;;  %v12247_v29 = vsub.s32 4, %v10002_v14  ;;  %vm12248_vm1 = vcmp.lt.s32.totalorder %v9762_v1, 0 }
 0x2ed   : > { %7969 = vcosq.f32 %v3191_v50  ;;  %v10232_v42 = vmul.u32.u64.low %v10154_v17, %v1694_v40  ;;  %v10233_v5 = vmul.u32.u64.high %v10154_v17, %v1694_v40, %v10232_v42  ;;  %v12250_v47 = vsub.s32 4, %v10093_v45 }
 0x2ee   : > { %v10229_v15 = vsel %vm12248_vm1, %v12247_v29, %v10002_v14  ;;  %7971 = vsinq.f32 %v3191_v50  ;;  %vm12251_vm0 = vcmp.lt.s32.totalorder %v9899_v54, 0  ;;  %v7588_v28 = vadd.s32 4294967294, %v3275_v22 }
 0x2ef   : > { %12249 = vst [vmem:[#allocation101_spill] sm:$0xff] %v10229_v15  ;;  %v10240_v38 = vsel %vm12251_vm0, %v12250_v47, %v10093_v45  ;;  %v3321_v20 = vadd.s32 1, %v7590_v13  ;;  %v3293_v14 = vsub.s32 4, %v10171_v0  ;;  %v1702_v62 = vmul.u32 %v10154_v17, %v1686_v21 }
 0x2f0   : > { %12252 = vst [vmem:[#allocation102_spill] sm:$0xff] %v10240_v38  ;;  %v1705_v37 = vadd.s32 1, %v10217_v59  ;;  %v12254_v33 = vand.u32 2147483647, %v10143_v23  ;;  %v12255_v2 = vand.u32 2147483647, %v9899_v54  ;;  %v3263_v18 = vadd.s32 %v10116_v58, %v10138_v60 }
 0x2f1   : > { %v12256_v50 = vmov 0  ;;  %v1627_v45 = vxor.u32 2147483648, %v1626_v27  ;;  %vm7589_vm9 = vcmp.lt.s32.totalorder %v7588_v28, 0  ;;  %vm3322_vm1 = vcmp.gt.s32.totalorder %v3321_v20, 0 }
 0x2f2   : > { %v10249_v8 = vand.u32 8388607, %v12254_v33  ;;  %vm10253_vm7 = vcmp.le.f32.partialorder %v12255_v2, 0.7853982  ;;  %v3278_v10 = vsel %vm7589_vm9, 0, %v7588_v28  ;;  %vm1704_vm0 = vc.u32 %v10233_v5, %v10216_v11 }
 0x2f3   : > { %v12257_v50 = vsel %vm10253_vm7, 4294967295, %v12256_v50  ;;  %v3323_v17 = vsel %vm3322_vm1, %v3321_v20, 0  ;;  %v1754_v25 = vand.u32 2139095040, %v10242_v9  ;;  %v3279_v3 = vsub.s32 32, %v3278_v10 }
 0x2f4   : > { %12258 = vst [vmem:[#allocation104_spill] sm:$0xff] %v12257_v50  ;;  %v3283_v22 = vsub.s32 4294967266, %v3278_v10  ;;  %v1706_v21 = vsel %vm1704_vm0, %v1705_v37, %v10217_v59  ;;  %v10267_v13 = vsel %vm11973_vm8, %v3293_v14, %v10171_v0  ;;  %v3319_v60 = vor.u32 8388608, %v10249_v8 }
 0x2f5   : > { %12259 = vst [vmem:[#allocation105_spill] sm:$0xff] %v10267_v13  ;;  %v1707_v58 = vadd.s32 %v1706_v21, %v1702_v62  ;;  %v3325_v29 = vand.u32 31, %v3323_v17  ;;  %vm12260_vm9 = vcmp.lt.s32.totalorder %v9899_v54, 0  ;;  %v3280_v47 = vshll.u32 %v10186_v26, %v3278_v10 }
 0x2f6   : > { %v1628_v42 = vsel %vm12260_vm9, %v1627_v45, %v1626_v27  ;;  %v3281_v28 = vshrl.u32 %v3263_v18, %v3279_v3  ;;  %v3284_v20 = vadd.s32 127, %v3283_v22  ;;  %v3324_v59 = vshrl.u32 %v3323_v17, 5 }
 0x2f7   : > { %v1708_v33 = vadd.s32 536870912, %v1707_v58  ;;  %v3326_v37 = vsub.s32 32, %v3325_v29  ;;  %v1755_v2 = vshrl.u32 %v1754_v25, 23  ;;  %v3328_v1 = vshll.u32 %v12056_v34, %v3325_v29 }
 0x2f8   : > { %v3285_v40 = vshll.u32 %v3284_v20, 23  ;;  %v3331_v0 = vshll.u32 %v12050_v36, %v3325_v29  ;;  %v3337_v14 = vshll.u32 %v12051_v39, %v3325_v29  ;;  %v3334_v26 = vshll.u32 %v12043_v7, %v3325_v29 }
 0x2f9   : > { %v10276_v62 = vshrl.u32 %v1708_v33, 30  ;;  %v3329_v8 = vshrl.u32 %v12050_v36, %v3326_v37  ;;  %v3332_v27 = vshrl.u32 %v12043_v7, %v3326_v37  ;;  %v3282_v45 = vor.u32 %v3281_v28, %v3280_v47 }
 0x2fa   : > { %v3286_v18 = vor.u32 4788187, %v3285_v40  ;;  %v3335_v10 = vshrl.u32 %v12051_v39, %v3326_v37  ;;  %v3338_v17 = vshrl.u32 %v12038_v48, %v3326_v37  ;;  %v1631_v25 = vsel %vm10253_vm7, %v9899_v54, %v1628_v42  ;;  %v10288_v20 = vpop.eup %7969 }
 0x2fb   : > { %v1710_v3 = vshll.u32 %v10276_v62, 30  ;;  %v3327_v22 = vshrl.u32 %v12056_v34, %v3326_v37  ;;  %v7530_v21 = vadd.s32 4294967169, %v1755_v2  ;;  %12261 = vst [vmem:[#allocation106_spill] sm:$0xff] %v10288_v20  ;;  %v3330_v33 = vor.u32 %v3329_v8, %v3328_v1  ;;  %v10291_v47 = vpop.eup %7971 }
 0x2fc   : > { %v3333_v13 = vor.u32 %v3332_v27, %v3331_v0  ;;  %v3339_v53 = vor.u32 %v3338_v17, %v3337_v14  ;;  %v3340_v40 = vshll.u32 %v12038_v48, %v3325_v29  ;;  %12262 = vst [vmem:[#allocation107_spill] sm:$0xff] %v10291_v47  ;;  %v3336_v15 = vor.u32 %v3335_v10, %v3334_v26 }
 0x2fd   : > { %v10293_v28 = vsub.s32 %v1707_v58, %v1710_v3  ;;  %v3341_v50 = vshrl.u32 %v12039_v63, %v3326_v37  ;;  %vm3343_vm1 = vcmp.lt.s32.totalorder %v3324_v59, 1  ;;  %v3287_v42 = vand.u32 2147483647, %v3286_v18 }
 0x2fe   : > { %v3289_v54 = vcvt.s32.f32 %v3282_v45  ;;  %vm3345_vm0 = vcmp.lt.s32.totalorder %v3324_v59, 3  ;;  %vm3346_vm9 = vcmp.lt.s32.totalorder %v3324_v59, 4  ;;  %vm3344_vm8 = vcmp.lt.s32.totalorder %v3324_v59, 2 }
 0x2ff   : > { %v1713_v2 = vsub.s32 0, %v10293_v28  ;;  %v3342_v20 = vor.u32 %v3341_v50, %v3340_v40  ;;  %v3348_v1 = vsel %vm3346_vm9, %v3336_v15, 2102212464  ;;  %7973 = vcosq.f32 %v1631_v25 }
 0x300   : > { %v3351_v29 = vsel %vm3343_vm1, %v3330_v33, %v3333_v13  ;;  %v3352_v58 = vsel %vm3346_vm9, %v3339_v53, 920167782  ;;  %v3359_v0 = vshll.u32 %v3319_v60, 8  ;;  %v3355_v8 = vsel %vm3343_vm1, %v3333_v13, %v3336_v15 }
 0x301   : > { %v7527_v14 = vmin.u32 %v1713_v2, %v10293_v28  ;;  %v3353_v37 = vsel %vm3345_vm0, %v3336_v15, %v3352_v58  ;;  %v12263_v27 = vand.u32 2147483647, %v10242_v9  ;;  %v3347_v50 = vsel %vm3343_vm1, %v3327_v22, %v3330_v33 }
 0x302   : > { %v3349_v45 = vsel %vm3345_vm0, %v3333_v13, %v3348_v1  ;;  %v3354_v18 = vsel %vm3344_vm8, %v3351_v29, %v3353_v37  ;;  %v3356_v10 = vsel %vm3346_vm9, %v3342_v20, 1326507024  ;;  %v10311_v17 = vmul.f32 %v3289_v54, %v3287_v42  ;;  %v10323_v20 = vpop.f32.mrf.mxu1 }
 0x303   : > { %v10305_v26 = vand.u32 8388607, %v12263_v27  ;;  %v1715_v60 = vclz %v7527_v14  ;;  %v3357_v3 = vsel %vm3345_vm0, %v3339_v53, %v3356_v10  ;;  %v1761_v40 = vadd.s32 1, %v7530_v21  ;;  %12264 = vst [vmem:[#allocation108_spill] sm:$0xff] %v10323_v20 }
 0x304   : > { %7975 = vsinq.f32 %v1631_v25  ;;  %v3358_v15 = vsel %vm3344_vm8, %v3355_v8, %v3357_v3  ;;  %v10315_v2 = vmul.u32.u64.low %v3359_v0, %v3354_v18  ;;  %v10316_v58 = vmul.u32.u64.high %v3359_v0, %v3354_v18, %v10315_v2 }
 0x305   : > { %v7528_v22 = vadd.s32 4294967294, %v1715_v60  ;;  %v3350_v13 = vsel %vm3344_vm8, %v3347_v50, %v3349_v45  ;;  %v10320_v33 = vmul.u32.u64.low %v3359_v0, %v3358_v15  ;;  %v10321_v1 = vmul.u32.u64.high %v3359_v0, %v3358_v15, %v10320_v33 }
 0x306   : > { %v1703_v54 = vadd.s32 %v10216_v11, %v10233_v5  ;;  %v1759_v53 = vor.u32 8388608, %v10305_v26  ;;  %vm1762_vm1 = vcmp.gt.s32.totalorder %v1761_v40, 0  ;;  %v3291_v21 = vxor.u32 2147483648, %v10311_v17 }
 0x307   : > { %vm7529_vm0 = vcmp.lt.s32.totalorder %v7528_v22, 0  ;;  %v1763_v59 = vsel %vm1762_vm1, %v1761_v40, 0  ;;  %v3366_v14 = vmul.u32 %v3359_v0, %v3350_v13  ;;  %v3369_v37 = vadd.s32 1, %v10316_v58 }
 0x308   : > { %v1718_v29 = vsel %vm7529_vm0, 0, %v7528_v22  ;;  %v1765_v8 = vand.u32 31, %v1763_v59  ;;  %v10333_v5 = vshrl.u32 %v1763_v59, 5  ;;  %vm3368_vm8 = vc.u32 %v10321_v1, %v10315_v2 }
 0x309   : > { %v1719_v27 = vsub.s32 32, %v1718_v29  ;;  %v1720_v50 = vshll.u32 %v10293_v28, %v1718_v29  ;;  %v1723_v11 = vsub.s32 4294967266, %v1718_v29  ;;  %v3370_v0 = vsel %vm3368_vm8, %v3369_v37, %v10316_v58 }
 0x30a   : > { %v1766_v26 = vsub.s32 32, %v1765_v8  ;;  %v1768_v45 = vshll.u32 %v12056_v34, %v1765_v8  ;;  %v1771_v18 = vshll.u32 %v12050_v36, %v1765_v8  ;;  %v1774_v3 = vshll.u32 %v12043_v7, %v1765_v8 }
 0x30b   : > { %v1721_v10 = vshrl.u32 %v1703_v54, %v1719_v27  ;;  %v1724_v60 = vadd.s32 127, %v1723_v11  ;;  %v12265_v40 = vand.u32 2147483647, %v9979_v31  ;;  %v12266_v28 = vmov 0 }
 0x30c   : > { %v3371_v15 = vadd.s32 %v3370_v0, %v3366_v14  ;;  %v1767_v22 = vshrl.u32 %v12056_v34, %v1766_v26  ;;  %v1769_v13 = vshrl.u32 %v12050_v36, %v1766_v26  ;;  %v1772_v33 = vshrl.u32 %v12043_v7, %v1766_v26  ;;  %v10350_v59 = vpop.eup %7973 }
 0x30d   : > { %vm10343_vm9 = vcmp.le.f32.partialorder %v12265_v40, 0.7853982  ;;  %12269 = vst [vmem:[#allocation110_spill] sm:$0xff] %v10350_v59  ;;  %v1722_v58 = vor.u32 %v1721_v10, %v1720_v50  ;;  %v1725_v54 = vshll.u32 %v1724_v60, 23  ;;  %v1775_v29 = vshrl.u32 %v12051_v39, %v1766_v26 }
 0x30e   : > { %v12267_v28 = vsel %vm10343_vm9, 4294967295, %v12266_v28  ;;  %v1777_v37 = vshll.u32 %v12051_v39, %v1765_v8  ;;  %v3372_v27 = vadd.s32 536870912, %v3371_v15  ;;  %v1770_v11 = vor.u32 %v1769_v13, %v1768_v45 }
 0x30f   : > { %12268 = vst [vmem:[#allocation109_spill] sm:$0xff] %v12267_v28  ;;  %v1773_v40 = vor.u32 %v1772_v33, %v1771_v18  ;;  %v1778_v14 = vshrl.u32 %v12038_v48, %v1766_v26  ;;  %v1726_v0 = vor.u32 4788187, %v1725_v54  ;;  %v1729_v42 = vcvt.s32.f32 %v1722_v58 }
 0x310   : > { %v1776_v25 = vor.u32 %v1775_v29, %v1774_v3  ;;  %v1780_v47 = vshll.u32 %v12038_v48, %v1765_v8  ;;  %v12270_v59 = vand.u32 2147483647, %v10054_v61  ;;  %v12271_v38 = vmov 0 }
 0x311   : > { %v3373_v50 = vshrl.u32 %v3372_v27, 30  ;;  %v1779_v10 = vor.u32 %v1778_v14, %v1777_v37  ;;  %v1781_v60 = vshrl.u32 %v12039_v63, %v1766_v26  ;;  %vm1783_vm8 = vcmp.lt.s32.totalorder %v10333_v5, 1  ;;  %v10365_v45 = vpop.eup %7975 }
 0x312   : > { %vm10359_vm0 = vcmp.le.f32.partialorder %v12270_v59, 0.7853982  ;;  %12274 = vst [vmem:[#allocation112_spill] sm:$0xff] %v10365_v45  ;;  %v1727_v18 = vand.u32 2147483647, %v1726_v0  ;;  %vm11980_vm6 = vcmp.lt.s32.totalorder %v10333_v5, 4  ;;  %v1791_v58 = vsel %vm1783_vm8, %v1770_v11, %v1773_v40 }
 0x313   : > { %v12272_v38 = vsel %vm10359_vm0, 4294967295, %v12271_v38  ;;  %v1799_v8 = vshll.u32 %v1759_v53, 8  ;;  %v3374_v3 = vshll.u32 %v3373_v50, 30  ;;  %v1782_v13 = vor.u32 %v1781_v60, %v1780_v47 }
 0x314   : > { %12273 = vst [vmem:[#allocation111_spill] sm:$0xff] %v12272_v38  ;;  %v3418_v33 = vand.u32 2139095040, %v10323_v20  ;;  %v1730_v59 = vmul.f32 %v1729_v42, %v1727_v18  ;;  %v1788_v26 = vsel %vm11980_vm6, %v1776_v25, 2102212464  ;;  %v1792_v54 = vsel %vm11980_vm6, %v1779_v10, 920167782 }
 0x315   : > { %vm12275_vm1 = vcmp.lt.s32.totalorder %v9979_v31, 0  ;;  %vm3313_vm11 = vcmp.lt.s32.totalorder %v10143_v23, 0  ;;  %v10381_v47 = vsub.s32 %v3371_v15, %v3374_v3  ;;  %v1787_v42 = vsel %vm1783_vm8, %v1767_v22, %v1770_v11 }
 0x316   : > { %v3292_v53 = vsel %vm12275_vm1, %v3291_v21, %v10311_v17  ;;  %vm12276_vm7 = vcmp.lt.s32.totalorder %v10333_v5, 3  ;;  %v1731_v37 = vxor.u32 2147483648, %v1730_v59  ;;  %vm12278_vm6 = vcmp.lt.s32.totalorder %v10333_v5, 2 }
 0x317   : > { %v1793_v29 = vsel %vm12276_vm7, %v1776_v25, %v1792_v54  ;;  %vm12277_vm14 = vmmov %vm12276_vm7  ;;  %v1795_v17 = vsel %vm1783_vm8, %v1773_v40, %v1776_v25  ;;  %v3377_v21 = vsub.s32 0, %v10381_v47  ;;  %vm12279_vm1 = vcmp.lt.s32.totalorder %v10333_v5, 4 }
 0x318   : > { %v1789_v27 = vsel %vm12277_vm14, %v1773_v40, %v1788_v26  ;;  %v1794_v14 = vsel %vm12278_vm6, %v1791_v58, %v1793_v29  ;;  %v1796_v15 = vsel %vm12279_vm1, %v1782_v13, 1326507024  ;;  %v3295_v11 = vsel %vm10343_vm9, %v9979_v31, %v3292_v53  ;;  %vm12280_vm14 = vmmov %vm12276_vm7 }
 0x319   : > { %v10396_v0 = vmul.u32.u64.low %v1799_v8, %v1794_v14  ;;  %v10397_v22 = vmul.u32.u64.high %v1799_v8, %v1794_v14, %v10396_v0  ;;  %v1797_v60 = vsel %vm12280_vm14, %v1779_v10, %v1796_v15  ;;  %v3419_v18 = vshrl.u32 %v3418_v33, 23 }
 0x31a   : > { %v12281_v3 = vand.u32 2147483647, %v10323_v20  ;;  %vm12282_vm6 = vcmp.lt.s32.totalorder %v10054_v61, 0  ;;  %v7591_v13 = vmin.u32 %v3377_v21, %v10381_v47  ;;  %vm12283_vm7 = vcmp.lt.s32.totalorder %v10333_v5, 2  ;;  %v10430_v21 = vpop.f32.mrf.mxu0 }
 0x31b   : > { %v1732_v40 = vsel %vm12282_vm6, %v1731_v37, %v1730_v59  ;;  %v1790_v26 = vsel %vm12283_vm7, %v1787_v42, %v1789_v27  ;;  %vm12284_vm8 = vmmov %vm12283_vm7  ;;  %v3397_v54 = vsub.s32 4, %v3373_v50  ;;  %v7594_v10 = vadd.s32 4294967169, %v3419_v18 }
 0x31c   : > { %v3422_v25 = vand.u32 8388607, %v12281_v3  ;;  %v1798_v58 = vsel %vm12284_vm8, %v1795_v17, %v1797_v60  ;;  %7977 = vcosq.f32 %v3295_v11  ;;  %v12285_v33 = vsub.s32 4, %v10276_v62  ;;  %vm12286_vm1 = vmmov %vm12282_vm6 }
 0x31d   : > { %v10414_v53 = vmul.u32.u64.low %v1799_v8, %v1798_v58  ;;  %v10415_v29 = vmul.u32.u64.high %v1799_v8, %v1798_v58, %v10414_v53  ;;  %v3379_v37 = vclz %v7591_v13  ;;  %v1809_v14 = vadd.s32 1, %v10397_v22 }
 0x31e   : > { %v10422_v59 = vsel %vm12286_vm1, %v12285_v33, %v10276_v62  ;;  %v10428_v5 = vsel %vm10359_vm0, %v10054_v61, %v1732_v40  ;;  %v1806_v42 = vmul.u32 %v1799_v8, %v1790_v26  ;;  %v3423_v27 = vor.u32 8388608, %v3422_v25 }
 0x31f   : > { %12287 = vst [vmem:[#allocation113_spill] sm:$0xff] %v10422_v59  ;;  %v3425_v17 = vadd.s32 1, %v7594_v10  ;;  %7979 = vsinq.f32 %v3295_v11  ;;  %v7592_v15 = vadd.s32 4294967294, %v3379_v37  ;;  %v1858_v62 = vand.u32 2139095040, %v10430_v21 }
 0x320   : > { %v3367_v18 = vadd.s32 %v10315_v2, %v10321_v1  ;;  %v10438_v3 = vsel %vm3313_vm11, %v3397_v54, %v3373_v50  ;;  %vm1808_vm14 = vc.u32 %v10415_v29, %v10396_v0  ;;  %7981 = vcosq.f32 %v10428_v5 }
 0x321   : > { %12288 = vst [vmem:[#allocation114_spill] sm:$0xff] %v10438_v3  ;;  %vm3426_vm6 = vcmp.gt.s32.totalorder %v3425_v17, 0  ;;  %vm7593_vm7 = vcmp.lt.s32.totalorder %v7592_v15, 0  ;;  %v1810_v8 = vsel %vm1808_vm14, %v1809_v14, %v10397_v22  ;;  %v10444_v26 = vshll.u32 %v3423_v27, 8 }
 0x322   : > { %v3427_v11 = vsel %vm3426_vm6, %v3425_v17, 0  ;;  %v3382_v25 = vsel %vm7593_vm7, 0, %v7592_v15  ;;  %v1811_v40 = vadd.s32 %v1810_v8, %v1806_v42  ;;  %v1859_v58 = vshrl.u32 %v1858_v62, 23 }
 0x323   : > { %v3429_v13 = vand.u32 31, %v3427_v11  ;;  %v3383_v2 = vsub.s32 32, %v3382_v25  ;;  %v3384_v1 = vshll.u32 %v10381_v47, %v3382_v25  ;;  %v3387_v50 = vsub.s32 4294967266, %v3382_v25 }
 0x324   : > { %v1812_v54 = vadd.s32 536870912, %v1811_v40  ;;  %v3428_v53 = vshrl.u32 %v3427_v11, 5  ;;  %vm11990_vm8 = vcmp.lt.s32.totalorder %v10242_v9, 0  ;;  %7983 = vsinq.f32 %v10428_v5 }
 0x325   : > { %v3430_v10 = vsub.s32 32, %v3429_v13  ;;  %v3432_v33 = vshll.u32 %v12056_v34, %v3429_v13  ;;  %v3385_v37 = vshrl.u32 %v3367_v18, %v3383_v2  ;;  %v3388_v60 = vadd.s32 127, %v3387_v50 }
 0x326   : > { %v3435_v22 = vshll.u32 %v12050_v36, %v3429_v13  ;;  %v3441_v14 = vshll.u32 %v12051_v39, %v3429_v13  ;;  %v1813_v42 = vshrl.u32 %v1812_v54, 30  ;;  %v3438_v47 = vshll.u32 %v12043_v7, %v3429_v13 }
 0x327   : > { %v3433_v27 = vshrl.u32 %v12050_v36, %v3430_v10  ;;  %v3436_v17 = vshrl.u32 %v12043_v7, %v3430_v10  ;;  %v3386_v15 = vor.u32 %v3385_v37, %v3384_v1  ;;  %v3389_v62 = vshll.u32 %v3388_v60, 23 }
 0x328   : > { %v3439_v8 = vshrl.u32 %v12051_v39, %v3430_v10  ;;  %v3442_v11 = vshrl.u32 %v12038_v48, %v3430_v10  ;;  %v1814_v25 = vshll.u32 %v1813_v42, 30  ;;  %v7534_v2 = vadd.s32 4294967169, %v1859_v58 }
 0x329   : > { %v3434_v18 = vor.u32 %v3433_v27, %v3432_v33  ;;  %v12289_v50 = vand.u32 2147483647, %v10430_v21  ;;  %v3390_v54 = vor.u32 4788187, %v3389_v62  ;;  %v3393_v61 = vcvt.s32.f32 %v3386_v15  ;;  %v10459_v31 = vpop.eup %7977 }
 0x32a   : > { %v3437_v38 = vor.u32 %v3436_v17, %v3435_v22  ;;  %v3443_v59 = vor.u32 %v3442_v11, %v3441_v14  ;;  %12290 = vst [vmem:[#allocation115_spill] sm:$0xff] %v10459_v31  ;;  %v10461_v28 = vsub.s32 %v1811_v40, %v1814_v25  ;;  %v3440_v60 = vor.u32 %v3439_v8, %v3438_v47 }
 0x32b   : > { %v10457_v3 = vand.u32 8388607, %v12289_v50  ;;  %v3444_v1 = vshll.u32 %v12038_v48, %v3429_v13  ;;  %v3445_v37 = vshrl.u32 %v12039_v63, %v3430_v10  ;;  %v3391_v45 = vand.u32 2147483647, %v3390_v54 }
 0x32c   : > { %v3431_v58 = vshrl.u32 %v12056_v34, %v3430_v10  ;;  %vm3447_vm1 = vcmp.lt.s32.totalorder %v3428_v53, 1  ;;  %vm3449_vm14 = vcmp.lt.s32.totalorder %v3428_v53, 3  ;;  %v10467_v33 = vpop.eup %7979  ;;  %v1817_v22 = vsub.s32 0, %v10461_v28 }
 0x32d   : > { %12291 = vst [vmem:[#allocation116_spill] sm:$0xff] %v10467_v33  ;;  %v3446_v14 = vor.u32 %v3445_v37, %v3444_v1  ;;  %vm3448_vm6 = vcmp.lt.s32.totalorder %v3428_v53, 2  ;;  %vm3450_vm7 = vcmp.lt.s32.totalorder %v3428_v53, 4  ;;  %v3394_v40 = vmul.f32 %v3393_v61, %v3391_v45  ;;  %v10471_v47 = vpop.eup %7981 }
 0x32e   : > { %v3452_v27 = vsel %vm3450_vm7, %v3440_v60, 2102212464  ;;  %v3455_v13 = vsel %vm3447_vm1, %v3434_v18, %v3437_v38  ;;  %v3456_v17 = vsel %vm3450_vm7, %v3443_v59, 920167782  ;;  %12292 = vst [vmem:[#allocation117_spill] sm:$0xff] %v10471_v47  ;;  %v7531_v15 = vmin.u32 %v1817_v22, %v10461_v28 }
 0x32f   : > { %v1837_v62 = vsub.s32 4, %v1813_v42  ;;  %v3457_v10 = vsel %vm3449_vm14, %v3440_v60, %v3456_v17  ;;  %v3459_v8 = vsel %vm3447_vm1, %v3437_v38, %v3440_v60  ;;  %v3451_v11 = vsel %vm3447_vm1, %v3431_v58, %v3434_v18 }
 0x330   : > { %v3453_v25 = vsel %vm3449_vm14, %v3437_v38, %v3452_v27  ;;  %v3458_v50 = vsel %vm3448_vm6, %v3455_v13, %v3457_v10  ;;  %v3460_v61 = vsel %vm3450_vm7, %v3446_v14, 1326507024  ;;  %v1819_v45 = vclz %v7531_v15  ;;  %v10492_v27 = vpop.f32.mrf.mxu0 }
 0x331   : > { %v3461_v54 = vsel %vm3449_vm14, %v3443_v59, %v3460_v61  ;;  %v10481_v1 = vmul.u32.u64.low %v10444_v26, %v3458_v50  ;;  %v10482_v37 = vmul.u32.u64.high %v10444_v26, %v3458_v50, %v10481_v1  ;;  %v3395_v22 = vxor.u32 2147483648, %v3394_v40 }
 0x332   : > { %v3462_v60 = vsel %vm3448_vm6, %v3459_v8, %v3461_v54  ;;  %v1865_v17 = vadd.s32 1, %v7534_v2  ;;  %v7532_v18 = vadd.s32 4294967294, %v1819_v45  ;;  %v3454_v38 = vsel %vm3448_vm6, %v3451_v11, %v3453_v25 }
 0x333   : > { %v10489_v58 = vmul.u32.u64.low %v10444_v26, %v3462_v60  ;;  %v10490_v14 = vmul.u32.u64.high %v10444_v26, %v3462_v60, %v10489_v58  ;;  %v1807_v59 = vadd.s32 %v10396_v0, %v10415_v29  ;;  %v1863_v13 = vor.u32 8388608, %v10457_v3 }
 0x334   : > { %vm1866_vm1 = vcmp.gt.s32.totalorder %v1865_v17, 0  ;;  %vm7533_vm14 = vcmp.lt.s32.totalorder %v7532_v18, 0  ;;  %v10500_v2 = vsel %vm11990_vm8, %v1837_v62, %v1813_v42  ;;  %v3473_v53 = vadd.s32 1, %v10482_v37 }
 0x335   : > { %12293 = vst [vmem:[#allocation118_spill] sm:$0xff] %v10500_v2  ;;  %v1867_v15 = vsel %vm1866_vm1, %v1865_v17, 0  ;;  %v3396_v10 = vsel %vm3313_vm11, %v3395_v22, %v3394_v40  ;;  %v1822_v8 = vsel %vm7533_vm14, 0, %v7532_v18  ;;  %v3470_v11 = vmul.u32 %v10444_v26, %v3454_v38 }
 0x336   : > { %v1869_v0 = vand.u32 31, %v1867_v15  ;;  %v12294_v29 = vand.u32 2147483647, %v10143_v23  ;;  %v12295_v3 = vmov 0  ;;  %v1823_v25 = vsub.s32 32, %v1822_v8 }
 0x337   : > { %v1824_v42 = vshll.u32 %v10461_v28, %v1822_v8  ;;  %v1827_v62 = vsub.s32 4294967266, %v1822_v8  ;;  %v10513_v50 = vshrl.u32 %v1867_v15, 5  ;;  %vm3472_vm7 = vc.u32 %v10490_v14, %v10481_v1 }
 0x338   : > { %vm10508_vm6 = vcmp.le.f32.partialorder %v12294_v29, 0.7853982  ;;  %v1870_v40 = vsub.s32 32, %v1869_v0  ;;  %v1872_v61 = vshll.u32 %v12056_v34, %v1869_v0  ;;  %v1875_v26 = vshll.u32 %v12050_v36, %v1869_v0 }
 0x339   : > { %v12296_v3 = vsel %vm10508_vm6, 4294967295, %v12295_v3  ;;  %v1825_v45 = vshrl.u32 %v1807_v59, %v1823_v25  ;;  %v1828_v54 = vadd.s32 127, %v1827_v62  ;;  %v3474_v22 = vsel %vm3472_vm7, %v3473_v53, %v10482_v37 }
 0x33a   : > { %12297 = vst [vmem:[#allocation119_spill] sm:$0xff] %v12296_v3  ;;  %v1878_v60 = vshll.u32 %v12043_v7, %v1869_v0  ;;  %v3475_v17 = vadd.s32 %v3474_v22, %v3470_v11  ;;  %v1871_v28 = vshrl.u32 %v12056_v34, %v1870_v40  ;;  %v1873_v18 = vshrl.u32 %v12050_v36, %v1870_v40 }
 0x33b   : > { %v1876_v38 = vshrl.u32 %v12043_v7, %v1870_v40  ;;  %v1826_v58 = vor.u32 %v1825_v45, %v1824_v42  ;;  %v1829_v15 = vshll.u32 %v1828_v54, 23  ;;  %v1879_v8 = vshrl.u32 %v12051_v39, %v1870_v40 }
 0x33c   : > { %v1881_v29 = vshll.u32 %v12051_v39, %v1869_v0  ;;  %v12298_v59 = vand.u32 2147483647, %v10242_v9  ;;  %v12299_v25 = vmov 0  ;;  %v3476_v37 = vadd.s32 536870912, %v3475_v17 }
 0x33d   : > { %v1874_v53 = vor.u32 %v1873_v18, %v1872_v61  ;;  %v1877_v11 = vor.u32 %v1876_v38, %v1875_v26  ;;  %v1882_v62 = vshrl.u32 %v12038_v48, %v1870_v40  ;;  %v1830_v22 = vor.u32 4788187, %v1829_v15 }
 0x33e   : > { %vm10528_vm11 = vcmp.le.f32.partialorder %v12298_v59, 0.7853982  ;;  %v1833_v5 = vcvt.s32.f32 %v1826_v58  ;;  %v1880_v2 = vor.u32 %v1879_v8, %v1878_v60  ;;  %v1884_v42 = vshll.u32 %v12038_v48, %v1869_v0  ;;  %v10536_v59 = vpop.eup %7983 }
 0x33f   : > { %v12300_v25 = vsel %vm10528_vm11, 4294967295, %v12299_v25  ;;  %v3477_v45 = vshrl.u32 %v3476_v37, 30  ;;  %v1883_v54 = vor.u32 %v1882_v62, %v1881_v29  ;;  %v1885_v47 = vshrl.u32 %v12039_v63, %v1870_v40  ;;  %12302 = vst [vmem:[#allocation121_spill] sm:$0xff] %v10536_v59 }
 0x340   : > { %12301 = vst [vmem:[#allocation120_spill] sm:$0xff] %v12300_v25  ;;  %vm1887_vm1 = vcmp.lt.s32.totalorder %v10513_v50, 1  ;;  %v1831_v31 = vand.u32 2147483647, %v1830_v22  ;;  %vm1889_vm14 = vcmp.lt.s32.totalorder %v10513_v50, 3  ;;  %vm1890_vm7 = vcmp.lt.s32.totalorder %v10513_v50, 4 }
 0x341   : > { %v1903_v61 = vshll.u32 %v1863_v13, 8  ;;  %v3478_v26 = vshll.u32 %v3477_v45, 30  ;;  %v1886_v18 = vor.u32 %v1885_v47, %v1884_v42  ;;  %vm1888_vm8 = vcmp.lt.s32.totalorder %v10513_v50, 2 }
 0x342   : > { %v1962_v0 = vand.u32 2139095040, %v10492_v27  ;;  %v1834_v60 = vmul.f32 %v1833_v5, %v1831_v31  ;;  %v1892_v40 = vsel %vm1890_vm7, %v1880_v2, 2102212464  ;;  %v1895_v38 = vsel %vm1887_vm1, %v1874_v53, %v1877_v11 }
 0x343   : > { %v1896_v58 = vsel %vm1890_vm7, %v1883_v54, 920167782  ;;  %v3399_v47 = vsel %vm10508_vm6, %v10143_v23, %v3396_v10  ;;  %v10552_v13 = vsub.s32 %v3475_v17, %v3478_v26  ;;  %v1891_v31 = vsel %vm1887_vm1, %v1871_v28, %v1874_v53 }
 0x344   : > { %v1897_v5 = vsel %vm1889_vm14, %v1880_v2, %v1896_v58  ;;  %v1835_v15 = vxor.u32 2147483648, %v1834_v60  ;;  %v1893_v8 = vsel %vm1889_vm14, %v1877_v11, %v1892_v40  ;;  %v1899_v37 = vsel %vm1887_vm1, %v1877_v11, %v1880_v2 }
 0x345   : > { %v1898_v29 = vsel %vm1888_vm8, %v1895_v38, %v1897_v5  ;;  %v3481_v10 = vsub.s32 0, %v10552_v13  ;;  %v1900_v17 = vsel %vm1890_vm7, %v1886_v18, 1326507024  ;;  %vm12303_vm0 = vcmp.lt.s32.totalorder %v10242_v9, 0 }
 0x346   : > { %v10567_v62 = vmul.u32.u64.low %v1903_v61, %v1898_v29  ;;  %v10568_v28 = vmul.u32.u64.high %v1903_v61, %v1898_v29, %v10567_v62  ;;  %v1836_v53 = vsel %vm12303_vm0, %v1835_v15, %v1834_v60  ;;  %v3501_v22 = vsub.s32 4, %v3477_v45 }
 0x347   : > { %v1901_v42 = vsel %vm1889_vm14, %v1883_v54, %v1900_v17  ;;  %v1963_v26 = vshrl.u32 %v1962_v0, 23  ;;  %v7595_v40 = vmin.u32 %v3481_v10, %v10552_v13  ;;  %v1894_v2 = vsel %vm1888_vm8, %v1891_v31, %v1893_v8  ;;  %v10589_v31 = vpop.f32.mrf.mxu1 }
 0x348   : > { %v1902_v11 = vsel %vm1888_vm8, %v1899_v37, %v1901_v42  ;;  %v12304_v18 = vand.u32 2147483647, %v10492_v27  ;;  %v1839_v60 = vsel %vm10528_vm11, %v10242_v9, %v1836_v53  ;;  %7985 = vcosq.f32 %v3399_v47 }
 0x349   : > { %v10585_v58 = vmul.u32.u64.low %v1903_v61, %v1902_v11  ;;  %v10586_v5 = vmul.u32.u64.high %v1903_v61, %v1902_v11, %v10585_v58  ;;  %v7538_v54 = vadd.s32 4294967169, %v1963_v26  ;;  %v3483_v0 = vclz %v7595_v40  ;;  %v10604_v42 = vpop.f32.mrf.mxu1 }
 0x34a   : > { %v1966_v38 = vand.u32 8388607, %v12304_v18  ;;  %v1913_v15 = vadd.s32 1, %v10568_v28  ;;  %7987 = vsinq.f32 %v3399_v47  ;;  %v3471_v50 = vadd.s32 %v10481_v1, %v10490_v14  ;;  %12307 = vst [vmem:[#allocation123_spill] sm:$0xff] %v10604_v42 }
 0x34b   : > { %v1910_v8 = vmul.u32 %v1903_v61, %v1894_v2  ;;  %v1969_v37 = vadd.s32 1, %v7538_v54  ;;  %7989 = vcosq.f32 %v1839_v60  ;;  %v7596_v10 = vadd.s32 4294967294, %v3483_v0 }
 0x34c   : > { %v1967_v29 = vor.u32 8388608, %v1966_v38  ;;  %vm12305_vm0 = vcmp.lt.s32.totalorder %v10323_v20, 0  ;;  %v3522_v53 = vand.u32 2139095040, %v10589_v31  ;;  %7991 = vsinq.f32 %v1839_v60 }
 0x34d   : > { %v10595_v17 = vsel %vm12305_vm0, %v3501_v22, %v3477_v45  ;;  %vm1912_vm8 = vc.u32 %v10586_v5, %v10567_v62  ;;  %vm1970_vm1 = vcmp.gt.s32.totalorder %v1969_v37, 0  ;;  %vm7597_vm14 = vcmp.lt.s32.totalorder %v7596_v10, 0 }
 0x34e   : > { %12306 = vst [vmem:[#allocation122_spill] sm:$0xff] %v10595_v17  ;;  %v1914_v1 = vsel %vm1912_vm8, %v1913_v15, %v10568_v28  ;;  %v1971_v14 = vsel %vm1970_vm1, %v1969_v37, 0  ;;  %v10602_v61 = vshll.u32 %v1967_v29, 8  ;;  %v3486_v26 = vsel %vm7597_vm14, 0, %v7596_v10 }
 0x34f   : > { %v1915_v45 = vadd.s32 %v1914_v1, %v1910_v8  ;;  %v1973_v22 = vand.u32 31, %v1971_v14  ;;  %v3487_v2 = vsub.s32 32, %v3486_v26  ;;  %v3488_v11 = vshll.u32 %v10552_v13, %v3486_v26 }
 0x350   : > { %v3491_v18 = vsub.s32 4294967266, %v3486_v26  ;;  %v3523_v38 = vshrl.u32 %v3522_v53, 23  ;;  %v1972_v58 = vshrl.u32 %v1971_v14, 5  ;;  %v12308_v53 = vand.u32 2147483647, %v10323_v20 }
 0x351   : > { %v1916_v60 = vadd.s32 536870912, %v1915_v45  ;;  %v1974_v54 = vsub.s32 32, %v1973_v22  ;;  %v1976_v28 = vshll.u32 %v12056_v34, %v1973_v22  ;;  %v3489_v0 = vshrl.u32 %v3471_v50, %v3487_v2 }
 0x352   : > { %v3492_v15 = vadd.s32 127, %v3491_v18  ;;  %v1979_v29 = vshll.u32 %v12050_v36, %v1973_v22  ;;  %v1985_v37 = vshll.u32 %v12051_v39, %v1973_v22  ;;  %v1982_v13 = vshll.u32 %v12043_v7, %v1973_v22 }
 0x353   : > { %v1917_v8 = vshrl.u32 %v1916_v60, 30  ;;  %v1977_v10 = vshrl.u32 %v12050_v36, %v1974_v54  ;;  %v1980_v1 = vshrl.u32 %v12043_v7, %v1974_v54  ;;  %vm10616_vm7 = vcmp.le.f32.partialorder %v12308_v53, 0.7853982 }
 0x354   : > { %v12309_v14 = vmov 0  ;;  %v3490_v26 = vor.u32 %v3489_v0, %v3488_v11  ;;  %v3493_v50 = vshll.u32 %v3492_v15, 23  ;;  %v1983_v2 = vshrl.u32 %v12051_v39, %v1974_v54 }
 0x355   : > { %v12310_v14 = vsel %vm10616_vm7, 4294967295, %v12309_v14  ;;  %v1986_v18 = vshrl.u32 %v12038_v48, %v1974_v54  ;;  %v1918_v40 = vshll.u32 %v1917_v8, 30  ;;  %v1975_v60 = vshrl.u32 %v12056_v34, %v1974_v54  ;;  %v10623_v59 = vpop.eup %7985 }
 0x356   : > { %12311 = vst [vmem:[#allocation124_spill] sm:$0xff] %v12310_v14  ;;  %v1978_v47 = vor.u32 %v1977_v10, %v1976_v28  ;;  %v7598_v17 = vadd.s32 4294967169, %v3523_v38  ;;  %v3494_v23 = vor.u32 4788187, %v3493_v50  ;;  %v3497_v3 = vcvt.s32.f32 %v3490_v26  ;;  %12312 = vst [vmem:[#allocation125_spill] sm:$0xff] %v10623_v59 }
 0x357   : > { %v1981_v9 = vor.u32 %v1980_v1, %v1979_v29  ;;  %v1987_v25 = vor.u32 %v1986_v18, %v1985_v37  ;;  %v10626_v53 = vsub.s32 %v1915_v45, %v1918_v40  ;;  %v1984_v11 = vor.u32 %v1983_v2, %v1982_v13  ;;  %v10630_v33 = vpop.eup %7987 }
 0x358   : > { %v1988_v0 = vshll.u32 %v12038_v48, %v1973_v22  ;;  %v1989_v15 = vshrl.u32 %v12039_v63, %v1974_v54  ;;  %12313 = vst [vmem:[#allocation126_spill] sm:$0xff] %v10630_v33  ;;  %v3495_v49 = vand.u32 2147483647, %v3494_v23  ;;  %vm1991_vm8 = vcmp.lt.s32.totalorder %v1972_v58, 1  ;;  %v10632_v38 = vpop.eup %7989 }
 0x359   : > { %vm1992_vm1 = vcmp.lt.s32.totalorder %v1972_v58, 2  ;;  %vm1993_vm14 = vcmp.lt.s32.totalorder %v1972_v58, 3  ;;  %v1921_v28 = vsub.s32 0, %v10626_v53  ;;  %vm1994_vm6 = vcmp.lt.s32.totalorder %v1972_v58, 4  ;;  %v10636_v40 = vpop.eup %7991 }
 0x35a   : > { %v1990_v29 = vor.u32 %v1989_v15, %v1988_v0  ;;  %v1995_v45 = vsel %vm1991_vm8, %v1975_v60, %v1978_v47  ;;  %v3498_v37 = vmul.f32 %v3497_v3, %v3495_v49  ;;  %v1996_v22 = vsel %vm1994_vm6, %v1984_v11, 2102212464 }
 0x35b   : > { %v1999_v54 = vsel %vm1991_vm8, %v1978_v47, %v1981_v9  ;;  %v2000_v10 = vsel %vm1994_vm6, %v1987_v25, 920167782  ;;  %v7535_v23 = vmin.u32 %v1921_v28, %v10626_v53  ;;  %v1997_v1 = vsel %vm1993_vm14, %v1981_v9, %v1996_v22 }
 0x35c   : > { %v2001_v13 = vsel %vm1993_vm14, %v1984_v11, %v2000_v10  ;;  %v2003_v26 = vsel %vm1991_vm8, %v1981_v9, %v1984_v11  ;;  %v3499_v50 = vxor.u32 2147483648, %v3498_v37  ;;  %v1941_v2 = vsub.s32 4, %v1917_v8 }
 0x35d   : > { %v2002_v18 = vsel %vm1992_vm1, %v1999_v54, %v2001_v13  ;;  %v2004_v60 = vsel %vm1994_vm6, %v1990_v29, 1326507024  ;;  %v1923_v0 = vclz %v7535_v23  ;;  %v1998_v28 = vsel %vm1992_vm1, %v1995_v45, %v1997_v1 }
 0x35e   : > { %v2005_v49 = vsel %vm1993_vm14, %v1987_v25, %v2004_v60  ;;  %v10646_v3 = vmul.u32.u64.low %v10602_v61, %v2002_v18  ;;  %v10647_v47 = vmul.u32.u64.high %v10602_v61, %v2002_v18, %v10646_v3  ;;  %v3500_v15 = vsel %vm12305_vm0, %v3499_v50, %v3498_v37 }
 0x35f   : > { %v2006_v22 = vsel %vm1992_vm1, %v2003_v26, %v2005_v49  ;;  %v12314_v9 = vand.u32 2147483647, %v10589_v31  ;;  %v3503_v29 = vsel %vm10616_vm7, %v10323_v20, %v3500_v15  ;;  %v7536_v54 = vadd.s32 4294967294, %v1923_v0 }
 0x360   : > { %v10659_v25 = vmul.u32.u64.low %v10602_v61, %v2006_v22  ;;  %v10660_v10 = vmul.u32.u64.high %v10602_v61, %v2006_v22, %v10659_v25  ;;  %v1911_v23 = vadd.s32 %v10567_v62, %v10586_v5  ;;  %vm12315_vm6 = vcmp.lt.s32.totalorder %v10430_v21, 0 }
 0x361   : > { %v3526_v11 = vand.u32 8388607, %v12314_v9  ;;  %v10666_v45 = vsel %vm12315_vm6, %v1941_v2, %v1917_v8  ;;  %v3529_v37 = vadd.s32 1, %v7598_v17  ;;  %vm7537_vm0 = vcmp.lt.s32.totalorder %v7536_v54, 0 }
 0x362   : > { %12316 = vst [vmem:[#allocation127_spill] sm:$0xff] %v10666_v45  ;;  %v2014_v1 = vmul.u32 %v10602_v61, %v1998_v28  ;;  %v2017_v13 = vadd.s32 1, %v10647_v47  ;;  %v3626_v26 = vand.u32 2139095040, %v10604_v42  ;;  %7993 = vcosq.f32 %v3503_v29 }
 0x363   : > { %v3527_v58 = vor.u32 8388608, %v3526_v11  ;;  %v1926_v50 = vsel %vm7537_vm0, 0, %v7536_v54  ;;  %vm3530_vm8 = vcmp.gt.s32.totalorder %v3529_v37, 0  ;;  %v12317_v18 = vand.u32 2147483647, %v10604_v42 }
 0x364   : > { %7995 = vsinq.f32 %v3503_v29  ;;  %v1927_v62 = vsub.s32 32, %v1926_v50  ;;  %v1928_v5 = vshll.u32 %v10626_v53, %v1926_v50  ;;  %v1931_v8 = vsub.s32 4294967266, %v1926_v50 }
 0x365   : > { %v10673_v60 = vand.u32 8388607, %v12317_v18  ;;  %vm2016_vm1 = vc.u32 %v10660_v10, %v10646_v3  ;;  %v3531_v17 = vsel %vm3530_vm8, %v3529_v37, 0  ;;  %v10677_v61 = vshll.u32 %v3527_v58, 8 }
 0x366   : > { %v3627_v2 = vshrl.u32 %v3626_v26, 23  ;;  %v1929_v0 = vshrl.u32 %v1911_v23, %v1927_v62  ;;  %v1932_v49 = vadd.s32 127, %v1931_v8  ;;  %vm12008_vm14 = vcmp.lt.s32.totalorder %v10492_v27, 0 }
 0x367   : > { %v2018_v15 = vsel %vm2016_vm1, %v2017_v13, %v10647_v47  ;;  %v10681_v28 = vshrl.u32 %v3531_v17, 5  ;;  %v12318_v22 = vand.u32 2147483647, %v10492_v27  ;;  %v10690_v53 = vadd.s32 %v10646_v3, %v10660_v10 }
 0x368   : > { %v2019_v11 = vadd.s32 %v2018_v15, %v2014_v1  ;;  %v3533_v29 = vand.u32 31, %v3531_v17  ;;  %v3631_v54 = vor.u32 8388608, %v10673_v60  ;;  %v12321_v25 = vand.u32 2147483647, %v10430_v21 }
 0x369   : > { %vm10685_vm6 = vcmp.le.f32.partialorder %v12318_v22, 0.7853982  ;;  %v1930_v47 = vor.u32 %v1929_v0, %v1928_v5  ;;  %v1933_v58 = vshll.u32 %v1932_v49, 23  ;;  %v7602_v37 = vadd.s32 4294967169, %v3627_v2 }
 0x36a   : > { %vm10695_vm0 = vcmp.le.f32.partialorder %v12321_v25, 0.7853982  ;;  %v2020_v13 = vadd.s32 536870912, %v2019_v11  ;;  %v3534_v26 = vsub.s32 32, %v3533_v29  ;;  %v3536_v3 = vshll.u32 %v12056_v34, %v3533_v29 }
 0x36b   : > { %v3539_v10 = vshll.u32 %v12050_v36, %v3533_v29  ;;  %v1934_v1 = vor.u32 4788187, %v1933_v58  ;;  %v1937_v50 = vcvt.s32.f32 %v1930_v47  ;;  %v3542_v18 = vshll.u32 %v12043_v7, %v3533_v29 }
 0x36c   : > { %v3545_v60 = vshll.u32 %v12051_v39, %v3533_v29  ;;  %v2021_v62 = vshrl.u32 %v2020_v13, 30  ;;  %v3535_v8 = vshrl.u32 %v12056_v34, %v3534_v26  ;;  %v3537_v5 = vshrl.u32 %v12050_v36, %v3534_v26 }
 0x36d   : > { %v3540_v17 = vshrl.u32 %v12043_v7, %v3534_v26  ;;  %v1935_v2 = vand.u32 2147483647, %v1934_v1  ;;  %v3543_v0 = vshrl.u32 %v12051_v39, %v3534_v26  ;;  %v3546_v49 = vshrl.u32 %v12038_v48, %v3534_v26 }
 0x36e   : > { %v3548_v15 = vshll.u32 %v12038_v48, %v3533_v29  ;;  %v2022_v22 = vshll.u32 %v2021_v62, 30  ;;  %v2045_v25 = vsub.s32 4, %v2021_v62  ;;  %v3538_v47 = vor.u32 %v3537_v5, %v3536_v3 }
 0x36f   : > { %v3541_v58 = vor.u32 %v3540_v17, %v3539_v10  ;;  %v1938_v45 = vmul.f32 %v1937_v50, %v1935_v2  ;;  %v3547_v20 = vor.u32 %v3546_v49, %v3545_v60  ;;  %v3549_v13 = vshrl.u32 %v12039_v63, %v3534_v26  ;;  %v10717_v33 = vpop.eup %7993 }
 0x370   : > { %v10712_v14 = vsub.s32 %v2019_v11, %v2022_v22  ;;  %v2046_v1 = vsel %vm12008_vm14, %v2045_v25, %v2021_v62  ;;  %v3544_v59 = vor.u32 %v3543_v0, %v3542_v18  ;;  %vm3554_vm8 = vcmp.lt.s32.totalorder %v10681_v28, 4 }
 0x371   : > { %v1939_v29 = vxor.u32 2147483648, %v1938_v45  ;;  %v10721_v3 = vsel %vm10685_vm6, 0, %v2046_v1  ;;  %v3550_v10 = vor.u32 %v3549_v13, %v3548_v15  ;;  %vm3553_vm7 = vcmp.lt.s32.totalorder %v10681_v28, 3  ;;  %v10724_v26 = vpop.eup %7995 }
 0x372   : > { %12324 = vst [vmem:[#allocation128_spill] sm:$0xff] %v10721_v3  ;;  %v2025_v11 = vsub.s32 0, %v10712_v14  ;;  %vm12325_vm1 = vcmp.lt.s32.totalorder %v10681_v28, 1  ;;  %v3556_v18 = vsel %vm3554_vm8, %v3544_v59, 2102212464  ;;  %vm12327_vm11 = vcmp.lt.s32.totalorder %v10430_v21, 0 }
 0x373   : > { %v3555_v50 = vsel %vm12325_vm1, %v3535_v8, %v3538_v47  ;;  %vm12326_vm14 = vmmov %vm12325_vm1  ;;  %v1940_v62 = vsel %vm12327_vm11, %v1939_v29, %v1938_v45  ;;  %v3557_v5 = vsel %vm3553_vm7, %v3541_v58, %v3556_v18  ;;  %v3560_v17 = vsel %vm3554_vm8, %v3547_v20, 920167782 }
 0x374   : > { %v3559_v60 = vsel %vm12326_vm14, %v3538_v47, %v3541_v58  ;;  %v10739_v2 = vshll.u32 %v3631_v54, 8  ;;  %v1943_v8 = vsel %vm10695_vm0, %v10430_v21, %v1940_v62  ;;  %v7539_v0 = vmin.u32 %v2025_v11, %v10712_v14  ;;  %vm12328_vm14 = vmmov %vm12325_vm1 }
 0x375   : > { %v3561_v49 = vsel %vm3553_vm7, %v3544_v59, %v3560_v17  ;;  %v3563_v45 = vsel %vm12328_vm14, %v3541_v58, %v3544_v59  ;;  %v10750_v15 = vadd.s32 3, %v10721_v3  ;;  %vm12329_vm11 = vcmp.lt.s32.totalorder %v10681_v28, 2  ;;  %v12390_v3 = vld [vmem:[#allocation45_spill] sm:$0xff] }
 0x376   : > { %v3558_v22 = vsel %vm12329_vm11, %v3555_v50, %v3557_v5  ;;  %vm12330_vm1 = vmmov %vm12329_vm11  ;;  %v3564_v25 = vsel %vm3554_vm8, %v3550_v10, 1326507024  ;;  %7997 = vcosq.f32 %v1943_v8  ;;  %v2027_v47 = vclz %v7539_v0 }
 0x377   : > { %v3562_v54 = vsel %vm12330_vm1, %v3559_v60, %v3561_v49  ;;  %v3565_v13 = vsel %vm3553_vm7, %v3547_v20, %v3564_v25  ;;  %v3633_v1 = vadd.s32 1, %v7602_v37  ;;  %vm12331_vm14 = vmmov %vm12330_vm1  ;;  %v485_v11 = vsub.s32 4, %v8221_v35 }
 0x378   : > { %v3566_v59 = vsel %vm12331_vm14, %v3563_v45, %v3565_v13  ;;  %v10763_v58 = vmul.u32.u64.low %v10677_v61, %v3562_v54  ;;  %v10764_v29 = vmul.u32.u64.high %v10677_v61, %v3562_v54, %v10763_v58  ;;  %v7540_v50 = vadd.s32 4294967294, %v2027_v47 }
 0x379   : > { %v10769_v18 = vmul.u32.u64.low %v10677_v61, %v3566_v59  ;;  %v10770_v10 = vmul.u32.u64.high %v10677_v61, %v3566_v59, %v10769_v18  ;;  %vm3634_vm8 = vcmp.gt.s32.totalorder %v3633_v1, 0  ;;  %7999 = vsinq.f32 %v1943_v8 }
 0x37a   : > { %v3574_v20 = vmul.u32 %v10677_v61, %v3558_v22  ;;  %v3635_v37 = vsel %vm3634_vm8, %v3633_v1, 0  ;;  %vm12332_vm7 = vcmp.lt.s32.totalorder %v8124_v19, 0  ;;  %vm7541_vm11 = vcmp.lt.s32.totalorder %v7540_v50, 0 }
 0x37b   : > { %v486_v28 = vsel %vm12332_vm7, %v485_v11, %v8221_v35  ;;  %v3637_v60 = vand.u32 31, %v3635_v37  ;;  %v12015_v5 = vxor.u32 2147483648, %v8604_v43  ;;  %v2030_v17 = vsel %vm7541_vm11, 0, %v7540_v50 }
 0x37c   : > { %v10778_v62 = vsel %vm8433_vm10, 0, %v486_v28  ;;  %v3577_v0 = vadd.s32 1, %v10764_v29  ;;  %v10782_v49 = vshrl.u32 %v3635_v37, 5  ;;  %v2031_v8 = vsub.s32 32, %v2030_v17 }
 0x37d   : > { %v10785_v61 = vadd.s32 3, %v10778_v62  ;;  %v2032_v45 = vshll.u32 %v10712_v14, %v2030_v17  ;;  %v2035_v35 = vsub.s32 4294967266, %v2030_v17  ;;  %vm3576_vm10 = vc.u32 %v10770_v10, %v10763_v58 }
 0x37e   : > { %v3638_v6 = vsub.s32 32, %v3637_v60  ;;  %v3640_v54 = vshll.u32 %v12056_v34, %v3637_v60  ;;  %v3643_v25 = vshll.u32 %v12050_v36, %v3637_v60  ;;  %v2033_v47 = vshrl.u32 %v10690_v53, %v2031_v8 }
 0x37f   : > { %v2036_v13 = vadd.s32 127, %v2035_v35  ;;  %v3578_v1 = vsel %vm3576_vm10, %v3577_v0, %v10764_v29  ;;  %v3646_v59 = vshll.u32 %v12043_v7, %v3637_v60  ;;  %v3649_v22 = vshll.u32 %v12051_v39, %v3637_v60 }
 0x380   : > { %v3579_v11 = vadd.s32 %v3578_v1, %v3574_v20  ;;  %v3639_v14 = vshrl.u32 %v12056_v34, %v3638_v6  ;;  %v3641_v50 = vshrl.u32 %v12050_v36, %v3638_v6  ;;  %v3644_v18 = vshrl.u32 %v12043_v7, %v3638_v6 }
 0x381   : > { %v2034_v37 = vor.u32 %v2033_v47, %v2032_v45  ;;  %v2037_v28 = vshll.u32 %v2036_v13, 23  ;;  %v3647_v17 = vshrl.u32 %v12051_v39, %v3638_v6  ;;  %vm12011_vm1 = vcmp.lt.s32.totalorder %v10589_v31, 0 }
 0x382   : > { %v3580_v53 = vadd.s32 536870912, %v3579_v11  ;;  %v3642_v8 = vor.u32 %v3641_v50, %v3640_v54  ;;  %v3645_v29 = vor.u32 %v3644_v18, %v3643_v25  ;;  %v3650_v0 = vshrl.u32 %v12038_v48, %v3638_v6 }
 0x383   : > { %v2038_v20 = vor.u32 4788187, %v2037_v28  ;;  %v2041_v35 = vcvt.s32.f32 %v2034_v37  ;;  %v3648_v34 = vor.u32 %v3647_v17, %v3646_v59  ;;  %v3652_v36 = vshll.u32 %v12038_v48, %v3637_v60  ;;  %v10804_v1 = vpop.eup %7997 }
 0x384   : > { %v3581_v7 = vshrl.u32 %v3580_v53, 30  ;;  %v3651_v45 = vor.u32 %v3650_v0, %v3649_v22  ;;  %v3653_v47 = vshrl.u32 %v12039_v63, %v3638_v6  ;;  %vm3655_vm14 = vcmp.lt.s32.totalorder %v10782_v49, 1 }
 0x385   : > { %v2039_v39 = vand.u32 2147483647, %v2038_v20  ;;  %vm3656_vm8 = vcmp.lt.s32.totalorder %v10782_v49, 2  ;;  %vm12010_vm7 = vcmp.lt.s32.totalorder %v10782_v49, 3  ;;  %vm3658_vm11 = vcmp.lt.s32.totalorder %v10782_v49, 4 }
 0x386   : > { %v3582_v54 = vshll.u32 %v3581_v7, 30  ;;  %v3605_v25 = vsub.s32 4, %v3581_v7  ;;  %v3654_v13 = vor.u32 %v3653_v47, %v3652_v36  ;;  %v3659_v48 = vsel %vm3655_vm14, %v3639_v14, %v3642_v8  ;;  %v10813_v60 = vpop.eup %7999 }
 0x387   : > { %v2042_v22 = vmul.f32 %v2041_v35, %v2039_v39  ;;  %v3660_v63 = vsel %vm3658_vm11, %v3648_v34, 2102212464  ;;  %v3663_v6 = vsel %vm3655_vm14, %v3642_v8, %v3645_v29  ;;  %v3664_v59 = vsel %vm3658_vm11, %v3651_v45, 920167782 }
 0x388   : > { %v3575_v50 = vadd.s32 %v10763_v58, %v10770_v10  ;;  %v10823_v18 = vsub.s32 %v3579_v11, %v3582_v54  ;;  %v3661_v14 = vsel %vm12010_vm7, %v3645_v29, %v3660_v63  ;;  %v3665_v37 = vsel %vm12010_vm7, %v3648_v34, %v3664_v59 }
 0x389   : > { %v2043_v28 = vxor.u32 2147483648, %v2042_v22  ;;  %v3662_v17 = vsel %vm3656_vm8, %v3659_v48, %v3661_v14  ;;  %v3666_v53 = vsel %vm3656_vm8, %v3663_v6, %v3665_v37  ;;  %v3667_v8 = vsel %vm3655_vm14, %v3645_v29, %v3648_v34 }
 0x38a   : > { %vm491_vm10 = vweird.f32 %v8124_v19  ;;  %v3585_v58 = vsub.s32 0, %v10823_v18  ;;  %v3668_v10 = vsel %vm3658_vm11, %v3654_v13, 1326507024  ;;  %vm12333_vm7 = vcmp.lt.s32.totalorder %v10492_v27, 0 }
 0x38b   : > { %v10840_v11 = vmul.u32.u64.low %v10739_v2, %v3666_v53  ;;  %v10841_v0 = vmul.u32.u64.high %v10739_v2, %v3666_v53, %v10840_v11  ;;  %v2044_v20 = vsel %vm12333_vm7, %v2043_v28, %v2042_v22  ;;  %v10847_v35 = vsel %vm12011_vm1, %v3605_v25, %v3581_v7  ;;  %v12339_v53 = vld [vmem:[#allocation31_spill] sm:$0xff] }
 0x38c   : > { %vm12334_vm14 = vcmp.lt.s32.totalorder %v10782_v49, 3  ;;  %v493_v34 = vand.u32 3, %v10785_v61  ;;  %v2047_v36 = vsel %vm10685_vm6, %v10492_v27, %v2044_v20  ;;  %v7599_v47 = vmin.u32 %v3585_v58, %v10823_v18  ;;  %v12335_v49 = vld [vmem:[#allocation4_spill] sm:$0xff] }
 0x38d   : > { %v3669_v29 = vsel %vm12334_vm14, %v3651_v45, %v3668_v10  ;;  %v2253_v54 = vsub.s32 4, %v8349_v30  ;;  %8001 = vcosq.f32 %v2047_v36  ;;  %v3678_v45 = vmul.u32 %v10739_v2, %v3662_v17 }
 0x38e   : > { %v3670_v39 = vsel %vm3656_vm8, %v3667_v8, %v3669_v29  ;;  %v3587_v13 = vclz %v7599_v47  ;;  %v3681_v61 = vadd.s32 1, %v10841_v0  ;;  %vm494_vm7 = vcmp.lt.s32.totalorder %v493_v34, 2 }
 0x38f   : > { %v10860_v7 = vmul.u32.u64.low %v10739_v2, %v3670_v39  ;;  %v10861_v25 = vmul.u32.u64.high %v10739_v2, %v3670_v39, %v10860_v7  ;;  %vm495_vm11 = vcmp.eq.s32.totalorder %v493_v34, 0  ;;  %8003 = vsinq.f32 %v2047_v36 }
 0x390   : > { %v497_v9 = vsel %vm495_vm11, %v8587_v56, %v12015_v5  ;;  %vm498_vm6 = vcmp.eq.s32.totalorder %v493_v34, 2  ;;  %vm12336_vm8 = vcmp.lt.s32.totalorder %v12335_v49, 0  ;;  %v7600_v22 = vadd.s32 4294967294, %v3587_v13 }
 0x391   : > { %v2254_v48 = vsel %vm12336_vm8, %v2253_v54, %v8349_v30  ;;  %v12337_v63 = vxor.u32 2147483648, %v8587_v56  ;;  %vm12018_vm14 = vweird.f32 %v12335_v49  ;;  %vm3680_vm1 = vc.u32 %v10861_v25, %v10840_v11  ;;  %v12343_v54 = vld [vmem:[#allocation14_spill] sm:$0xff] }
 0x392   : > { %v10876_v59 = vsel %vm8703_vm15, 0, %v2254_v48  ;;  %v12013_v28 = vxor.u32 2147483648, %v8886_v4  ;;  %vm7601_vm11 = vcmp.lt.s32.totalorder %v7600_v22, 0  ;;  %vm12016_vm8 = vcmp.lt.s32.totalorder %v10604_v42, 0 }
 0x393   : > { %v500_v2 = vsel %vm498_vm6, %v12337_v63, %v8604_v43  ;;  %v2260_v37 = vadd.s32 3, %v10876_v59  ;;  %v3682_v30 = vsel %vm3680_vm1, %v3681_v61, %v10841_v0  ;;  %v12012_v8 = vxor.u32 2147483648, %v12339_v53 }
 0x394   : > { %v501_v14 = vsel %vm494_vm7, %v497_v9, %v500_v2  ;;  %v3590_v58 = vsel %vm7601_vm11, 0, %v7600_v22  ;;  %v12340_v10 = vand.u32 2147483647, %v10604_v42  ;;  %v10894_v29 = vadd.s32 %v10840_v11, %v10861_v25  ;;  %v12345_v22 = vld [vmem:[#allocation2_spill] sm:$0xff] }
 0x395   : > { %v502_v17 = vsel %vm491_vm10, nan, %v501_v14  ;;  %v3683_v34 = vadd.s32 %v3682_v30, %v3678_v45  ;;  %v2261_v0 = vand.u32 3, %v2260_v37  ;;  %v3591_v36 = vsub.s32 32, %v3590_v58  ;;  %v12349_v30 = vld [vmem:[#allocation22_spill] sm:$0xff] }
 0x396   : > { %vm10889_vm15 = vcmp.le.f32.partialorder %v12340_v10, 0.7853982  ;;  %7055 = vrot.lane.b32.xlu0 %v502_v17, %s8038_s18  ;;  %v3592_v47 = vshll.u32 %v10823_v18, %v3590_v58  ;;  %v3595_v39 = vsub.s32 4294967266, %v3590_v58  ;;  %v2152_v13 = vsel %vm8506_vm2, 0, %v12343_v54 }
 0x397   : > { %v3684_v61 = vadd.s32 536870912, %v3683_v34  ;;  %vm2262_vm1 = vcmp.lt.s32.totalorder %v2261_v0, 2  ;;  %vm2263_vm7 = vcmp.eq.s32.totalorder %v2261_v0, 0  ;;  %vm2266_vm6 = vcmp.eq.s32.totalorder %v2261_v0, 2 }
 0x398   : > { %v3593_v9 = vshrl.u32 %v3575_v50, %v3591_v36  ;;  %v3596_v11 = vadd.s32 127, %v3595_v39  ;;  %v2265_v25 = vsel %vm2263_vm7, %v12339_v53, %v12013_v28  ;;  %v2268_v45 = vsel %vm2266_vm6, %v12012_v8, %v8886_v4  ;;  %v12350_v36 = vld [vmem:[#allocation19_spill] sm:$0xff] }
 0x399   : > { %v3685_v18 = vshrl.u32 %v3684_v61, 30  ;;  %v2269_v48 = vsel %vm2262_vm1, %v2265_v25, %v2268_v45  ;;  %vm12017_vm11 = vweird.f32 %v12345_v22  ;;  %v2156_v63 = vadd.s32 3, %v2152_v13  ;;  %v12351_v25 = vld [vmem:[#allocation20_spill] sm:$0xff] }
 0x39a   : > { %v12346_v2 = vand.u32 2147483647, %v10589_v31  ;;  %v3594_v50 = vor.u32 %v3593_v9, %v3592_v47  ;;  %v3597_v14 = vshll.u32 %v3596_v11, 23  ;;  %v2270_v37 = vsel %vm12018_vm14, nan, %v2269_v48  ;;  %v10919_v54 = vpop.eup %8001  ;;  %v12353_v9 = vld [vmem:[#allocation3_spill] sm:$0xff] }
 0x39b   : > { %v12014_v17 = vxor.u32 2147483648, %v12349_v30  ;;  %v3686_v58 = vshll.u32 %v3685_v18, 30  ;;  %v3709_v10 = vsub.s32 4, %v3685_v18  ;;  %7089 = vrot.lane.b32.xlu1 %v2270_v37, %s8038_s18  ;;  %v2157_v0 = vand.u32 3, %v2156_v63  ;;  %v12354_v63 = vld [vmem:[#allocation28_spill] sm:$0xff] }
 0x39c   : > { %vm10910_vm2 = vcmp.le.f32.partialorder %v12346_v2, 0.7853982  ;;  %v2163_v39 = vxor.u32 2147483648, %v12350_v36  ;;  %v3598_v7 = vor.u32 4788187, %v3597_v14  ;;  %v3601_v61 = vcvt.s32.f32 %v3594_v50  ;;  %v10932_v37 = vpop.eup %8003 }
 0x39d   : > { %v10924_v47 = vsel %vm8591_vm13, 0, %v12351_v25  ;;  %vm595_vm1 = vweird.f32 %v12353_v9  ;;  %v10927_v11 = vsub.s32 %v3683_v34, %v3686_v58  ;;  %v3710_v48 = vsel %vm12016_vm8, %v3709_v10, %v3685_v18  ;;  %v12356_v58 = vld [vmem:[#allocation27_spill] sm:$0xff] }
 0x39e   : > { %vm2159_vm7 = vcmp.eq.s32.totalorder %v2157_v0, 0  ;;  %v3599_v8 = vand.u32 2147483647, %v3598_v7  ;;  %v10936_v50 = vsel %vm10889_vm15, 0, %v3710_v48  ;;  %vm2162_vm13 = vcmp.eq.s32.totalorder %v2157_v0, 2 }
 0x39f   : > { %12355 = vst [vmem:[#allocation4_spill] sm:$0xff] %v10936_v50  ;;  %v2161_v14 = vsel %vm2159_vm7, %v12350_v36, %v12014_v17  ;;  %v3689_v34 = vsub.s32 0, %v10927_v11  ;;  %vm2158_vm6 = vcmp.lt.s32.totalorder %v2157_v0, 2  ;;  %v2164_v18 = vsel %vm2162_vm13, %v2163_v39, %v12349_v30 }
 0x3a0   : > { %v603_v10 = vxor.u32 2147483648, %v12356_v58  ;;  %v3602_v25 = vmul.f32 %v3601_v61, %v3599_v8  ;;  %v2165_v7 = vsel %vm2158_vm6, %v2161_v14, %v2164_v18  ;;  %v3923_v45 = vand.u32 3, %v10924_v47 }
 0x3a1   : > { %v3820_v48 = vand.u32 3, %v10778_v62  ;;  %v7603_v28 = vmin.u32 %v3689_v34, %v10927_v11  ;;  %v10950_v17 = vadd.s32 3, %v10936_v50  ;;  %v2166_v0 = vsel %vm12017_vm11, nan, %v2165_v7 }
 0x3a2   : > { %v5571_v5 = vand.u32 3, %v10876_v59  ;;  %v3603_v2 = vxor.u32 2147483648, %v3602_v25  ;;  %7087 = vrot.lane.b32.xlu0 %v2166_v0, %s8038_s18  ;;  %vm3925_vm7 = vcmp.eq.s32.totalorder %v3923_v45, 0  ;;  %vm3928_vm13 = vcmp.eq.s32.totalorder %v3923_v45, 2 }
 0x3a3   : > { %12357 = vst [vmem:[#allocation23_spill] sm:$0xff] %v10950_v17  ;;  %v5468_v8 = vand.u32 3, %v2152_v13  ;;  %v3691_v61 = vclz %v7603_v28  ;;  %vm3924_vm6 = vcmp.lt.s32.totalorder %v3923_v45, 2  ;;  %v12358_v62 = vxor.u32 2147483648, %v12354_v63  ;;  %v12391_v17 = vld [vmem:[#allocation41_spill] sm:$0xff] }
 0x3a4   : > { %v3930_v34 = vsel %vm3928_vm13, %v603_v10, %v12354_v63  ;;  %vm12359_vm8 = vcmp.lt.s32.totalorder %v10589_v31, 0  ;;  %vm3822_vm11 = vcmp.eq.s32.totalorder %v3820_v48, 0  ;;  %vm3825_vm14 = vcmp.eq.s32.totalorder %v3820_v48, 2 }
 0x3a5   : > { %v3927_v14 = vsel %vm3925_vm7, %v12356_v58, %v12358_v62  ;;  %v3604_v18 = vsel %vm12359_vm8, %v3603_v2, %v3602_v25  ;;  %v7604_v28 = vadd.s32 4294967294, %v3691_v61  ;;  %v12360_v45 = vxor.u32 2147483648, %v8604_v43 }
 0x3a6   : > { %v3931_v59 = vsel %vm3924_vm6, %v3927_v14, %v3930_v34  ;;  %v3607_v13 = vsel %vm10910_vm2, %v10589_v31, %v3604_v18  ;;  %vm3821_vm8 = vcmp.lt.s32.totalorder %v3820_v48, 2  ;;  %v12361_v2 = vxor.u32 2147483648, %v8587_v56 }
 0x3a7   : > { %v3932_v7 = vsel %vm595_vm1, nan, %v3931_v59  ;;  %v3824_v0 = vsel %vm3822_vm11, %v8587_v56, %v12360_v45  ;;  %8005 = vcosq.f32 %v3607_v13  ;;  %vm5573_vm7 = vcmp.eq.s32.totalorder %v5571_v5, 0 }
 0x3a8   : > { %7201 = vrot.lane.b32.xlu1 %v3932_v7, %s8039_s19  ;;  %v3827_v25 = vsel %vm3825_vm14, %v12361_v2, %v8604_v43  ;;  %vm7605_vm13 = vcmp.lt.s32.totalorder %v7604_v28, 0  ;;  %vm5572_vm6 = vcmp.lt.s32.totalorder %v5571_v5, 2  ;;  %v12362_v61 = vxor.u32 2147483648, %v8886_v4 }
 0x3a9   : > { %v3828_v62 = vsel %vm3821_vm8, %v3824_v0, %v3827_v25  ;;  %8007 = vsinq.f32 %v3607_v13  ;;  %v3694_v34 = vsel %vm7605_vm13, 0, %v7604_v28  ;;  %vm5576_vm11 = vcmp.eq.s32.totalorder %v5571_v5, 2  ;;  %v12364_v0 = vld [vmem:[#allocation24_spill] sm:$0xff] }
 0x3aa   : > { %v5575_v14 = vsel %vm5573_vm7, %v12339_v53, %v12362_v61  ;;  %v3829_v18 = vsel %vm491_vm10, nan, %v3828_v62  ;;  %v3695_v59 = vsub.s32 32, %v3694_v34  ;;  %v3696_v48 = vshll.u32 %v10927_v11, %v3694_v34  ;;  %v12368_v62 = vld [vmem:[#allocation33_spill] sm:$0xff] }
 0x3ab   : > { %v3699_v7 = vsub.s32 4294967266, %v3694_v34  ;;  %7199 = vrot.lane.b32.xlu0 %v3829_v18, %s8039_s19  ;;  %v12363_v56 = vxor.u32 2147483648, %v12339_v53  ;;  %vm5470_vm14 = vcmp.eq.s32.totalorder %v5468_v8, 0  ;;  %vm5473_vm8 = vcmp.eq.s32.totalorder %v5468_v8, 2 }
 0x3ac   : > { %v10989_v28 = vsel %vm8782_vm5, 0, %v12364_v0  ;;  %v3697_v19 = vshrl.u32 %v10894_v29, %v3695_v59  ;;  %vm12366_vm10 = vweird.f32 %v12335_v49  ;;  %v12367_v2 = vxor.u32 2147483648, %v12349_v30  ;;  %v12369_v49 = vld [vmem:[#allocation32_spill] sm:$0xff]  ;;  %v12374_v0 = vld [vmem:[#allocation13_spill] sm:$0xff] }
 0x3ad   : > { %v5578_v43 = vsel %vm5576_vm11, %v12363_v56, %v8886_v4  ;;  %v3700_v5 = vadd.s32 127, %v3699_v7  ;;  %vm5469_vm7 = vcmp.lt.s32.totalorder %v5468_v8, 2  ;;  %v5475_v4 = vsel %vm5473_vm8, %v2163_v39, %v12349_v30  ;;  %v12371_v8 = vld [vmem:[#allocation34_spill] sm:$0xff] }
 0x3ae   : > { %v5579_v45 = vsel %vm5572_vm6, %v5575_v14, %v5578_v43  ;;  %v5472_v25 = vsel %vm5470_vm14, %v12350_v36, %v12367_v2  ;;  %v700_v53 = vadd.s32 3, %v10989_v28  ;;  %v704_v61 = vxor.u32 2147483648, %v12368_v62  ;;  %v12376_v43 = vld [vmem:[#allocation43_spill] sm:$0xff] }
 0x3af   : > { %v5580_v11 = vsel %vm12366_vm10, nan, %v5579_v45  ;;  %v3698_v29 = vor.u32 %v3697_v19, %v3696_v48  ;;  %v3701_v14 = vshll.u32 %v3700_v5, 23  ;;  %v5476_v34 = vsel %vm5469_vm7, %v5472_v25, %v5475_v4  ;;  %v12373_v48 = vld [vmem:[#allocation5_spill] sm:$0xff] }
 0x3b0   : > { %7233 = vrot.lane.b32.xlu1 %v5580_v11, %s8039_s19  ;;  %v12019_v18 = vxor.u32 2147483648, %v12369_v49  ;;  %vm12370_vm5 = vweird.f32 %v12345_v22  ;;  %v701_v7 = vand.u32 3, %v700_v53  ;;  %v596_v56 = vadd.s32 3, %v10924_v47 }
 0x3b1   : > { %v5477_v59 = vsel %vm12370_vm5, nan, %v5476_v34  ;;  %v11010_v36 = vsel %vm8973_vm4, 0, %v12371_v8  ;;  %v3702_v30 = vor.u32 4788187, %v3701_v14  ;;  %v3705_v39 = vcvt.s32.f32 %v3698_v29 }
 0x3b2   : > { %7231 = vrot.lane.b32.xlu0 %v5477_v59, %s8039_s19  ;;  %vm699_vm13 = vweird.f32 %v12373_v48  ;;  %v804_v45 = vadd.s32 3, %v11010_v36  ;;  %vm702_vm6 = vcmp.lt.s32.totalorder %v701_v7, 2  ;;  %vm703_vm11 = vcmp.eq.s32.totalorder %v701_v7, 0 }
 0x3b3   : > { %vm706_vm14 = vcmp.eq.s32.totalorder %v701_v7, 2  ;;  %v597_v22 = vand.u32 3, %v596_v56  ;;  %vm803_vm8 = vweird.f32 %v12374_v0  ;;  %v3703_v47 = vand.u32 2147483647, %v3702_v30 }
 0x3b4   : > { %v705_v13 = vsel %vm703_vm11, %v12369_v49, %v704_v61  ;;  %v708_v19 = vsel %vm706_vm14, %v12019_v18, %v12368_v62  ;;  %v805_v5 = vand.u32 3, %v804_v45  ;;  %v11022_v2 = vpop.eup %8005  ;;  %v12375_v53 = vxor.u32 2147483648, %v12354_v63  ;;  %v12379_v45 = vld [vmem:[#allocation11_spill] sm:$0xff]  ;;  %v12387_v18 = vld [vmem:[#allocation49_spill] sm:$0xff] }
 0x3b5   : > { %v709_v11 = vsel %vm702_vm6, %v705_v13, %v708_v19  ;;  %vm598_vm4 = vcmp.lt.s32.totalorder %v597_v22, 2  ;;  %vm599_vm10 = vcmp.eq.s32.totalorder %v597_v22, 0  ;;  %vm602_vm7 = vcmp.eq.s32.totalorder %v597_v22, 2  ;;  %v12380_v22 = vld [vmem:[#allocation42_spill] sm:$0xff] }
 0x3b6   : > { %v3706_v25 = vmul.f32 %v3705_v39, %v3703_v47  ;;  %v710_v4 = vsel %vm699_vm13, nan, %v709_v11  ;;  %v601_v29 = vsel %vm599_vm10, %v12356_v58, %v12375_v53  ;;  %v604_v14 = vsel %vm602_vm7, %v603_v10, %v12354_v63  ;;  %v11034_v7 = vpop.eup %8007  ;;  %v12377_v58 = vld [vmem:[#allocation30_spill] sm:$0xff]  ;;  %v12382_v11 = vld [vmem:[#allocation37_spill] sm:$0xff] }
 0x3b7   : > { %7059 = vrot.lane.b32.xlu1 %v710_v4, %s8038_s18  ;;  %v605_v34 = vsel %vm598_vm4, %v601_v29, %v604_v14  ;;  %vm806_vm5 = vcmp.lt.s32.totalorder %v805_v5, 2  ;;  %vm807_vm6 = vcmp.eq.s32.totalorder %v805_v5, 0  ;;  %v808_v59 = vxor.u32 2147483648, %v9178_v44  ;;  %v12383_v14 = vld [vmem:[#allocation38_spill] sm:$0xff] }
 0x3b8   : > { %v3707_v56 = vxor.u32 2147483648, %v3706_v25  ;;  %v606_v8 = vsel %vm595_vm1, nan, %v605_v34  ;;  %vm810_vm11 = vcmp.eq.s32.totalorder %v805_v5, 2  ;;  %v811_v30 = vxor.u32 2147483648, %v12376_v43  ;;  %v12384_v34 = vld [vmem:[#allocation39_spill] sm:$0xff] }
 0x3b9   : > { %7057 = vrot.lane.b32.xlu0 %v606_v8, %s8038_s18  ;;  %v809_v63 = vsel %vm807_vm6, %v12376_v43, %v808_v59  ;;  %v2360_v39 = vsel %vm8804_vm3, 0, %v12377_v58  ;;  %vm2363_vm14 = vweird.f32 %v12379_v45  ;;  %v2368_v47 = vxor.u32 2147483648, %v12380_v22  ;;  %v12386_v58 = vld [vmem:[#allocation15_spill] sm:$0xff]  ;;  %v12399_v45 = vld [vmem:[#allocation25_spill] sm:$0xff] }
 0x3ba   : > { %vm12381_vm4 = vcmp.lt.s32.totalorder %v10604_v42, 0  ;;  %v812_v9 = vsel %vm810_vm11, %v811_v30, %v9178_v44  ;;  %v2364_v19 = vadd.s32 3, %v2360_v39  ;;  %v2371_v4 = vxor.u32 2147483648, %v12382_v11 }
 0x3bb   : > { %v3708_v13 = vsel %vm12381_vm4, %v3707_v56, %v3706_v25  ;;  %v813_v29 = vsel %vm806_vm5, %v809_v63, %v812_v9  ;;  %vm12385_vm3 = vnez %v12384_v34  ;;  %vm2467_vm1 = vweird.f32 %v12386_v58 }
 0x3bc   : > { %v3711_v53 = vsel %vm10889_vm15, %v10604_v42, %v3708_v13  ;;  %v2464_v8 = vsel %vm12385_vm3, 0, %v12383_v14  ;;  %v814_v25 = vsel %vm803_vm8, nan, %v813_v29  ;;  %v2365_v56 = vand.u32 3, %v2364_v19  ;;  %v12388_v13 = vld [vmem:[#allocation48_spill] sm:$0xff] }
 0x3bd   : > { %8009 = vcosq.f32 %v3711_v53  ;;  %v2468_v10 = vadd.s32 3, %v2464_v8  ;;  %7061 = vrot.lane.b32.xlu1 %v814_v25, %s8038_s18  ;;  %v2472_v20 = vxor.u32 2147483648, %v12387_v18  ;;  %v2475_v5 = vxor.u32 2147483648, %v12388_v13 }
 0x3be   : > { %8011 = vsinq.f32 %v3711_v53  ;;  %v4026_v63 = vand.u32 3, %v10989_v28  ;;  %vm2366_vm15 = vcmp.lt.s32.totalorder %v2365_v56, 2  ;;  %vm2367_vm10 = vcmp.eq.s32.totalorder %v2365_v56, 0 }
 0x3bf   : > { %vm2370_vm7 = vcmp.eq.s32.totalorder %v2365_v56, 2  ;;  %v2469_v9 = vand.u32 3, %v2468_v10  ;;  %v2369_v14 = vsel %vm2367_vm10, %v12382_v11, %v2368_v47  ;;  %v4129_v10 = vand.u32 3, %v11010_v36 }
 0x3c0   : > { %v2372_v34 = vsel %vm2370_vm7, %v2371_v4, %v12380_v22  ;;  %vm4027_vm5 = vcmp.lt.s32.totalorder %v4026_v63, 2  ;;  %vm4028_vm6 = vcmp.eq.s32.totalorder %v4026_v63, 0  ;;  %vm4031_vm10 = vcmp.eq.s32.totalorder %v4026_v63, 2 }
 0x3c1   : > { %v2373_v19 = vsel %vm2366_vm15, %v2369_v14, %v2372_v34  ;;  %vm2470_vm11 = vcmp.lt.s32.totalorder %v2469_v9, 2  ;;  %vm2471_vm4 = vcmp.eq.s32.totalorder %v2469_v9, 0  ;;  %vm2474_vm3 = vcmp.eq.s32.totalorder %v2469_v9, 2 }
 0x3c2   : > { %v2374_v53 = vsel %vm2363_vm14, nan, %v2373_v19  ;;  %v2473_v29 = vsel %vm2471_vm4, %v12388_v13, %v2472_v20  ;;  %v2476_v28 = vsel %vm2474_vm3, %v2475_v5, %v12387_v18  ;;  %v4030_v25 = vsel %vm4028_vm6, %v12369_v49, %v704_v61 }
 0x3c3   : > { %7091 = vrot.lane.b32.xlu0 %v2374_v53, %s8038_s18  ;;  %v2477_v56 = vsel %vm2470_vm11, %v2473_v29, %v2476_v28  ;;  %v5674_v14 = vand.u32 3, %v2360_v39  ;;  %v12389_v34 = vxor.u32 2147483648, %v12369_v49  ;;  %v5777_v50 = vand.u32 3, %v2464_v8  ;;  %v12396_v53 = vld [vmem:[#allocation53_spill] sm:$0xff]  ;;  %v12397_v29 = vld [vmem:[#allocation55_spill] sm:$0xff] }
 0x3c4   : > { %v2478_v9 = vsel %vm2467_vm1, nan, %v2477_v56  ;;  %vm12392_vm15 = vnez %v12391_v17  ;;  %vm4130_vm7 = vcmp.lt.s32.totalorder %v4129_v10, 2  ;;  %vm4131_vm6 = vcmp.eq.s32.totalorder %v4129_v10, 0  ;;  %v12400_v56 = vld [vmem:[#allocation62_spill] sm:$0xff] }
 0x3c5   : > { %v4033_v19 = vsel %vm4031_vm10, %v12389_v34, %v12368_v62  ;;  %v11083_v42 = vsel %vm12392_vm15, 0, %v12390_v3  ;;  %7093 = vrot.lane.b32.xlu1 %v2478_v9, %s8038_s18  ;;  %vm4134_vm11 = vcmp.eq.s32.totalorder %v4129_v10, 2  ;;  %v4133_v39 = vsel %vm4131_vm6, %v12376_v43, %v808_v59  ;;  %v12393_v59 = vld [vmem:[#allocation17_spill] sm:$0xff]  ;;  %v12402_v9 = vld [vmem:[#allocation47_spill] sm:$0xff]  ;;  %v12403_v34 = vld [vmem:[#allocation44_spill] sm:$0xff] }
 0x3c6   : > { %v4034_v61 = vsel %vm4027_vm5, %v4030_v25, %v4033_v19  ;;  %v4136_v62 = vsel %vm4134_vm11, %v811_v30, %v9178_v44  ;;  %vm5675_vm4 = vcmp.lt.s32.totalorder %v5674_v14, 2  ;;  %vm5676_vm3 = vcmp.eq.s32.totalorder %v5674_v14, 0 }
 0x3c7   : > { %v4035_v36 = vsel %vm699_vm13, nan, %v4034_v61  ;;  %v4137_v17 = vsel %vm4130_vm7, %v4133_v39, %v4136_v62  ;;  %vm5679_vm10 = vcmp.eq.s32.totalorder %v5674_v14, 2  ;;  %vm5778_vm15 = vcmp.lt.s32.totalorder %v5777_v50, 2  ;;  %v12401_v14 = vld [vmem:[#allocation61_spill] sm:$0xff] }
 0x3c8   : > { %7203 = vrot.lane.b32.xlu0 %v4035_v36, %s8039_s19  ;;  %v4138_v3 = vsel %vm803_vm8, nan, %v4137_v17  ;;  %v5678_v49 = vsel %vm5676_vm3, %v12382_v11, %v2368_v47  ;;  %v5681_v8 = vsel %vm5679_vm10, %v2371_v4, %v12380_v22  ;;  %vm5779_vm5 = vcmp.eq.s32.totalorder %v5777_v50, 0  ;;  %v12394_v11 = vld [vmem:[#allocation51_spill] sm:$0xff]  ;;  %v12405_v61 = vld [vmem:[#allocation21_spill] sm:$0xff] }
 0x3c9   : > { %7205 = vrot.lane.b32.xlu1 %v4138_v3, %s8039_s19  ;;  %v5682_v48 = vsel %vm5675_vm4, %v5678_v49, %v5681_v8  ;;  %v5781_v44 = vsel %vm5779_vm5, %v12388_v13, %v2472_v20  ;;  %vm5782_vm13 = vcmp.eq.s32.totalorder %v5777_v50, 2  ;;  %vm907_vm6 = vweird.f32 %v12393_v59  ;;  %v12395_v13 = vld [vmem:[#allocation50_spill] sm:$0xff]  ;;  %v12406_v36 = vld [vmem:[#allocation57_spill] sm:$0xff] }
 0x3ca   : > { %v11099_v43 = vpop.eup %8009  ;;  %v5683_v30 = vsel %vm2363_vm14, nan, %v5682_v48  ;;  %v5784_v0 = vsel %vm5782_vm13, %v2475_v5, %v12387_v18  ;;  %v908_v47 = vadd.s32 3, %v11083_v42  ;;  %v912_v22 = vxor.u32 2147483648, %v12394_v11  ;;  %v12407_v49 = vld [vmem:[#allocation54_spill] sm:$0xff] }
 0x3cb   : > { %v11106_v4 = vpop.eup %8011  ;;  %v5785_v20 = vsel %vm5778_vm15, %v5781_v44, %v5784_v0  ;;  %v915_v63 = vxor.u32 2147483648, %v12395_v13  ;;  %vm12398_vm8 = vnez %v12397_v29  ;;  %vm1011_vm14 = vweird.f32 %v12399_v45 }
 0x3cc   : > { %7235 = vrot.lane.b32.xlu0 %v5683_v30, %s8039_s19  ;;  %v1008_v28 = vsel %vm12398_vm8, 0, %v12396_v53  ;;  %v5786_v18 = vsel %vm2467_vm1, nan, %v5785_v20  ;;  %v909_v5 = vand.u32 3, %v908_v47  ;;  %v1016_v10 = vxor.u32 2147483648, %v12400_v56  ;;  %v12408_v53 = vld [vmem:[#allocation58_spill] sm:$0xff] }
 0x3cd   : > { %v1012_v25 = vadd.s32 3, %v1008_v28  ;;  %7237 = vrot.lane.b32.xlu1 %v5786_v18, %s8039_s19  ;;  %v1019_v50 = vxor.u32 2147483648, %v12401_v14  ;;  %vm12404_vm7 = vnez %v12403_v34  ;;  %vm12024_vm11 = vweird.f32 %v12405_v61 }
 0x3ce   : > { %v2568_v19 = vsel %vm12404_vm7, 0, %v12402_v9  ;;  %v2576_v39 = vxor.u32 2147483648, %v12406_v36  ;;  %vm910_vm4 = vcmp.lt.s32.totalorder %v909_v5, 2  ;;  %vm911_vm3 = vcmp.eq.s32.totalorder %v909_v5, 0 }
 0x3cf   : > { %vm914_vm10 = vcmp.eq.s32.totalorder %v909_v5, 2  ;;  %v1013_v58 = vand.u32 3, %v1012_v25  ;;  %v913_v62 = vsel %vm911_vm3, %v12395_v13, %v912_v22  ;;  %v2572_v3 = vadd.s32 3, %v2568_v19 }
 0x3d0   : > { %v916_v17 = vsel %vm914_vm10, %v915_v63, %v12394_v11  ;;  %v2579_v8 = vxor.u32 2147483648, %v12407_v49  ;;  %vm12409_vm13 = vnez %v12140_v32  ;;  %vm2675_vm8 = vweird.f32 %v8859_v51 }
 0x3d1   : > { %v917_v48 = vsel %vm910_vm4, %v913_v62, %v916_v17  ;;  %vm1014_vm1 = vcmp.lt.s32.totalorder %v1013_v58, 2  ;;  %vm1015_vm15 = vcmp.eq.s32.totalorder %v1013_v58, 0  ;;  %vm1018_vm5 = vcmp.eq.s32.totalorder %v1013_v58, 2 }
 0x3d2   : > { %v918_v44 = vsel %vm907_vm6, nan, %v917_v48  ;;  %v1017_v30 = vsel %vm1015_vm15, %v12401_v14, %v1016_v10  ;;  %v1020_v0 = vsel %vm1018_vm5, %v1019_v50, %v12400_v56  ;;  %v2573_v47 = vand.u32 3, %v2572_v3 }
 0x3d3   : > { %7063 = vrot.lane.b32.xlu0 %v918_v44, %s8038_s18  ;;  %v1021_v20 = vsel %vm1014_vm1, %v1017_v30, %v1020_v0  ;;  %v2672_v29 = vsel %vm12409_vm13, 0, %v12408_v53  ;;  %v2680_v18 = vxor.u32 2147483648, %v9542_v55  ;;  %v2683_v34 = vxor.u32 2147483648, %v9538_v46  ;;  %v12410_v0 = vld [vmem:[#allocation64_spill] sm:$0xff] }
 0x3d4   : > { %v1022_v5 = vsel %vm1011_vm14, nan, %v1021_v20  ;;  %vm2574_vm7 = vcmp.lt.s32.totalorder %v2573_v47, 2  ;;  %vm2575_vm4 = vcmp.eq.s32.totalorder %v2573_v47, 0  ;;  %vm2578_vm3 = vcmp.eq.s32.totalorder %v2573_v47, 2  ;;  %v12411_v47 = vld [vmem:[#allocation60_spill] sm:$0xff] }
 0x3d5   : > { %7065 = vrot.lane.b32.xlu1 %v1022_v5, %s8038_s18  ;;  %v2577_v25 = vsel %vm2575_vm4, %v12407_v49, %v2576_v39  ;;  %v2580_v9 = vsel %vm2578_vm3, %v2579_v8, %v12406_v36  ;;  %v2676_v32 = vadd.s32 3, %v2672_v29  ;;  %v4232_v62 = vand.u32 3, %v11083_v42 }
 0x3d6   : > { %v2581_v58 = vsel %vm2574_vm7, %v2577_v25, %v2580_v9  ;;  %v4335_v17 = vand.u32 3, %v1008_v28  ;;  %v5880_v3 = vand.u32 3, %v2568_v19  ;;  %v5983_v30 = vand.u32 3, %v2672_v29 }
 0x3d7   : > { %v2582_v48 = vsel %vm12024_vm11, nan, %v2581_v58  ;;  %v2677_v44 = vand.u32 3, %v2676_v32  ;;  %vm12412_vm10 = vnez %v12411_v47  ;;  %vm4233_vm1 = vcmp.lt.s32.totalorder %v4232_v62, 2 }
 0x3d8   : > { %v11154_v20 = vsel %vm12412_vm10, 0, %v12410_v0  ;;  %7095 = vrot.lane.b32.xlu0 %v2582_v48, %s8038_s18  ;;  %vm4234_vm15 = vcmp.eq.s32.totalorder %v4232_v62, 0  ;;  %vm4237_vm5 = vcmp.eq.s32.totalorder %v4232_v62, 2  ;;  %vm4336_vm13 = vcmp.lt.s32.totalorder %v4335_v17, 2  ;;  %v12415_v62 = vld [vmem:[#allocation67_spill] sm:$0xff] }
 0x3d9   : > { %vm2678_vm7 = vcmp.lt.s32.totalorder %v2677_v44, 2  ;;  %vm2679_vm4 = vcmp.eq.s32.totalorder %v2677_v44, 0  ;;  %vm2682_vm3 = vcmp.eq.s32.totalorder %v2677_v44, 2  ;;  %v4236_v42 = vsel %vm4234_vm15, %v12395_v13, %v912_v22  ;;  %v12422_v0 = vld [vmem:[#allocation63_spill] sm:$0xff] }
 0x3da   : > { %v2681_v28 = vsel %vm2679_vm4, %v9538_v46, %v2680_v18  ;;  %v2684_v19 = vsel %vm2682_vm3, %v2683_v34, %v9542_v55  ;;  %v4239_v53 = vsel %vm4237_vm5, %v915_v63, %v12394_v11  ;;  %vm4337_vm10 = vcmp.eq.s32.totalorder %v4335_v17, 0 }
 0x3db   : > { %v2685_v29 = vsel %vm2678_vm7, %v2681_v28, %v2684_v19  ;;  %v4240_v5 = vsel %vm4233_vm1, %v4236_v42, %v4239_v53  ;;  %v4339_v25 = vsel %vm4337_vm10, %v12401_v14, %v1016_v10  ;;  %vm4340_vm11 = vcmp.eq.s32.totalorder %v4335_v17, 2  ;;  %v12413_v14 = vld [vmem:[#allocation35_spill] sm:$0xff]  ;;  %v12424_v42 = vld [vmem:[#allocation40_spill] sm:$0xff]  ;;  %v12425_v28 = vld [vmem:[#allocation73_spill] sm:$0xff] }
 0x3dc   : > { %v2686_v9 = vsel %vm2675_vm8, nan, %v2685_v29  ;;  %v4241_v32 = vsel %vm907_vm6, nan, %v4240_v5  ;;  %v4342_v22 = vsel %vm4340_vm11, %v1019_v50, %v12400_v56  ;;  %vm5881_vm15 = vcmp.lt.s32.totalorder %v5880_v3, 2 }
 0x3dd   : > { %7097 = vrot.lane.b32.xlu1 %v2686_v9, %s8038_s18  ;;  %7207 = vrot.lane.b32.xlu0 %v4241_v32, %s8039_s19  ;;  %v4343_v11 = vsel %vm4336_vm13, %v4339_v25, %v4342_v22  ;;  %vm5882_vm5 = vcmp.eq.s32.totalorder %v5880_v3, 0  ;;  %vm5885_vm1 = vcmp.eq.s32.totalorder %v5880_v3, 2  ;;  %vm5984_vm7 = vcmp.lt.s32.totalorder %v5983_v30, 2  ;;  %v12420_v3 = vld [vmem:[#allocation46_spill] sm:$0xff]  ;;  %v12426_v25 = vld [vmem:[#allocation68_spill] sm:$0xff] }
 0x3de   : > { %v4344_v13 = vsel %vm1011_vm14, nan, %v4343_v11  ;;  %v5884_v59 = vsel %vm5882_vm5, %v12407_v49, %v2576_v39  ;;  %v5887_v63 = vsel %vm5885_vm1, %v2579_v8, %v12406_v36  ;;  %vm5985_vm6 = vcmp.eq.s32.totalorder %v5983_v30, 0  ;;  %v12416_v39 = vld [vmem:[#allocation66_spill] sm:$0xff]  ;;  %v12418_v8 = vld [vmem:[#allocation75_spill] sm:$0xff] }
 0x3df   : > { %v5888_v56 = vsel %vm5881_vm15, %v5884_v59, %v5887_v63  ;;  %v5987_v10 = vsel %vm5985_vm6, %v9538_v46, %v2680_v18  ;;  %vm5988_vm11 = vcmp.eq.s32.totalorder %v5983_v30, 2  ;;  %vm1115_vm4 = vweird.f32 %v12413_v14  ;;  %v12417_v46 = vld [vmem:[#allocation70_spill] sm:$0xff]  ;;  %v12421_v30 = vld [vmem:[#allocation69_spill] sm:$0xff] }
 0x3e0   : > { %vm12414_vm13 = vweird.f32 %v12405_v61  ;;  %v5990_v58 = vsel %vm5988_vm11, %v2683_v34, %v9542_v55  ;;  %v1116_v45 = vadd.s32 3, %v11154_v20  ;;  %v1120_v17 = vxor.u32 2147483648, %v12415_v62 }
 0x3e1   : > { %v5889_v50 = vsel %vm12414_vm13, nan, %v5888_v56  ;;  %7209 = vrot.lane.b32.xlu1 %v4344_v13, %s8039_s19  ;;  %v5991_v36 = vsel %vm5984_vm7, %v5987_v10, %v5990_v58  ;;  %v1123_v49 = vxor.u32 2147483648, %v12416_v39  ;;  %vm12419_vm14 = vnez %v12418_v8  ;;  %v12427_v56 = vld [vmem:[#allocation71_spill] sm:$0xff]  ;;  %v12429_v58 = vld [vmem:[#allocation52_spill] sm:$0xff] }
 0x3e2   : > { %7239 = vrot.lane.b32.xlu0 %v5889_v50, %s8039_s19  ;;  %v1216_v18 = vsel %vm12419_vm14, 0, %v12417_v46  ;;  %vm1219_vm3 = vweird.f32 %v12420_v3  ;;  %v5992_v55 = vsel %vm2675_vm8, nan, %v5991_v36  ;;  %v1117_v61 = vand.u32 3, %v1116_v45  ;;  %v12430_v45 = vld [vmem:[#allocation83_spill] sm:$0xff] }
 0x3e3   : > { %v1220_v34 = vadd.s32 3, %v1216_v18  ;;  %v1224_v48 = vxor.u32 2147483648, %v9815_v16  ;;  %v1227_v44 = vxor.u32 2147483648, %v9805_v41  ;;  %vm12423_vm10 = vnez %v12422_v0 }
 0x3e4   : > { %v2776_v47 = vsel %vm12423_vm10, 0, %v12421_v30  ;;  %vm2779_vm15 = vweird.f32 %v12424_v42  ;;  %v2784_v19 = vxor.u32 2147483648, %v12425_v28  ;;  %vm1118_vm5 = vcmp.lt.s32.totalorder %v1117_v61, 2 }
 0x3e5   : > { %vm1119_vm1 = vcmp.eq.s32.totalorder %v1117_v61, 0  ;;  %vm1122_vm7 = vcmp.eq.s32.totalorder %v1117_v61, 2  ;;  %v1221_v53 = vand.u32 3, %v1220_v34  ;;  %7241 = vrot.lane.b32.xlu1 %v5992_v55, %s8039_s19  ;;  %v2780_v5 = vadd.s32 3, %v2776_v47  ;;  %v12431_v34 = vld [vmem:[#allocation82_spill] sm:$0xff] }
 0x3e6   : > { %v1121_v51 = vsel %vm1119_vm1, %v12416_v39, %v1120_v17  ;;  %v1124_v29 = vsel %vm1122_vm7, %v1123_v49, %v12415_v62  ;;  %v2787_v9 = vxor.u32 2147483648, %v12426_v25  ;;  %v2880_v50 = vsel %vm9786_vm12, 0, %v12427_v56 }
 0x3e7   : > { %v1125_v32 = vsel %vm1118_vm5, %v1121_v51, %v1124_v29  ;;  %vm1222_vm8 = vcmp.lt.s32.totalorder %v1221_v53, 2  ;;  %vm1223_vm6 = vcmp.eq.s32.totalorder %v1221_v53, 0  ;;  %vm1226_vm11 = vcmp.eq.s32.totalorder %v1221_v53, 2 }
 0x3e8   : > { %v1126_v22 = vsel %vm1115_vm4, nan, %v1125_v32  ;;  %v1225_v11 = vsel %vm1223_vm6, %v9805_v41, %v1224_v48  ;;  %v1228_v13 = vsel %vm1226_vm11, %v1227_v44, %v9815_v16  ;;  %v2781_v59 = vand.u32 3, %v2780_v5 }
 0x3e9   : > { %7067 = vrot.lane.b32.xlu0 %v1126_v22, %s8038_s18  ;;  %v1229_v63 = vsel %vm1222_vm8, %v1225_v11, %v1228_v13  ;;  %vm2883_vm13 = vweird.f32 %v12429_v58  ;;  %v2888_v36 = vxor.u32 2147483648, %v12430_v45  ;;  %v2884_v61 = vadd.s32 3, %v2880_v50  ;;  %v12432_v11 = vld [vmem:[#allocation80_spill] sm:$0xff]  ;;  %v12433_v13 = vld [vmem:[#allocation78_spill] sm:$0xff] }
 0x3ea   : > { %v1230_v46 = vsel %vm1219_vm3, nan, %v1229_v63  ;;  %vm2782_vm14 = vcmp.lt.s32.totalorder %v2781_v59, 2  ;;  %vm2783_vm10 = vcmp.eq.s32.totalorder %v2781_v59, 0  ;;  %vm2786_vm5 = vcmp.eq.s32.totalorder %v2781_v59, 2 }
 0x3eb   : > { %7069 = vrot.lane.b32.xlu1 %v1230_v46, %s8038_s18  ;;  %v2785_v8 = vsel %vm2783_vm10, %v12426_v25, %v2784_v19  ;;  %v2788_v55 = vsel %vm2786_vm5, %v2787_v9, %v12425_v28  ;;  %v2891_v30 = vxor.u32 2147483648, %v12431_v34  ;;  %v4438_v53 = vand.u32 3, %v11154_v20 }
 0x3ec   : > { %v2789_v0 = vsel %vm2782_vm14, %v2785_v8, %v2788_v55  ;;  %v4541_v51 = vand.u32 3, %v1216_v18  ;;  %v6086_v29 = vand.u32 3, %v2776_v47  ;;  %v2885_v32 = vand.u32 3, %v2884_v61  ;;  %v12436_v61 = vld [vmem:[#allocation85_spill] sm:$0xff] }
 0x3ed   : > { %v2790_v5 = vsel %vm2779_vm15, nan, %v2789_v0  ;;  %v6189_v22 = vand.u32 3, %v2880_v50  ;;  %vm12434_vm12 = vnez %v12433_v13  ;;  %vm4439_vm1 = vcmp.lt.s32.totalorder %v4438_v53, 2  ;;  %v12446_v13 = vld [vmem:[#allocation90_spill] sm:$0xff] }
 0x3ee   : > { %v11233_v59 = vsel %vm12434_vm12, 0, %v12432_v11  ;;  %7099 = vrot.lane.b32.xlu0 %v2790_v5, %s8038_s18  ;;  %vm4440_vm7 = vcmp.eq.s32.totalorder %v4438_v53, 0  ;;  %vm4443_vm8 = vcmp.eq.s32.totalorder %v4438_v53, 2  ;;  %vm4542_vm6 = vcmp.lt.s32.totalorder %v4541_v51, 2  ;;  %v12442_v5 = vld [vmem:[#allocation87_spill] sm:$0xff] }
 0x3ef   : > { %vm2886_vm11 = vcmp.lt.s32.totalorder %v2885_v32, 2  ;;  %vm2887_vm14 = vcmp.eq.s32.totalorder %v2885_v32, 0  ;;  %vm2890_vm10 = vcmp.eq.s32.totalorder %v2885_v32, 2  ;;  %v4442_v20 = vsel %vm4440_vm7, %v12416_v39, %v1120_v17  ;;  %v12443_v32 = vld [vmem:[#allocation79_spill] sm:$0xff] }
 0x3f0   : > { %v2889_v18 = vsel %vm2887_vm14, %v12431_v34, %v2888_v36  ;;  %v2892_v47 = vsel %vm2890_vm10, %v2891_v30, %v12430_v45  ;;  %v4445_v63 = vsel %vm4443_vm8, %v1123_v49, %v12415_v62  ;;  %vm4543_vm5 = vcmp.eq.s32.totalorder %v4541_v51, 0  ;;  %v12445_v11 = vld [vmem:[#allocation59_spill] sm:$0xff] }
 0x3f1   : > { %v2893_v56 = vsel %vm2886_vm11, %v2889_v18, %v2892_v47  ;;  %v4446_v10 = vsel %vm4439_vm1, %v4442_v20, %v4445_v63  ;;  %v4545_v50 = vsel %vm4543_vm5, %v9805_v41, %v1224_v48  ;;  %vm4546_vm12 = vcmp.eq.s32.totalorder %v4541_v51, 2  ;;  %v12435_v48 = vld [vmem:[#allocation56_spill] sm:$0xff]  ;;  %v12447_v47 = vld [vmem:[#allocation86_spill] sm:$0xff] }
 0x3f2   : > { %v2894_v46 = vsel %vm2883_vm13, nan, %v2893_v56  ;;  %v4447_v8 = vsel %vm1115_vm4, nan, %v4446_v10  ;;  %v4548_v17 = vsel %vm4546_vm12, %v1227_v44, %v9815_v16  ;;  %vm6087_vm7 = vcmp.lt.s32.totalorder %v6086_v29, 2  ;;  %v12441_v51 = vld [vmem:[#allocation92_spill] sm:$0xff] }
 0x3f3   : > { %7101 = vrot.lane.b32.xlu1 %v2894_v46, %s8038_s18  ;;  %7211 = vrot.lane.b32.xlu0 %v4447_v8, %s8039_s19  ;;  %v4549_v62 = vsel %vm4542_vm6, %v4545_v50, %v4548_v17  ;;  %vm6088_vm1 = vcmp.eq.s32.totalorder %v6086_v29, 0  ;;  %vm6091_vm8 = vcmp.eq.s32.totalorder %v6086_v29, 2  ;;  %vm6190_vm11 = vcmp.lt.s32.totalorder %v6189_v22, 2 }
 0x3f4   : > { %v4550_v39 = vsel %vm1219_vm3, nan, %v4549_v62  ;;  %v6090_v14 = vsel %vm6088_vm1, %v12426_v25, %v2784_v19  ;;  %v6093_v41 = vsel %vm6091_vm8, %v2787_v9, %v12425_v28  ;;  %vm6191_vm4 = vcmp.eq.s32.totalorder %v6189_v22, 0  ;;  %v12437_v19 = vld [vmem:[#allocation84_spill] sm:$0xff]  ;;  %v12448_v62 = vld [vmem:[#allocation89_spill] sm:$0xff] }
 0x3f5   : > { %v6094_v16 = vsel %vm6087_vm7, %v6090_v14, %v6093_v41  ;;  %v6193_v49 = vsel %vm6191_vm4, %v12431_v34, %v2888_v36  ;;  %vm6194_vm14 = vcmp.eq.s32.totalorder %v6189_v22, 2  ;;  %vm1323_vm10 = vweird.f32 %v12435_v48  ;;  %v12439_v36 = vld [vmem:[#allocation65_spill] sm:$0xff]  ;;  %v12451_v41 = vld [vmem:[#allocation72_spill] sm:$0xff] }
 0x3f6   : > { %v6095_v44 = vsel %vm2779_vm15, nan, %v6094_v16  ;;  %v6196_v55 = vsel %vm6194_vm14, %v2891_v30, %v12430_v45  ;;  %v1324_v3 = vadd.s32 3, %v11233_v59  ;;  %v1328_v0 = vxor.u32 2147483648, %v12436_v61  ;;  %v12440_v30 = vld [vmem:[#allocation94_spill] sm:$0xff] }
 0x3f7   : > { %7213 = vrot.lane.b32.xlu1 %v4550_v39, %s8039_s19  ;;  %7243 = vrot.lane.b32.xlu0 %v6095_v44, %s8039_s19  ;;  %v6197_v28 = vsel %vm6190_vm11, %v6193_v49, %v6196_v55  ;;  %v1331_v25 = vxor.u32 2147483648, %v12437_v19  ;;  %vm12438_vm3 = vnez %v12209_v57  ;;  %vm1427_vm6 = vweird.f32 %v12439_v36  ;;  %v12449_v39 = vld [vmem:[#allocation91_spill] sm:$0xff] }
 0x3f8   : > { %v1424_v9 = vsel %vm12438_vm3, 0, %v9968_v12  ;;  %v6198_v42 = vsel %vm2883_vm13, nan, %v6197_v28  ;;  %v1325_v45 = vand.u32 3, %v1324_v3  ;;  %v1432_v53 = vxor.u32 2147483648, %v12440_v30  ;;  %v12452_v28 = vld [vmem:[#allocation99_spill] sm:$0xff] }
 0x3f9   : > { %v1428_v34 = vadd.s32 3, %v1424_v9  ;;  %v1435_v29 = vxor.u32 2147483648, %v12441_v51  ;;  %vm12444_vm15 = vnez %v12443_v32  ;;  %vm2987_vm5 = vweird.f32 %v12445_v11 }
 0x3fa   : > { %v2984_v22 = vsel %vm12444_vm15, 0, %v12442_v5  ;;  %v2992_v57 = vxor.u32 2147483648, %v12446_v13  ;;  %vm1326_vm12 = vcmp.lt.s32.totalorder %v1325_v45, 2  ;;  %vm1327_vm7 = vcmp.eq.s32.totalorder %v1325_v45, 0 }
 0x3fb   : > { %vm1330_vm1 = vcmp.eq.s32.totalorder %v1325_v45, 2  ;;  %v1429_v12 = vand.u32 3, %v1428_v34  ;;  %7245 = vrot.lane.b32.xlu1 %v6198_v42, %s8039_s19  ;;  %v1329_v58 = vsel %vm1327_vm7, %v12437_v19, %v1328_v0  ;;  %v2988_v18 = vadd.s32 3, %v2984_v22 }
 0x3fc   : > { %v1332_v20 = vsel %vm1330_vm1, %v1331_v25, %v12436_v61  ;;  %v2995_v63 = vxor.u32 2147483648, %v12447_v47  ;;  %vm12450_vm4 = vnez %v12449_v39  ;;  %vm3091_vm14 = vweird.f32 %v12451_v41 }
 0x3fd   : > { %v1333_v56 = vsel %vm1326_vm12, %v1329_v58, %v1332_v20  ;;  %vm1430_vm13 = vcmp.lt.s32.totalorder %v1429_v12, 2  ;;  %vm1431_vm8 = vcmp.eq.s32.totalorder %v1429_v12, 0  ;;  %vm1434_vm11 = vcmp.eq.s32.totalorder %v1429_v12, 2 }
 0x3fe   : > { %v1334_v10 = vsel %vm1323_vm10, nan, %v1333_v56  ;;  %v1433_v50 = vsel %vm1431_vm8, %v12441_v51, %v1432_v53  ;;  %v1436_v46 = vsel %vm1434_vm11, %v1435_v29, %v12440_v30  ;;  %v2989_v8 = vand.u32 3, %v2988_v18  ;;  %v12453_v18 = vld [vmem:[#allocation96_spill] sm:$0xff]  ;;  %v12454_v56 = vld [vmem:[#allocation95_spill] sm:$0xff] }
 0x3ff   : > { %7071 = vrot.lane.b32.xlu0 %v1334_v10, %s8038_s18  ;;  %v1437_v17 = vsel %vm1430_vm13, %v1433_v50, %v1436_v46  ;;  %v3088_v14 = vsel %vm12450_vm4, 0, %v12448_v62  ;;  %v3096_v16 = vxor.u32 2147483648, %v10183_v24  ;;  %v3099_v42 = vxor.u32 2147483648, %v12452_v28 }
 0x400   : > { %v1438_v49 = vsel %vm1427_vm6, nan, %v1437_v17  ;;  %vm2990_vm3 = vcmp.lt.s32.totalorder %v2989_v8, 2  ;;  %vm2991_vm15 = vcmp.eq.s32.totalorder %v2989_v8, 0  ;;  %vm2994_vm12 = vcmp.eq.s32.totalorder %v2989_v8, 2 }
 0x401   : > { %7073 = vrot.lane.b32.xlu1 %v1438_v49, %s8038_s18  ;;  %v2993_v44 = vsel %vm2991_vm15, %v12447_v47, %v2992_v57  ;;  %v2996_v55 = vsel %vm2994_vm12, %v2995_v63, %v12446_v13  ;;  %v3092_v3 = vadd.s32 3, %v3088_v14  ;;  %v4644_v34 = vand.u32 3, %v11233_v59 }
 0x402   : > { %v2997_v45 = vsel %vm2990_vm3, %v2993_v44, %v2996_v55  ;;  %v4747_v5 = vand.u32 3, %v1424_v9  ;;  %v6292_v32 = vand.u32 3, %v2984_v22  ;;  %v6395_v20 = vand.u32 3, %v3088_v14  ;;  %v12461_v55 = vld [vmem:[#allocation81_spill] sm:$0xff] }
 0x403   : > { %v2998_v12 = vsel %vm2987_vm5, nan, %v2997_v45  ;;  %v3093_v58 = vand.u32 3, %v3092_v3  ;;  %vm12455_vm7 = vnez %v12454_v56  ;;  %vm4645_vm1 = vcmp.lt.s32.totalorder %v4644_v34, 2  ;;  %v12463_v45 = vld [vmem:[#allocation110_spill] sm:$0xff] }
 0x404   : > { %v11314_v10 = vsel %vm12455_vm7, 0, %v12453_v18  ;;  %7103 = vrot.lane.b32.xlu0 %v2998_v12, %s8038_s18  ;;  %vm4646_vm13 = vcmp.eq.s32.totalorder %v4644_v34, 0  ;;  %vm4649_vm8 = vcmp.eq.s32.totalorder %v4644_v34, 2  ;;  %vm4748_vm11 = vcmp.lt.s32.totalorder %v4747_v5, 2 }
 0x405   : > { %vm3094_vm4 = vcmp.lt.s32.totalorder %v3093_v58, 2  ;;  %vm3095_vm3 = vcmp.eq.s32.totalorder %v3093_v58, 0  ;;  %vm3098_vm15 = vcmp.eq.s32.totalorder %v3093_v58, 2  ;;  %v4648_v59 = vsel %vm4646_vm13, %v12437_v19, %v1328_v0  ;;  %v12467_v58 = vld [vmem:[#allocation76_spill] sm:$0xff] }
 0x406   : > { %v3097_v9 = vsel %vm3095_vm3, %v12452_v28, %v3096_v16  ;;  %v3100_v22 = vsel %vm3098_vm15, %v3099_v42, %v10183_v24  ;;  %v4651_v50 = vsel %vm4649_vm8, %v1331_v25, %v12436_v61  ;;  %vm4749_vm12 = vcmp.eq.s32.totalorder %v4747_v5, 0 }
 0x407   : > { %v3101_v46 = vsel %vm3094_vm4, %v3097_v9, %v3100_v22  ;;  %v4652_v8 = vsel %vm4645_vm1, %v4648_v59, %v4651_v50  ;;  %v4751_v17 = vsel %vm4749_vm12, %v12441_v51, %v1432_v53  ;;  %vm4752_vm7 = vcmp.eq.s32.totalorder %v4747_v5, 2  ;;  %v12456_v51 = vld [vmem:[#allocation74_spill] sm:$0xff]  ;;  %v12464_v5 = vld [vmem:[#allocation101_spill] sm:$0xff] }
 0x408   : > { %v3102_v62 = vsel %vm3091_vm14, nan, %v3101_v46  ;;  %v4653_v39 = vsel %vm1323_vm10, nan, %v4652_v8  ;;  %v4754_v0 = vsel %vm4752_vm7, %v1435_v29, %v12440_v30  ;;  %vm6293_vm13 = vcmp.lt.s32.totalorder %v6292_v32, 2  ;;  %v12469_v22 = vld [vmem:[#allocation106_spill] sm:$0xff] }
 0x409   : > { %7105 = vrot.lane.b32.xlu1 %v3102_v62, %s8038_s18  ;;  %7215 = vrot.lane.b32.xlu0 %v4653_v39, %s8039_s19  ;;  %v4755_v61 = vsel %vm4748_vm11, %v4751_v17, %v4754_v0  ;;  %vm6294_vm1 = vcmp.eq.s32.totalorder %v6292_v32, 0  ;;  %vm6297_vm8 = vcmp.eq.s32.totalorder %v6292_v32, 2  ;;  %vm6396_vm4 = vcmp.lt.s32.totalorder %v6395_v20, 2  ;;  %v12465_v32 = vld [vmem:[#allocation98_spill] sm:$0xff] }
 0x40a   : > { %v4756_v19 = vsel %vm1427_vm6, nan, %v4755_v61  ;;  %v6296_v48 = vsel %vm6294_vm1, %v12447_v47, %v2992_v57  ;;  %v6299_v25 = vsel %vm6297_vm8, %v2995_v63, %v12446_v13  ;;  %vm6397_vm10 = vcmp.eq.s32.totalorder %v6395_v20, 0  ;;  %v12457_v57 = vld [vmem:[#allocation100_spill] sm:$0xff]  ;;  %v12458_v63 = vld [vmem:[#allocation102_spill] sm:$0xff]  ;;  %v12470_v61 = vld [vmem:[#allocation105_spill] sm:$0xff] }
 0x40b   : > { %v6300_v30 = vsel %vm6293_vm13, %v6296_v48, %v6299_v25  ;;  %v6399_v53 = vsel %vm6397_vm10, %v12452_v28, %v3096_v16  ;;  %vm6400_vm3 = vcmp.eq.s32.totalorder %v6395_v20, 2  ;;  %vm1531_vm15 = vweird.f32 %v12456_v51  ;;  %v12459_v16 = vld [vmem:[#allocation104_spill] sm:$0xff]  ;;  %v12468_v20 = vld [vmem:[#allocation107_spill] sm:$0xff] }
 0x40c   : > { %v6301_v29 = vsel %vm2987_vm5, nan, %v6300_v30  ;;  %v6402_v14 = vsel %vm6400_vm3, %v3099_v42, %v10183_v24  ;;  %v1532_v36 = vadd.s32 3, %v11314_v10  ;;  %v1536_v49 = vxor.u32 2147483648, %v10193_v52  ;;  %v12462_v28 = vld [vmem:[#allocation112_spill] sm:$0xff] }
 0x40d   : > { %7217 = vrot.lane.b32.xlu1 %v4756_v19, %s8039_s19  ;;  %7247 = vrot.lane.b32.xlu0 %v6301_v29, %s8039_s19  ;;  %v6403_v13 = vsel %vm6396_vm4, %v6399_v53, %v6402_v14  ;;  %v1539_v47 = vxor.u32 2147483648, %v12457_v57  ;;  %vm12460_vm6 = vnez %v12459_v16  ;;  %vm1635_vm11 = vweird.f32 %v12461_v55  ;;  %v12472_v25 = vld [vmem:[#allocation88_spill] sm:$0xff] }
 0x40e   : > { %v1632_v44 = vsel %vm12460_vm6, 0, %v12458_v63  ;;  %v6404_v24 = vsel %vm3091_vm14, nan, %v6403_v13  ;;  %v1533_v11 = vand.u32 3, %v1532_v36  ;;  %v1640_v42 = vxor.u32 2147483648, %v12462_v28  ;;  %v12473_v30 = vld [vmem:[#allocation116_spill] sm:$0xff]  ;;  %v12474_v63 = vld [vmem:[#allocation115_spill] sm:$0xff] }
 0x40f   : > { %v1636_v3 = vadd.s32 3, %v1632_v44  ;;  %v1643_v34 = vxor.u32 2147483648, %v12463_v45  ;;  %vm12466_vm5 = vnez %v12465_v32  ;;  %vm3195_vm12 = vweird.f32 %v12467_v58  ;;  %v12484_v58 = vld [vmem:[#allocation103_spill] sm:$0xff] }
 0x410   : > { %v3192_v12 = vsel %vm12466_vm5, 0, %v12464_v5  ;;  %v3200_v18 = vxor.u32 2147483648, %v12468_v20  ;;  %vm1534_vm7 = vcmp.lt.s32.totalorder %v1533_v11, 2  ;;  %vm1535_vm13 = vcmp.eq.s32.totalorder %v1533_v11, 0 }
 0x411   : > { %vm1538_vm1 = vcmp.eq.s32.totalorder %v1533_v11, 2  ;;  %v1637_v56 = vand.u32 3, %v1636_v3  ;;  %7249 = vrot.lane.b32.xlu1 %v6404_v24, %s8039_s19  ;;  %v1537_v41 = vsel %vm1535_vm13, %v12457_v57, %v1536_v49  ;;  %v3196_v9 = vadd.s32 3, %v3192_v12 }
 0x412   : > { %v1540_v59 = vsel %vm1538_vm1, %v1539_v47, %v10193_v52  ;;  %v3203_v50 = vxor.u32 2147483648, %v12469_v22  ;;  %v3296_v48 = vsel %vm10343_vm9, 0, %v12470_v61  ;;  %vm3299_vm10 = vweird.f32 %v12472_v25  ;;  %v11413_v61 = vpop.permute.xlu1 %7089 }
 0x413   : > { %v1541_v46 = vsel %vm1534_vm7, %v1537_v41, %v1540_v59  ;;  %vm1638_vm14 = vcmp.lt.s32.totalorder %v1637_v56, 2  ;;  %vm1639_vm8 = vcmp.eq.s32.totalorder %v1637_v56, 0  ;;  %vm1642_vm4 = vcmp.eq.s32.totalorder %v1637_v56, 2  ;;  %v12475_v59 = vld [vmem:[#allocation113_spill] sm:$0xff] }
 0x414   : > { %v1542_v8 = vsel %vm1531_vm15, nan, %v1541_v46  ;;  %v1641_v17 = vsel %vm1639_vm8, %v12463_v45, %v1640_v42  ;;  %v1644_v62 = vsel %vm1642_vm4, %v1643_v34, %v12462_v28  ;;  %v3197_v39 = vand.u32 3, %v3196_v9  ;;  %v12476_v9 = vld [vmem:[#allocation111_spill] sm:$0xff] }
 0x415   : > { %7075 = vrot.lane.b32.xlu0 %v1542_v8, %s8038_s18  ;;  %v1645_v0 = vsel %vm1638_vm14, %v1641_v17, %v1644_v62  ;;  %v3304_v53 = vxor.u32 2147483648, %v12473_v30  ;;  %v3300_v13 = vadd.s32 3, %v3296_v48  ;;  %v3307_v16 = vxor.u32 2147483648, %v12474_v63 }
 0x416   : > { %v1646_v29 = vsel %vm1635_vm11, nan, %v1645_v0  ;;  %vm3198_vm3 = vcmp.lt.s32.totalorder %v3197_v39, 2  ;;  %vm3199_vm6 = vcmp.eq.s32.totalorder %v3197_v39, 0  ;;  %vm3202_vm5 = vcmp.eq.s32.totalorder %v3197_v39, 2 }
 0x417   : > { %7077 = vrot.lane.b32.xlu1 %v1646_v29, %s8038_s18  ;;  %v3201_v14 = vsel %vm3199_vm6, %v12469_v22, %v3200_v18  ;;  %v3204_v36 = vsel %vm3202_vm5, %v3203_v50, %v12468_v20  ;;  %v4850_v11 = vand.u32 3, %v11314_v10  ;;  %v4953_v3 = vand.u32 3, %v1632_v44  ;;  %v11405_v44 = vpop.permute.xlu0 %7055 }
 0x418   : > { %v3205_v24 = vsel %vm3198_vm3, %v3201_v14, %v3204_v36  ;;  %v6498_v5 = vand.u32 3, %v3192_v12  ;;  %v3301_v56 = vand.u32 3, %v3300_v13  ;;  %v6601_v41 = vand.u32 3, %v3296_v48  ;;  %v12479_v14 = vld [vmem:[#allocation121_spill] sm:$0xff]  ;;  %v12482_v13 = vld [vmem:[#allocation120_spill] sm:$0xff] }
 0x419   : > { %v3206_v32 = vsel %vm3195_vm12, nan, %v3205_v24  ;;  %vm12477_vm9 = vnez %v12476_v9  ;;  %vm4851_vm7 = vcmp.lt.s32.totalorder %v4850_v11, 2  ;;  %vm4852_vm13 = vcmp.eq.s32.totalorder %v4850_v11, 0  ;;  %v12489_v9 = vld [vmem:[#allocation126_spill] sm:$0xff] }
 0x41a   : > { %v11399_v46 = vsel %vm12477_vm9, 0, %v12475_v59  ;;  %7107 = vrot.lane.b32.xlu0 %v3206_v32, %s8038_s18  ;;  %vm4855_vm1 = vcmp.eq.s32.totalorder %v4850_v11, 2  ;;  %vm4954_vm14 = vcmp.lt.s32.totalorder %v4953_v3, 2  ;;  %vm3302_vm8 = vcmp.lt.s32.totalorder %v3301_v56, 2  ;;  %v11450_v24 = vpop.permute.xlu1 %7201  ;;  %v12485_v32 = vld [vmem:[#allocation114_spill] sm:$0xff]  ;;  %v12488_v59 = vld [vmem:[#allocation97_spill] sm:$0xff] }
 0x41b   : > { %vm3303_vm4 = vcmp.eq.s32.totalorder %v3301_v56, 0  ;;  %vm3306_vm3 = vcmp.eq.s32.totalorder %v3301_v56, 2  ;;  %v4854_v10 = vsel %vm4852_vm13, %v12457_v57, %v1536_v49  ;;  %v4857_v17 = vsel %vm4855_vm1, %v1539_v47, %v10193_v52  ;;  %v12486_v56 = vld [vmem:[#allocation119_spill] sm:$0xff] }
 0x41c   : > { %v3305_v12 = vsel %vm3303_vm4, %v12474_v63, %v3304_v53  ;;  %v3308_v8 = vsel %vm3306_vm3, %v3307_v16, %v12473_v30  ;;  %vm4955_vm6 = vcmp.eq.s32.totalorder %v4953_v3, 0  ;;  %v4858_v39 = vsel %vm4851_vm7, %v4854_v10, %v4857_v17 }
 0x41d   : > { %v3309_v62 = vsel %vm3302_vm8, %v3305_v12, %v3308_v8  ;;  %v4957_v0 = vsel %vm4955_vm6, %v12463_v45, %v1640_v42  ;;  %vm4958_vm5 = vcmp.eq.s32.totalorder %v4953_v3, 2  ;;  %v4859_v19 = vsel %vm1531_vm15, nan, %v4858_v39  ;;  %v12478_v45 = vld [vmem:[#allocation93_spill] sm:$0xff] }
 0x41e   : > { %v3310_v49 = vsel %vm3299_vm10, nan, %v3309_v62  ;;  %v4960_v48 = vsel %vm4958_vm5, %v1643_v34, %v12462_v28  ;;  %vm6499_vm9 = vcmp.lt.s32.totalorder %v6498_v5, 2  ;;  %7219 = vrot.lane.b32.xlu0 %v4859_v19, %s8039_s19  ;;  %vm6500_vm7 = vcmp.eq.s32.totalorder %v6498_v5, 0  ;;  %v11435_v34 = vpop.permute.xlu0 %7087  ;;  %v12490_v62 = vld [vmem:[#allocation125_spill] sm:$0xff] }
 0x41f   : > { %7109 = vrot.lane.b32.xlu1 %v3310_v49, %s8038_s18  ;;  %v4961_v52 = vsel %vm4954_vm14, %v4957_v0, %v4960_v48  ;;  %vm6503_vm13 = vcmp.eq.s32.totalorder %v6498_v5, 2  ;;  %vm6602_vm1 = vcmp.lt.s32.totalorder %v6601_v41, 2  ;;  %v6502_v51 = vsel %vm6500_vm7, %v12469_v22, %v3200_v18  ;;  %v12480_v22 = vld [vmem:[#allocation117_spill] sm:$0xff] }
 0x420   : > { %v4962_v57 = vsel %vm1635_vm11, nan, %v4961_v52  ;;  %v6505_v47 = vsel %vm6503_vm13, %v3203_v50, %v12468_v20  ;;  %vm6603_vm15 = vcmp.eq.s32.totalorder %v6601_v41, 0  ;;  %vm6606_vm8 = vcmp.eq.s32.totalorder %v6601_v41, 2 }
 0x421   : > { %v6506_v28 = vsel %vm6499_vm9, %v6502_v51, %v6505_v47  ;;  %v6605_v42 = vsel %vm6603_vm15, %v12474_v63, %v3304_v53  ;;  %vm1739_vm14 = vweird.f32 %v12478_v45  ;;  %v6608_v29 = vsel %vm6606_vm8, %v3307_v16, %v12473_v30  ;;  %v12481_v53 = vld [vmem:[#allocation118_spill] sm:$0xff] }
 0x422   : > { %v6507_v55 = vsel %vm3195_vm12, nan, %v6506_v28  ;;  %v1740_v18 = vadd.s32 3, %v11399_v46  ;;  %v1744_v36 = vxor.u32 2147483648, %v12479_v14  ;;  %v6609_v20 = vsel %vm6602_vm1, %v6605_v42, %v6608_v29  ;;  %v11469_v0 = vpop.permute.xlu0 %7199  ;;  %v11479_v51 = vpop.permute.xlu1 %7233  ;;  %v12491_v28 = vld [vmem:[#allocation122_spill] sm:$0xff]  ;;  %v12492_v42 = vld [vmem:[#allocation124_spill] sm:$0xff] }
 0x423   : > { %7221 = vrot.lane.b32.xlu1 %v4962_v57, %s8039_s19  ;;  %7251 = vrot.lane.b32.xlu0 %v6507_v55, %s8039_s19  ;;  %v1747_v50 = vxor.u32 2147483648, %v12480_v22  ;;  %vm12483_vm11 = vnez %v12482_v13  ;;  %vm1843_vm12 = vweird.f32 %v12484_v58  ;;  %v6610_v30 = vsel %vm3299_vm10, nan, %v6609_v20  ;;  %v12494_v29 = vld [vmem:[#allocation108_spill] sm:$0xff] }
 0x424   : > { %v1840_v63 = vsel %vm12483_vm11, 0, %v12481_v53  ;;  %v1741_v16 = vand.u32 3, %v1740_v18  ;;  %v1848_v3 = vxor.u32 2147483648, %v10636_v40  ;;  %v1851_v5 = vxor.u32 2147483648, %v10632_v38 }
 0x425   : > { %v1844_v11 = vadd.s32 3, %v1840_v63  ;;  %vm12487_vm4 = vnez %v12486_v56  ;;  %vm3403_vm3 = vweird.f32 %v12488_v59  ;;  %v3408_v10 = vxor.u32 2147483648, %v12489_v9 }
 0x426   : > { %v3400_v41 = vsel %vm12487_vm4, 0, %v12485_v32  ;;  %vm1742_vm6 = vcmp.lt.s32.totalorder %v1741_v16, 2  ;;  %vm1743_vm5 = vcmp.eq.s32.totalorder %v1741_v16, 0  ;;  %vm1746_vm9 = vcmp.eq.s32.totalorder %v1741_v16, 2 }
 0x427   : > { %v1845_v12 = vand.u32 3, %v1844_v11  ;;  %7253 = vrot.lane.b32.xlu1 %v6610_v30, %s8039_s19  ;;  %v1745_v25 = vsel %vm1743_vm5, %v12480_v22, %v1744_v36  ;;  %v1748_v8 = vsel %vm1746_vm9, %v1747_v50, %v12479_v14  ;;  %v3404_v17 = vadd.s32 3, %v3400_v41 }
 0x428   : > { %v3411_v39 = vxor.u32 2147483648, %v12490_v62  ;;  %v1749_v49 = vsel %vm1742_vm6, %v1745_v25, %v1748_v8  ;;  %vm12493_vm1 = vnez %v12492_v42  ;;  %vm3507_vm15 = vweird.f32 %v12494_v29  ;;  %v11498_v25 = vpop.permute.xlu0 %7231 }
 0x429   : > { %vm1846_vm10 = vcmp.lt.s32.totalorder %v1845_v12, 2  ;;  %vm1847_vm7 = vcmp.eq.s32.totalorder %v1845_v12, 0  ;;  %vm1850_vm13 = vcmp.eq.s32.totalorder %v1845_v12, 2  ;;  %v1750_v19 = vsel %vm1739_vm14, nan, %v1749_v49 }
 0x42a   : > { %v1849_v48 = vsel %vm1847_vm7, %v10632_v38, %v1848_v3  ;;  %v1852_v52 = vsel %vm1850_vm13, %v1851_v5, %v10636_v40  ;;  %v3405_v57 = vand.u32 3, %v3404_v17  ;;  %7079 = vrot.lane.b32.xlu0 %v1750_v19, %s8038_s18  ;;  %v3504_v55 = vsel %vm12493_vm1, 0, %v12491_v28  ;;  %v12495_v19 = vld [vmem:[#allocation127_spill] sm:$0xff] }
 0x42b   : > { %v1853_v47 = vsel %vm1846_vm10, %v1849_v48, %v1852_v52  ;;  %v3512_v18 = vxor.u32 2147483648, %v10724_v26  ;;  %v3508_v30 = vadd.s32 3, %v3504_v55  ;;  %v3515_v16 = vxor.u32 2147483648, %v10717_v33 }
 0x42c   : > { %v1854_v20 = vsel %vm1843_vm12, nan, %v1853_v47  ;;  %vm3406_vm8 = vcmp.lt.s32.totalorder %v3405_v57, 2  ;;  %vm3407_vm11 = vcmp.eq.s32.totalorder %v3405_v57, 0  ;;  %vm3410_vm4 = vcmp.eq.s32.totalorder %v3405_v57, 2 }
 0x42d   : > { %7081 = vrot.lane.b32.xlu1 %v1854_v20, %s8038_s18  ;;  %v3409_v53 = vsel %vm3407_vm11, %v12490_v62, %v3408_v10  ;;  %v3412_v13 = vsel %vm3410_vm4, %v3411_v39, %v12489_v9  ;;  %v5056_v32 = vand.u32 3, %v11399_v46  ;;  %v5159_v56 = vand.u32 3, %v1840_v63  ;;  %v11508_v46 = vpop.permute.xlu1 %7059 }
 0x42e   : > { %v3413_v11 = vsel %vm3406_vm8, %v3409_v53, %v3412_v13  ;;  %v6704_v12 = vand.u32 3, %v3400_v41  ;;  %v3509_v17 = vand.u32 3, %v3508_v30  ;;  %v6807_v49 = vand.u32 3, %v3504_v55 }
 0x42f   : > { %v3414_v8 = vsel %vm3403_vm3, nan, %v3413_v11  ;;  %v11505_v48 = vsel %vm10695_vm0, 0, %v12495_v19  ;;  %vm5057_vm6 = vcmp.lt.s32.totalorder %v5056_v32, 2  ;;  %vm5058_vm5 = vcmp.eq.s32.totalorder %v5056_v32, 0 }
 0x430   : > { %7111 = vrot.lane.b32.xlu0 %v3414_v8, %s8038_s18  ;;  %vm5061_vm9 = vcmp.eq.s32.totalorder %v5056_v32, 2  ;;  %vm5160_vm10 = vcmp.lt.s32.totalorder %v5159_v56, 2  ;;  %vm3510_vm7 = vcmp.lt.s32.totalorder %v3509_v17, 2  ;;  %vm3511_vm13 = vcmp.eq.s32.totalorder %v3509_v17, 0 }
 0x431   : > { %vm3514_vm1 = vcmp.eq.s32.totalorder %v3509_v17, 2  ;;  %v5060_v63 = vsel %vm5058_vm5, %v12480_v22, %v1744_v36  ;;  %v3513_v23 = vsel %vm3511_vm13, %v10717_v33, %v3512_v18  ;;  %v5063_v52 = vsel %vm5061_vm9, %v1747_v50, %v12479_v14  ;;  %v11529_v14 = vpop.permute.xlu0 %7057 }
 0x432   : > { %v3516_v41 = vsel %vm3514_vm1, %v3515_v16, %v10724_v26  ;;  %vm5161_vm0 = vcmp.eq.s32.totalorder %v5159_v56, 0  ;;  %v5064_v47 = vsel %vm5057_vm6, %v5060_v63, %v5063_v52  ;;  %vm5164_vm8 = vcmp.eq.s32.totalorder %v5159_v56, 2 }
 0x433   : > { %v3517_v57 = vsel %vm3510_vm7, %v3513_v23, %v3516_v41  ;;  %v5163_v28 = vsel %vm5161_vm0, %v10632_v38, %v1848_v3  ;;  %v5065_v42 = vsel %vm1739_vm14, nan, %v5064_v47  ;;  %v5166_v22 = vsel %vm5164_vm8, %v1851_v5, %v10636_v40  ;;  %v11542_v3 = vpop.permute.xlu1 %7061 }
 0x434   : > { %v3518_v36 = vsel %vm3507_vm15, nan, %v3517_v57  ;;  %vm6705_vm11 = vcmp.lt.s32.totalorder %v6704_v12, 2  ;;  %7223 = vrot.lane.b32.xlu0 %v5065_v42, %s8039_s19  ;;  %v5167_v50 = vsel %vm5160_vm10, %v5163_v28, %v5166_v22  ;;  %vm6706_vm4 = vcmp.eq.s32.totalorder %v6704_v12, 0  ;;  %v12499_v57 = vld [vmem:[#allocation7_spill] sm:$0xff] }
 0x435   : > { %7113 = vrot.lane.b32.xlu1 %v3518_v36, %s8038_s18  ;;  %vm6709_vm6 = vcmp.eq.s32.totalorder %v6704_v12, 2  ;;  %vm6808_vm5 = vcmp.lt.s32.totalorder %v6807_v49, 2  ;;  %v5168_v45 = vsel %vm1843_vm12, nan, %v5167_v50  ;;  %v6708_v38 = vsel %vm6706_vm4, %v12490_v62, %v3408_v10  ;;  %v11569_v30 = vpop.permute.xlu0 %7091  ;;  %v12501_v28 = vld [vmem:[#allocation123_spill] sm:$0xff] }
 0x436   : > { %v6711_v40 = vsel %vm6709_vm6, %v3411_v39, %v12489_v9  ;;  %vm6809_vm14 = vcmp.eq.s32.totalorder %v6807_v49, 0  ;;  %vm6812_vm12 = vcmp.eq.s32.totalorder %v6807_v49, 2  ;;  %vm1947_vm9 = vweird.f32 %v10430_v21  ;;  %v12502_v36 = vld [vmem:[#allocation23_spill] sm:$0xff] }
 0x437   : > { %v6712_v5 = vsel %vm6705_vm11, %v6708_v38, %v6711_v40  ;;  %v6811_v58 = vsel %vm6809_vm14, %v10717_v33, %v3512_v18  ;;  %v6814_v9 = vsel %vm6812_vm12, %v3515_v16, %v10724_v26  ;;  %v1948_v62 = vadd.s32 3, %v11505_v48  ;;  %v12496_v18 = vld [vmem:[#allocation6_spill] sm:$0xff] }
 0x438   : > { %v6713_v10 = vsel %vm3403_vm3, nan, %v6712_v5  ;;  %v1952_v39 = vxor.u32 2147483648, %v10813_v60  ;;  %v6815_v55 = vsel %vm6808_vm5, %v6811_v58, %v6814_v9  ;;  %v1955_v33 = vxor.u32 2147483648, %v10804_v1 }
 0x439   : > { %7225 = vrot.lane.b32.xlu1 %v5168_v45, %s8039_s19  ;;  %7255 = vrot.lane.b32.xlu0 %v6713_v10, %s8039_s19  ;;  %vm12497_vm10 = vcmask 23552   ;;  %vm2051_vm3 = vweird.f32 %v10492_v27  ;;  %v6816_v26 = vsel %vm3507_vm15, nan, %v6815_v55  ;;  %v1949_v59 = vand.u32 3, %v1948_v62 }
 0x43a   : > { %v7312_v20 = vsel %vm12497_vm10, %v12496_v18, %v11405_v44  ;;  %v2053_v53 = vand.u32 3, %v10750_v15  ;;  %v2056_v13 = vxor.u32 2147483648, %v10932_v37  ;;  %v2059_v16 = vxor.u32 2147483648, %v10919_v54  ;;  %v11579_v15 = vpop.permute.xlu1 %7093  ;;  %v11595_v17 = vpop.permute.xlu0 %7203  ;;  %vm12498_vm11 = vmmov %vm12497_vm10 }
 0x43b   : > { %7344 = vst [vmem:[%s11547_s23] sm:$0xff] %v7312_v20  ;;  %v11575_v11 = vsel %vm10910_vm2, 0, %v10847_v35  ;;  %vm3611_vm7 = vweird.f32 %v10589_v31  ;;  %v3616_v29 = vxor.u32 2147483648, %v11034_v7  ;;  %vm1950_vm15 = vcmp.lt.s32.totalorder %v1949_v59, 2  ;;  %vm12500_vm4 = vmmov %vm12497_vm10 }
 0x43c   : > { %vm1951_vm13 = vcmp.eq.s32.totalorder %v1949_v59, 0  ;;  %vm1954_vm1 = vcmp.eq.s32.totalorder %v1949_v59, 2  ;;  %vm2054_vm0 = vcmp.lt.s32.totalorder %v2053_v53, 2  ;;  %vm2055_vm2 = vcmp.eq.s32.totalorder %v2053_v53, 0  ;;  %v12503_v59 = vld [vmem:[#allocation128_spill] sm:$0xff] }
 0x43d   : > { %7257 = vrot.lane.b32.xlu1 %v6816_v26, %s8039_s19  ;;  %v1953_v32 = vsel %vm1951_vm13, %v10804_v1, %v1952_v39  ;;  %v1956_v35 = vsel %vm1954_vm1, %v1955_v33, %v10813_v60  ;;  %vm2058_vm8 = vcmp.eq.s32.totalorder %v2053_v53, 2  ;;  %v2057_v56 = vsel %vm2055_vm2, %v10919_v54, %v2056_v13 }
 0x43e   : > { %v1957_v6 = vsel %vm1950_vm15, %v1953_v32, %v1956_v35  ;;  %v2060_v12 = vsel %vm2058_vm8, %v2059_v16, %v10932_v37  ;;  %v3612_v8 = vadd.s32 3, %v11575_v11  ;;  %v3619_v63 = vxor.u32 2147483648, %v11022_v2  ;;  %v11616_v45 = vpop.permute.xlu1 %7205  ;;  %v11624_v40 = vpop.permute.xlu0 %7235 }
 0x43f   : > { %v1958_v49 = vsel %vm1947_vm9, nan, %v1957_v6  ;;  %v2061_v19 = vsel %vm2054_vm0, %v2057_v56, %v2060_v12  ;;  %v7127_v23 = vsel %vm12498_vm11, %v11435_v34, %v11413_v61  ;;  %v7320_v47 = vsel %vm12500_vm4, %v12499_v57, %v11435_v34 }
 0x440   : > { %7083 = vrot.lane.b32.xlu0 %v1958_v49, %s8038_s18  ;;  %v2062_v41 = vsel %vm2051_vm3, nan, %v2061_v19  ;;  %v3613_v52 = vand.u32 3, %v3612_v8  ;;  %vm3715_vm6 = vweird.f32 %v12501_v28  ;;  %7369 = vst [vmem:[%s11547_s23 + $0xc0] sm:$0xff] %v7320_v47  ;;  %v3717_v42 = vand.u32 3, %v12502_v36  ;;  %v12509_v19 = vld [vmem:[#allocation9_spill] sm:$0xff] }
 0x441   : > { %7085 = vrot.lane.b32.xlu1 %v2062_v41, %s8038_s18  ;;  %v3720_v22 = vxor.u32 2147483648, %v11106_v4  ;;  %v3723_v61 = vxor.u32 2147483648, %v11099_v43  ;;  %v5262_v50 = vand.u32 3, %v11505_v48  ;;  %vm7263_vm10 = vcmask 179200  }
 0x442   : > { %vm3614_vm5 = vcmp.lt.s32.totalorder %v3613_v52, 2  ;;  %vm3615_vm14 = vcmp.eq.s32.totalorder %v3613_v52, 0  ;;  %vm3618_vm12 = vcmp.eq.s32.totalorder %v3613_v52, 2  ;;  %vm3718_vm15 = vcmp.lt.s32.totalorder %v3717_v42, 2  ;;  %v7238_v32 = vpop.permute.xlu1 %7237 }
 0x443   : > { %v3617_v34 = vsel %vm3615_vm14, %v11022_v2, %v3616_v29  ;;  %v3620_v38 = vsel %vm3618_vm12, %v3619_v63, %v11034_v7  ;;  %vm3719_vm13 = vcmp.eq.s32.totalorder %v3717_v42, 0  ;;  %vm3722_vm1 = vcmp.eq.s32.totalorder %v3717_v42, 2 }
 0x444   : > { %v3621_v5 = vsel %vm3614_vm5, %v3617_v34, %v3620_v38  ;;  %v3721_v48 = vsel %vm3719_vm13, %v11099_v43, %v3720_v22  ;;  %vm5263_vm0 = vcmp.lt.s32.totalorder %v5262_v50, 2  ;;  %v3724_v10 = vsel %vm3722_vm1, %v3723_v61, %v11106_v4 }
 0x445   : > { %v3622_v58 = vsel %vm3611_vm7, nan, %v3621_v5  ;;  %vm5264_vm2 = vcmp.eq.s32.totalorder %v5262_v50, 0  ;;  %vm5267_vm8 = vcmp.eq.s32.totalorder %v5262_v50, 2  ;;  %v3725_v9 = vsel %vm3718_vm15, %v3721_v48, %v3724_v10  ;;  %v7064_v35 = vpop.permute.xlu0 %7063  ;;  %v8013_v50 = vld [vmem:[%s8072_s17 + $0x18] sm:$0xff] }
 0x446   : > { %7115 = vrot.lane.b32.xlu0 %v3622_v58, %s8038_s18  ;;  %v5266_v62 = vsel %vm5264_vm2, %v10804_v1, %v1952_v39  ;;  %v5269_v55 = vsel %vm5267_vm8, %v1955_v33, %v10813_v60  ;;  %vm7346_vm11 = vcmask 334848   ;;  %v3726_v18 = vsel %vm3715_vm6, nan, %v3725_v9  ;;  %v8014_v48 = vld [vmem:[%s8072_s17 + $0x58] sm:$0xff] }
 0x447   : > { %v5270_v20 = vsel %vm5263_vm0, %v5266_v62, %v5269_v55  ;;  %v7264_v26 = vsel %vm7263_vm10, %v11469_v0, %v11450_v24  ;;  %v5365_v53 = vand.u32 3, %v12503_v59  ;;  %7117 = vrot.lane.b32.xlu1 %v3726_v18, %s8038_s18  ;;  %v6910_v60 = vand.u32 3, %v11575_v11  ;;  %v12504_v24 = vld [vmem:[#allocation4_spill] sm:$0xff]  ;;  %v7066_v12 = vpop.permute.xlu1 %7065 }
 0x448   : > { %v5271_v1 = vsel %vm1947_vm9, nan, %v5270_v20  ;;  %7347 = vst.msk [vmem:[%s11547_s23 + $0x10] sm:$0xff] %vm7346_vm11, %v7264_v26  ;;  %v7272_v39 = vsel %vm7263_vm10, %v11498_v25, %v11479_v51  ;;  %v7336_v33 = vsel %vm7263_vm10, %v7127_v23, %v11498_v25  ;;  %v7013_v21 = vand.u32 3, %v12504_v24 }
 0x449   : > { %vm5366_vm4 = vcmp.lt.s32.totalorder %v5365_v53, 2  ;;  %vm5367_vm5 = vcmp.eq.s32.totalorder %v5365_v53, 0  ;;  %vm5370_vm14 = vcmp.eq.s32.totalorder %v5365_v53, 2  ;;  %7370 = vst [vmem:[%s11547_s23 + $0xc8] sm:$0xff] %v7336_v33  ;;  %7371 = vst.msk [vmem:[%s11547_s23 + $0xd0] sm:$0xff] %vm7346_vm11, %v7272_v39  ;;  %vm6911_vm9 = vcmp.lt.s32.totalorder %v6910_v60, 2 }
 0x44a   : > { %7227 = vrot.lane.b32.xlu0 %v5271_v1, %s8039_s19  ;;  %v5369_v11 = vsel %vm5367_vm5, %v10919_v54, %v2056_v13  ;;  %v5372_v51 = vsel %vm5370_vm14, %v2059_v16, %v10932_v37  ;;  %vm6912_vm12 = vcmp.eq.s32.totalorder %v6910_v60, 0  ;;  %vm6915_vm15 = vcmp.eq.s32.totalorder %v6910_v60, 2  ;;  %v8015_v39 = vld [vmem:[%s8072_s17 + $0x20] sm:$0xff] }
 0x44b   : > { %v5373_v25 = vsel %vm5366_vm4, %v5369_v11, %v5372_v51  ;;  %v6914_v6 = vsel %vm6912_vm12, %v11022_v2, %v3616_v29  ;;  %vm7014_vm13 = vcmp.lt.s32.totalorder %v7013_v21, 2  ;;  %v6917_v13 = vsel %vm6915_vm15, %v3619_v63, %v11034_v7  ;;  %v12505_v29 = vld [vmem:[#allocation8_spill] sm:$0xff]  ;;  %v8016_v51 = vld [vmem:[%s8072_s17 + $0x60] sm:$0xff] }
 0x44c   : > { %v5374_v56 = vsel %vm2051_vm3, nan, %v5373_v25  ;;  %vm7015_vm1 = vcmp.eq.s32.totalorder %v7013_v21, 0  ;;  %vm7018_vm0 = vcmp.eq.s32.totalorder %v7013_v21, 2  ;;  %v6918_v54 = vsel %vm6911_vm9, %v6914_v6, %v6917_v13 }
 0x44d   : > { %7229 = vrot.lane.b32.xlu1 %v5374_v56, %s8039_s19  ;;  %v7017_v37 = vsel %vm7015_vm1, %v11099_v43, %v3720_v22  ;;  %v7020_v16 = vsel %vm7018_vm0, %v3723_v61, %v11106_v4  ;;  %vm12506_vm2 = vcmask 23552   ;;  %v6919_v2 = vsel %vm3611_vm7, nan, %v6918_v54  ;;  %v7096_v4 = vpop.permute.xlu0 %7095 }
 0x44e   : > { %v7313_v27 = vsel %vm12506_vm2, %v12505_v29, %v11508_v46  ;;  %v7021_v7 = vsel %vm7014_vm13, %v7017_v37, %v7020_v16  ;;  %vm12507_vm3 = vmmov %vm12506_vm2  ;;  %7259 = vrot.lane.b32.xlu0 %v6919_v2, %s8039_s19  ;;  %v7273_v63 = vsel %vm7263_vm10, %v11624_v40, %v7238_v32  ;;  %v394_v58 = vmul.f32 0.1, %v8014_v48 }
 0x44f   : > { %7348 = vst [vmem:[%s11547_s23 + $0x18] sm:$0xff] %v7313_v27  ;;  %v7119_v8 = vsel %vm12507_vm3, %v11405_v44, %v11529_v14  ;;  %vm12508_vm8 = vmmov %vm12506_vm2  ;;  %v7022_v31 = vsel %vm3715_vm6, nan, %v7021_v7  ;;  %v7098_v52 = vpop.permute.xlu1 %7097  ;;  %v387_v33 = vmul.f32 0.1, %v8015_v39  ;;  %v395_v25 = vmul.f32 0.1, %v8016_v51 }
 0x450   : > { %v7120_v43 = vsel %vm12508_vm8, %v11508_v46, %v11542_v3  ;;  %v7328_v49 = vsel %vm7263_vm10, %v7119_v8, %v11469_v0  ;;  %vm12510_vm7 = vmmov %vm12506_vm2  ;;  %v7265_v3 = vsel %vm7263_vm10, %v11595_v17, %v11616_v45  ;;  %7374 = vst.msk [vmem:[%s11547_s23 + $0xe8] sm:$0xff] %vm7346_vm11, %v7273_v63  ;;  %v386_v45 = vmul.f32 0.1, %v8013_v50 }
 0x451   : > { %v7321_v44 = vsel %vm12510_vm7, %v12509_v19, %v11569_v30  ;;  %vm12511_vm4 = vmmov %vm12506_vm2  ;;  %7345 = vst [vmem:[%s11547_s23 + $0x8] sm:$0xff] %v7328_v49  ;;  %v7329_v14 = vsel %vm7263_vm10, %v7120_v43, %v11595_v17  ;;  %7261 = vrot.lane.b32.xlu1 %v7022_v31, %s8039_s19  ;;  %v12514_v17 = vld [vmem:[#allocation12_spill] sm:$0xff]  ;;  %v7208_v57 = vpop.permute.xlu0 %7207  ;;  %v8017_v43 = vld [vmem:[%s8072_s17 + $0x28] sm:$0xff] }
 0x452   : > { %v7128_v46 = vsel %vm12511_vm4, %v11569_v30, %v11579_v15  ;;  %7372 = vst [vmem:[%s11547_s23 + $0xd8] sm:$0xff] %v7321_v44  ;;  %7349 = vst [vmem:[%s11547_s23 + $0x20] sm:$0xff] %v7329_v14  ;;  %v12512_v30 = vld [vmem:[#allocation10_spill] sm:$0xff] }
 0x453   : > { %v7337_v0 = vsel %vm7263_vm10, %v7128_v46, %v11624_v40  ;;  %7350 = vst.msk [vmem:[%s11547_s23 + $0x28] sm:$0xff] %vm7346_vm11, %v7265_v3  ;;  %vm12513_vm6 = vmmov %vm12506_vm2  ;;  %v7210_v36 = vpop.permute.xlu1 %7209  ;;  %v8018_v46 = vld [vmem:[%s8072_s17 + $0x68] sm:$0xff] }
 0x454   : > { %7373 = vst [vmem:[%s11547_s23 + $0xe0] sm:$0xff] %v7337_v0  ;;  %v7314_v15 = vsel %vm12513_vm6, %v12512_v30, %v7064_v35  ;;  %vm12515_vm5 = vmmov %vm12506_vm2  ;;  %v7266_v22 = vsel %vm7263_vm10, %v7208_v57, %v7210_v36  ;;  %v396_v14 = vmul.f32 0.1, %v8018_v46  ;;  %v8019_v36 = vld [vmem:[%s8072_s17 + $0x30] sm:$0xff] }
 0x455   : > { %v7322_v23 = vsel %vm12515_vm5, %v12514_v17, %v7096_v4  ;;  %7351 = vst [vmem:[%s11547_s23 + $0x30] sm:$0xff] %v7314_v15  ;;  %vm12516_vm14 = vmmov %vm12506_vm2  ;;  %v7240_v42 = vpop.permute.xlu0 %7239 }
 0x456   : > { %7375 = vst [vmem:[%s11547_s23 + $0xf0] sm:$0xff] %v7322_v23  ;;  %v7121_v41 = vsel %vm12516_vm14, %v7064_v35, %v7066_v12  ;;  %vm12517_vm9 = vmmov %vm12506_vm2 }
 0x457   : > { %v7330_v47 = vsel %vm7263_vm10, %v7121_v41, %v7208_v57  ;;  %v7129_v28 = vsel %vm12517_vm9, %v7096_v4, %v7098_v52  ;;  %7353 = vst.msk [vmem:[%s11547_s23 + $0x40] sm:$0xff] %vm7346_vm11, %v7266_v22  ;;  %v7242_v34 = vpop.permute.xlu1 %7241  ;;  %vm12518_vm12 = vmmov %vm12506_vm2  ;;  %v388_v4 = vmul.f32 0.1, %v8017_v43 }
 0x458   : > { %7352 = vst [vmem:[%s11547_s23 + $0x38] sm:$0xff] %v7330_v47  ;;  %v7338_v61 = vsel %vm7263_vm10, %v7129_v28, %v7240_v42  ;;  %v7274_v38 = vsel %vm7263_vm10, %v7240_v42, %v7242_v34  ;;  %vm12519_vm15 = vmmov %vm12506_vm2  ;;  %v389_v42 = vmul.f32 0.1, %v8019_v36  ;;  %v8020_v34 = vld [vmem:[%s8072_s17 + $0x70] sm:$0xff] }
 0x459   : > { %7376 = vst [vmem:[%s11547_s23 + $0xf8] sm:$0xff] %v7338_v61  ;;  %7377 = vst.msk [vmem:[%s11547_s23 + $0x100] sm:$0xff] %vm7346_vm11, %v7274_v38  ;;  %v397_v38 = vmul.f32 0.1, %v8020_v34 }
 0x45a   : > { %vm12520_vm13 = vmmov %vm12506_vm2 }
 0x45b   : > { %v7068_v40 = vpop.permute.xlu0 %7067  ;;  %vm12521_vm1 = vmmov %vm12506_vm2 }
 0x45c   : > { %v7315_v5 = vsel %vm12518_vm12, %v386_v45, %v7068_v40  ;;  %vm12522_vm0 = vmmov %vm12521_vm1 }
 0x45d   : > { %7354 = vst [vmem:[%s11547_s23 + $0x48] sm:$0xff] %v7315_v5  ;;  %v7070_v10 = vpop.permute.xlu1 %7069  ;;  %vm12523_vm2 = vmmov %vm12522_vm0 }
 0x45e   : > { %v7122_v55 = vsel %vm12520_vm13, %v7068_v40, %v7070_v10  ;;  %vm12524_vm3 = vmmov %vm12522_vm0 }
 0x45f   : > { %vm12525_vm8 = vmmov %vm12522_vm0 }
 0x460   : > { %v7100_v9 = vpop.permute.xlu0 %7099  ;;  %vm12526_vm7 = vmmov %vm12522_vm0 }
 0x461   : > { %v7323_v62 = vsel %vm12519_vm15, %v394_v58, %v7100_v9  ;;  %vm12527_vm4 = vmmov %vm12522_vm0 }
 0x462   : > { %7378 = vst [vmem:[%s11547_s23 + $0x108] sm:$0xff] %v7323_v62  ;;  %vm12528_vm6 = vmmov %vm12522_vm0 }
 0x463   : > { %vm12529_vm5 = vmmov %vm12522_vm0 }
 0x464   : > { %vm12530_vm14 = vmmov %vm12522_vm0 }
 0x465   : > { %v7102_v18 = vpop.permute.xlu1 %7101  ;;  %v7212_v20 = vpop.permute.xlu0 %7211  ;;  %vm12531_vm9 = vmmov %vm12522_vm0 }
 0x466   : > { %v7331_v26 = vsel %vm7263_vm10, %v7122_v55, %v7212_v20  ;;  %v7130_v59 = vsel %vm12521_vm1, %v7100_v9, %v7102_v18  ;;  %vm12532_vm12 = vmmov %vm12522_vm0 }
 0x467   : > { %7355 = vst [vmem:[%s11547_s23 + $0x50] sm:$0xff] %v7331_v26  ;;  %vm12533_vm15 = vmmov %vm12522_vm0 }
 0x468   : > { %vm12534_vm13 = vmmov %vm12522_vm0 }
 0x469   : > { %v7214_v53 = vpop.permute.xlu1 %7213  ;;  %v7244_v32 = vpop.permute.xlu0 %7243  ;;  %vm12535_vm1 = vmmov %vm12522_vm0 }
 0x46a   : > { %v7267_v1 = vsel %vm7263_vm10, %v7212_v20, %v7214_v53  ;;  %v7339_v60 = vsel %vm7263_vm10, %v7130_v59, %v7244_v32  ;;  %v8021_v53 = vld [vmem:[%s8072_s17 + $0x38] sm:$0xff] }
 0x46b   : > { %7356 = vst.msk [vmem:[%s11547_s23 + $0x58] sm:$0xff] %vm7346_vm11, %v7267_v1  ;;  %7379 = vst [vmem:[%s11547_s23 + $0x110] sm:$0xff] %v7339_v60 }
 0x46d   : > { %v7246_v24 = vpop.permute.xlu1 %7245 }
 0x46e   : > { %v7275_v21 = vsel %vm7263_vm10, %v7244_v32, %v7246_v24  ;;  %v390_v32 = vmul.f32 0.1, %v8021_v53 }
 0x46f   : > { %7380 = vst.msk [vmem:[%s11547_s23 + $0x118] sm:$0xff] %vm7346_vm11, %v7275_v21  ;;  %v8022_v21 = vld [vmem:[%s8072_s17 + $0x78] sm:$0xff] }
 0x471   : > { %v7072_v35 = vpop.permute.xlu0 %7071 }
 0x472   : > { %v7316_v11 = vsel %vm12522_vm0, %v387_v33, %v7072_v35 }
 0x473   : > { %7357 = vst [vmem:[%s11547_s23 + $0x60] sm:$0xff] %v7316_v11  ;;  %v7074_v6 = vpop.permute.xlu1 %7073 }
 0x474   : > { %v7123_v54 = vsel %vm12524_vm3, %v7072_v35, %v7074_v6  ;;  %v398_v35 = vmul.f32 0.1, %v8022_v21 }
 0x476   : > { %v7104_v56 = vpop.permute.xlu0 %7103 }
 0x477   : > { %v7324_v13 = vsel %vm12523_vm2, %v395_v25, %v7104_v56  ;;  %vm12536_vm2 = vmmov %vm12522_vm0 }
 0x478   : > { %7381 = vst [vmem:[%s11547_s23 + $0x120] sm:$0xff] %v7324_v13 }
 0x47b   : > { %v7106_v37 = vpop.permute.xlu1 %7105  ;;  %v7216_v16 = vpop.permute.xlu0 %7215 }
 0x47c   : > { %v7332_v29 = vsel %vm7263_vm10, %v7123_v54, %v7216_v16  ;;  %v7131_v27 = vsel %vm12525_vm8, %v7104_v56, %v7106_v37 }
 0x47d   : > { %7358 = vst [vmem:[%s11547_s23 + $0x68] sm:$0xff] %v7332_v29 }
 0x47f   : > { %v7218_v12 = vpop.permute.xlu1 %7217  ;;  %v7248_v2 = vpop.permute.xlu0 %7247 }
 0x480   : > { %v7268_v7 = vsel %vm7263_vm10, %v7216_v16, %v7218_v12  ;;  %v7340_v8 = vsel %vm7263_vm10, %v7131_v27, %v7248_v2 }
 0x481   : > { %7359 = vst.msk [vmem:[%s11547_s23 + $0x70] sm:$0xff] %vm7346_vm11, %v7268_v7  ;;  %7382 = vst [vmem:[%s11547_s23 + $0x128] sm:$0xff] %v7340_v8 }
 0x483   : > { %v7250_v31 = vpop.permute.xlu1 %7249 }
 0x484   : > { %v7276_v49 = vsel %vm7263_vm10, %v7248_v2, %v7250_v31 }
 0x485   : > { %7383 = vst.msk [vmem:[%s11547_s23 + $0x130] sm:$0xff] %vm7346_vm11, %v7276_v49 }
 0x487   : > { %v7076_v19 = vpop.permute.xlu0 %7075 }
 0x488   : > { %v7317_v44 = vsel %vm12526_vm7, %v388_v4, %v7076_v19 }
 0x489   : > { %7360 = vst [vmem:[%s11547_s23 + $0x78] sm:$0xff] %v7317_v44  ;;  %v7078_v3 = vpop.permute.xlu1 %7077 }
 0x48a   : > { %v7124_v30 = vsel %vm12528_vm6, %v7076_v19, %v7078_v3 }
 0x48c   : > { %v7108_v0 = vpop.permute.xlu0 %7107 }
 0x48d   : > { %v7325_v63 = vsel %vm12527_vm4, %v396_v14, %v7108_v0 }
 0x48e   : > { %7384 = vst [vmem:[%s11547_s23 + $0x138] sm:$0xff] %v7325_v63 }
 0x490   : > { %v7220_v17 = vpop.permute.xlu0 %7219 }
 0x491   : > { %v7110_v15 = vpop.permute.xlu1 %7109  ;;  %v7333_v23 = vsel %vm7263_vm10, %v7124_v30, %v7220_v17 }
 0x492   : > { %7361 = vst [vmem:[%s11547_s23 + $0x80] sm:$0xff] %v7333_v23  ;;  %v7132_v41 = vsel %vm12529_vm5, %v7108_v0, %v7110_v15 }
 0x495   : > { %v7222_v52 = vpop.permute.xlu1 %7221  ;;  %v7252_v57 = vpop.permute.xlu0 %7251 }
 0x496   : > { %v7269_v47 = vsel %vm7263_vm10, %v7220_v17, %v7222_v52  ;;  %v7341_v28 = vsel %vm7263_vm10, %v7132_v41, %v7252_v57 }
 0x497   : > { %7362 = vst.msk [vmem:[%s11547_s23 + $0x88] sm:$0xff] %vm7346_vm11, %v7269_v47  ;;  %7385 = vst [vmem:[%s11547_s23 + $0x140] sm:$0xff] %v7341_v28 }
 0x499   : > { %v7254_v22 = vpop.permute.xlu1 %7253 }
 0x49a   : > { %v7277_v61 = vsel %vm7263_vm10, %v7252_v57, %v7254_v22 }
 0x49b   : > { %7386 = vst.msk [vmem:[%s11547_s23 + $0x148] sm:$0xff] %vm7346_vm11, %v7277_v61 }
 0x49c   : > { %v7080_v50 = vpop.permute.xlu0 %7079 }
 0x49d   : > { %v7318_v45 = vsel %vm12530_vm14, %v389_v42, %v7080_v50 }
 0x49e   : > { %7363 = vst [vmem:[%s11547_s23 + $0x90] sm:$0xff] %v7318_v45 }
 0x49f   : > { %v7082_v40 = vpop.permute.xlu1 %7081 }
 0x4a0   : > { %v7125_v58 = vsel %vm12532_vm12, %v7080_v50, %v7082_v40 }
 0x4a2   : > { %v7112_v5 = vpop.permute.xlu0 %7111 }
 0x4a3   : > { %v7326_v48 = vsel %vm12531_vm9, %v397_v38, %v7112_v5 }
 0x4a4   : > { %7387 = vst [vmem:[%s11547_s23 + $0x150] sm:$0xff] %v7326_v48 }
 0x4a6   : > { %v7224_v9 = vpop.permute.xlu0 %7223 }
 0x4a7   : > { %v7114_v10 = vpop.permute.xlu1 %7113  ;;  %v7334_v62 = vsel %vm7263_vm10, %v7125_v58, %v7224_v9 }
 0x4a8   : > { %7364 = vst [vmem:[%s11547_s23 + $0x98] sm:$0xff] %v7334_v62  ;;  %v7133_v55 = vsel %vm12533_vm15, %v7112_v5, %v7114_v10 }
 0x4ab   : > { %v7226_v18 = vpop.permute.xlu1 %7225  ;;  %v7256_v20 = vpop.permute.xlu0 %7255 }
 0x4ac   : > { %v7270_v26 = vsel %vm7263_vm10, %v7224_v9, %v7226_v18  ;;  %v7342_v59 = vsel %vm7263_vm10, %v7133_v55, %v7256_v20 }
 0x4ad   : > { %7365 = vst.msk [vmem:[%s11547_s23 + $0xa0] sm:$0xff] %vm7346_vm11, %v7270_v26  ;;  %7388 = vst [vmem:[%s11547_s23 + $0x158] sm:$0xff] %v7342_v59 }
 0x4af   : > { %v7258_v1 = vpop.permute.xlu1 %7257 }
 0x4b0   : > { %v7278_v60 = vsel %vm7263_vm10, %v7256_v20, %v7258_v1 }
 0x4b1   : > { %7389 = vst.msk [vmem:[%s11547_s23 + $0x160] sm:$0xff] %vm7346_vm11, %v7278_v60 }
 0x4b2   : > { %v7084_v39 = vpop.permute.xlu0 %7083 }
 0x4b3   : > { %v7319_v33 = vsel %vm12534_vm13, %v390_v32, %v7084_v39  ;;  %v7086_v24 = vpop.permute.xlu1 %7085 }
 0x4b4   : > { %7366 = vst [vmem:[%s11547_s23 + $0xa8] sm:$0xff] %v7319_v33  ;;  %v7126_v6 = vsel %vm12522_vm0, %v7084_v39, %v7086_v24 }
 0x4b8   : > { %v7116_v11 = vpop.permute.xlu0 %7115 }
 0x4b9   : > { %v7327_v51 = vsel %vm12535_vm1, %v398_v35, %v7116_v11  ;;  %v7118_v25 = vpop.permute.xlu1 %7117 }
 0x4ba   : > { %7390 = vst [vmem:[%s11547_s23 + $0x168] sm:$0xff] %v7327_v51  ;;  %v7134_v16 = vsel %vm12536_vm2, %v7116_v11, %v7118_v25 }
 0x4bc   : > { %v7228_v56 = vpop.permute.xlu0 %7227 }
 0x4bd   : > { %v7335_v13 = vsel %vm7263_vm10, %v7126_v6, %v7228_v56 }
 0x4be   : > { %7367 = vst [vmem:[%s11547_s23 + $0xb0] sm:$0xff] %v7335_v13 }
 0x4bf   : > { %v7230_v54 = vpop.permute.xlu1 %7229 }
 0x4c0   : > { %v7271_v37 = vsel %vm7263_vm10, %v7228_v56, %v7230_v54  ;;  %v7260_v29 = vpop.permute.xlu0 %7259 }
 0x4c1   : > { %7368 = vst.msk [vmem:[%s11547_s23 + $0xb8] sm:$0xff] %vm7346_vm11, %v7271_v37  ;;  %v7343_v27 = vsel %vm7263_vm10, %v7134_v16, %v7260_v29 }
 0x4c2   : > { %7391 = vst [vmem:[%s11547_s23 + $0x170] sm:$0xff] %v7343_v27 }
 0x4c3   : > { %v7262_v12 = vpop.permute.xlu1 %7261 }
 0x4c4   : > { %v7279_v2 = vsel %vm7263_vm10, %v7260_v29, %v7262_v12 }
 0x4c5   : > { %7392 = vst.msk [vmem:[%s11547_s23 + $0x178] sm:$0xff] %vm7346_vm11, %v7279_v2 }
 0x4c6 PF: > { %s12_s9 = sadd.s32 1, %s8029_s9  }
 0x4c7   : > { %p9_p4 = scmp.ge.s32.totalorder %s12_s9, 4  }
 0x4c9   :  { %11 = sbr.rel (!%p9_p4) target bundleno = 1 (0x1), region = 58 }

</bundles_post_ra>
